<compile_context>
chip_gen: v5e
topology: v5e:2x2
jax: 0.10.0
libtpu: 0.0.40
codegen_flags: <defaults>
</compile_context>

<pallas_src>
import functools

import jax
import jax.numpy as jnp
from jax.experimental import pallas as pl
from jax.experimental.pallas import tpu as pltpu


def boundary_decision_kernel(x_ref, mask_ref, pad_ref, w_ref, out_ref,
                             qk_ref, vt_ref, *, n_heads, head_dim, tq):
    """Grid = (B, S // TQ); one (batch, query-tile) per step.

    x_ref    : (1, S, H)        f32   full sequence for this batch (reused across q-tiles)
    mask_ref : (1, TQ, S)       int8  attention mask rows for this q-tile, 1 == masked
    pad_ref  : (1, 1, TQ)       int8  att_mask[b, -1, q-tile] (output pad mask), lane-dense
    w_ref    : (H, 2*N*D + N)   f32   fused [Wq | Wk | Wv]
    out_ref  : (1, 1, TQ)       f32   lane-dense output row for this q-tile
    qk_ref   : (S, 2*N*D)       f32   VMEM scratch: Q|K projection for the whole sequence
    vt_ref   : (N, S)           f32   VMEM scratch: V projection, transposed (keys on lanes)
    """
    qt = pl.program_id(1)
    S = x_ref.shape[1]
    ND = n_heads * head_dim
    att_scale = 1.0 / (head_dim ** 0.5)

    # Project the whole sequence once per batch (first q-tile) into scratch.
    @pl.when(qt == 0)
    def _():
        proj = jnp.dot(x_ref[0], w_ref[...],
                       preferred_element_type=jnp.float32)      # (S, 2*ND + N)
        qk_ref[...] = proj[:, :2 * ND]
        vt_ref[...] = jnp.transpose(proj[:, 2 * ND:])            # (N, S)

    q_start = pl.multiple_of(qt * tq, tq)
    qk_tile = qk_ref[pl.ds(q_start, tq), :]                      # (TQ, 2*ND)
    q_all = qk_tile[:, :ND]                                      # (TQ, ND)
    k_all = qk_ref[:, ND:]                                       # (S, ND)
    vt = vt_ref[...]                                             # (N, S)

    masked = mask_ref[0] != 0                                    # (TQ, S) bool

    # Accumulate p_h * v_h over heads on the VPU; one lane reduce at the end
    # replaces n_heads width-1 MXU matmuls.
    acc = jnp.zeros((tq, S), jnp.float32)
    for h in range(n_heads):                                     # small, unrolled
        qh = q_all[:, h * head_dim:(h + 1) * head_dim]           # (TQ, D)
        kh = k_all[:, h * head_dim:(h + 1) * head_dim]           # (S, D)
        # score = q @ k^T (contraction over D) on the MXU.
        s = jax.lax.dot_general(qh, kh, (((1,), (1,)), ((), ())),
                                preferred_element_type=jnp.float32) * att_scale
        s = jnp.where(masked, -60000.0, s)
        # Softmax over keys (lane axis). Denominator >= 1 (max subtracted), so the
        # approximate reciprocal cannot divide by zero.
        p = jnp.exp(s - jnp.max(s, axis=-1, keepdims=True))
        p = p * pl.reciprocal(jnp.sum(p, axis=-1, keepdims=True), approx=True)
        acc = acc + p * vt[h:h + 1, :]                           # broadcast over queries

    out_col = jnp.sum(acc, axis=-1, keepdims=True)               # (TQ, 1)
    out_row = jnp.transpose(out_col)                             # (1, TQ) lane-dense
    out_row = jnp.where(pad_ref[0] != 0, -60000.0, out_row)
    out_ref[0] = jax.nn.sigmoid(out_row)


def boundary_decision_forward(x, mem, att_mask, w_qk, w_v, *,
                              n_heads, head_dim, q_tile=128):
    """Mirror of BoundaryDecision.forward (eval mode, mem=None path).

    Returns (ind, out) where ind = nonzero indices of out (as a tuple) and
    out has shape (B, S, 1).
    """
    if mem is not None and getattr(mem, "size", 0) > 0:
        raise NotImplementedError("only the mem=None path is shape-consistent")

    B, S, H = x.shape
    ND = n_heads * head_dim

    # Fused projection weight [Wq | Wk | Wv]  -> one MXU push per batch.
    w_fused = jnp.concatenate([w_qk, w_v], axis=1)               # (H, 2*ND + N)

    # Mask as int8 (4x less DMA than f32); pad mask = last query row, lane-dense.
    mask_i8 = att_mask.astype(jnp.int8)                          # (B, S, S)
    pad_i8 = mask_i8[:, S - 1:S, :]                              # (B, 1, S)

    # Query tiling: bounds (TQ, S) intermediates (VMEM pressure on v7x) and adds
    # grid steps; fall back to a single tile when S is not a multiple of q_tile.
    TQ = q_tile if (S % q_tile == 0) else S
    NQ = S // TQ

    kernel = functools.partial(boundary_decision_kernel,
                               n_heads=n_heads, head_dim=head_dim, tq=TQ)

    out_rows = pl.pallas_call(
        kernel,
        out_shape=jax.ShapeDtypeStruct((B, 1, S), jnp.float32),
        grid=(B, NQ),
        in_specs=[
            pl.BlockSpec((1, S, H), lambda b, qt: (b, 0, 0)),          # x (full seq)
            pl.BlockSpec((1, TQ, S), lambda b, qt: (b, qt, 0)),        # mask q-tile
            pl.BlockSpec((1, 1, TQ), lambda b, qt: (b, 0, qt)),        # pad row tile
            pl.BlockSpec((H, 2 * ND + n_heads), lambda b, qt: (0, 0)),  # fused W
        ],
        out_specs=pl.BlockSpec((1, 1, TQ), lambda b, qt: (b, 0, qt)),
        scratch_shapes=[
            pltpu.VMEM((S, 2 * ND), jnp.float32),                      # Q|K projection
            pltpu.VMEM((n_heads, S), jnp.float32),                     # V^T
        ],
        compiler_params=pltpu.CompilerParams(
            dimension_semantics=("parallel", "arbitrary")),
    )(x, mask_i8, pad_i8, w_fused)

    out = out_rows.reshape(B, S, 1)                              # (B,1,S) -> (B,S,1)
    # nonzero (data-dependent shape) is glue, computed eagerly outside the kernel.
    ind = jnp.nonzero(out)
    return ind, out


def reference_forward(x, att_mask, w_qk, w_v, *, n_heads, head_dim):
    """Pure-JAX reference matching the PyTorch module (mem=None, eval mode)."""
    B, S, H = x.shape
    qk = x @ w_qk
    q, k = jnp.split(qk, 2, axis=-1)
    v = x @ w_v
    q = q.reshape(B, S, n_heads, head_dim)
    k = k.reshape(B, S, n_heads, head_dim)
    vv = v.reshape(B, S, n_heads, 1)
    score = jnp.einsum('bqnd,bknd->bqkn', q, k) * (1.0 / head_dim ** 0.5)
    score = jnp.where(att_mask[..., None], -60000.0, score)
    prob = jax.nn.softmax(score, axis=2)
    attended = jnp.einsum('bqkn,bknd->bqnd', prob, vv)
    out = attended.sum(2)                       # (B, S, 1)
    padded = att_mask[:, -1]                    # (B, S)
    out = jnp.where(padded[..., None], -60000.0, out)
    return jax.nn.sigmoid(out)


if __name__ == "__main__":
    # Small but tiling-exercising shapes: 2 query tiles of 128 per batch.
    B, S, H = 2, 256, 32
    n_heads, head_dim = 4, 8

    key = jax.random.PRNGKey(0)
    kx, kqk, kv = jax.random.split(key, 3)

    x = jax.random.normal(kx, (B, S, H), dtype=jnp.float32)
    # Deterministic parameter init (shapes from __init__): qk_net / v_net weights.
    w_qk = jax.random.normal(kqk, (H, 2 * n_heads * head_dim), dtype=jnp.float32) * 0.05
    w_v = jax.random.normal(kv, (H, n_heads), dtype=jnp.float32) * 0.05

    # att_mask: True == masked. Causal mask plus 5 padded trailing positions in batch 1.
    causal = jnp.triu(jnp.ones((S, S), dtype=jnp.bool_), k=1)
    pad = jnp.zeros((B, S), dtype=jnp.bool_).at[1, S - 5:].set(True)
    att_mask = causal[None, :, :] | pad[:, None, :]

    ind, out = boundary_decision_forward(
        x, None, att_mask, w_qk, w_v, n_heads=n_heads, head_dim=head_dim)
    out = jax.block_until_ready(out)

    ref = reference_forward(x, att_mask, w_qk, w_v,
                            n_heads=n_heads, head_dim=head_dim)
    assert out.shape == (B, S, 1)
    # Tolerance is relaxed slightly because the softmax denominator uses the EUP
    # approximate reciprocal (pl.reciprocal(..., approx=True)).
    assert jnp.allclose(out, ref, atol=1e-3, rtol=1e-3), (
        f"max abs diff {jnp.max(jnp.abs(out - ref))}")
    assert len(ind) == 3  # nonzero(as_tuple=True) on a 3-D tensor

    print("KERNEL_OK")
</pallas_src>

<mosaic_0001>
module attributes {stable_mosaic.version = 11 : i64} {
  func.func @boundary_decision_kernel(%arg0: i32, %arg1: i32, %arg2: memref<1x256x32xf32, #tpu.memory_space<vmem>>, %arg3: memref<1x128x256xi8, #tpu.memory_space<vmem>>, %arg4: memref<1x1x128xi8, #tpu.memory_space<vmem>>, %arg5: memref<32x68xf32, #tpu.memory_space<vmem>>, %arg6: memref<1x1x128xf32, #tpu.memory_space<vmem>>, %arg7: memref<256x64xf32, #tpu.memory_space<vmem>>, %arg8: memref<4x256xf32, #tpu.memory_space<vmem>>) attributes {dimension_semantics = [#tpu.dimension_semantics<parallel>, #tpu.dimension_semantics<arbitrary>], iteration_bounds = array<i64: 2, 2>, scalar_prefetch = 0 : i64, scratch_operands = 2 : i64, tpu.core_type = #tpu.core_type<tc>, window_params = [{transform_indices = @transform_0, window_bounds = array<i64: 1, 256, 32>}, {transform_indices = @transform_1, window_bounds = array<i64: 1, 128, 256>}, {transform_indices = @transform_2, window_bounds = array<i64: 1, 1, 128>}, {pipeline_mode = #tpu.pipeline_mode<synchronous>, transform_indices = @transform_3, window_bounds = array<i64: 32, 68>}, {transform_indices = @transform_4, window_bounds = array<i64: 1, 1, 128>}]} {
    %c0_i32 = arith.constant 0 : i32
    %0 = arith.cmpi eq, %arg1, %c0_i32 : i32
    %1 = arith.extui %0 : i1 to i32
    %c0_i32_0 = arith.constant 0 : i32
    %2 = arith.cmpi ne, %1, %c0_i32_0 : i32
    scf.if %2 {
      %c0_37 = arith.constant 0 : index
      %c0_38 = arith.constant 0 : index
      %c0_39 = arith.constant 0 : index
      %116 = vector.load %arg2[%c0_37, %c0_38, %c0_39] : memref<1x256x32xf32, #tpu.memory_space<vmem>>, vector<1x256x32xf32>
      %117 = vector.shape_cast %116 : vector<1x256x32xf32> to vector<256x32xf32>
      %c0_40 = arith.constant 0 : index
      %c0_41 = arith.constant 0 : index
      %118 = vector.load %arg5[%c0_40, %c0_41] : memref<32x68xf32, #tpu.memory_space<vmem>>, vector<32x68xf32>
      %cst_42 = arith.constant dense<0.000000e+00> : vector<256x68xf32>
      %119 = tpu.matmul %117, %118, %cst_42 {dimension_numbers = #tpu.dot_dimension_numbers<[1], [0], [0], [1], [0, 0, 1, 1], [], []>} : vector<256x32xf32>, vector<32x68xf32>, vector<256x68xf32> -> vector<256x68xf32>
      %120 = vector.extract_strided_slice %119 {offsets = [0, 0], sizes = [256, 64], strides = [1, 1]} : vector<256x68xf32> to vector<256x64xf32>
      %c0_43 = arith.constant 0 : index
      %c0_44 = arith.constant 0 : index
      %121 = vector.load %arg7[%c0_43, %c0_44] : memref<256x64xf32, #tpu.memory_space<vmem>>, vector<256x64xf32>
      tpu.vector_store %arg7[%c0_43, %c0_44], %120 {strides = array<i32>} : memref<256x64xf32, #tpu.memory_space<vmem>>, vector<256x64xf32>,
      %122 = vector.extract_strided_slice %119 {offsets = [0, 64], sizes = [256, 4], strides = [1, 1]} : vector<256x68xf32> to vector<256x4xf32>
      %123 = tpu.transpose %122, [1, 0] : vector<256x4xf32> -> vector<4x256xf32>
      %c0_45 = arith.constant 0 : index
      %c0_46 = arith.constant 0 : index
      %124 = vector.load %arg8[%c0_45, %c0_46] : memref<4x256xf32, #tpu.memory_space<vmem>>, vector<4x256xf32>
      tpu.vector_store %arg8[%c0_45, %c0_46], %123 {strides = array<i32>} : memref<4x256xf32, #tpu.memory_space<vmem>>, vector<4x256xf32>,
    } else {
    }
    %c128_i32 = arith.constant 128 : i32
    %3 = arith.muli %arg1, %c128_i32 : i32
    %4 = tpu.assume_multiple %3, 128 : i32
    %5 = arith.index_cast %4 : i32 to index
    %c0 = arith.constant 0 : index
    %6 = vector.load %arg7[%5, %c0] : memref<256x64xf32, #tpu.memory_space<vmem>>, vector<128x64xf32>
    %7 = vector.extract_strided_slice %6 {offsets = [0, 0], sizes = [128, 32], strides = [1, 1]} : vector<128x64xf32> to vector<128x32xf32>
    %c0_1 = arith.constant 0 : index
    %c32 = arith.constant 32 : index
    %8 = vector.load %arg7[%c0_1, %c32] : memref<256x64xf32, #tpu.memory_space<vmem>>, vector<256x32xf32>
    %c0_2 = arith.constant 0 : index
    %c0_3 = arith.constant 0 : index
    %9 = vector.load %arg8[%c0_2, %c0_3] : memref<4x256xf32, #tpu.memory_space<vmem>>, vector<4x256xf32>
    %c0_4 = arith.constant 0 : index
    %c0_5 = arith.constant 0 : index
    %c0_6 = arith.constant 0 : index
    %10 = vector.load %arg3[%c0_4, %c0_5, %c0_6] : memref<1x128x256xi8, #tpu.memory_space<vmem>>, vector<1x128x256xi8>
    %11 = vector.shape_cast %10 : vector<1x128x256xi8> to vector<128x256xi8>
    %c0_i8 = arith.constant 0 : i8
    %12 = vector.broadcast %c0_i8 : i8 to vector<128x256xi8>
    %13 = arith.cmpi ne, %11, %12 : vector<128x256xi8>
    %cst = arith.constant 0.000000e+00 : f32
    %14 = vector.broadcast %cst : f32 to vector<128x256xf32>
    %15 = vector.extract_strided_slice %7 {offsets = [0, 0], sizes = [128, 8], strides = [1, 1]} : vector<128x32xf32> to vector<128x8xf32>
    %16 = vector.extract_strided_slice %8 {offsets = [0, 0], sizes = [256, 8], strides = [1, 1]} : vector<256x32xf32> to vector<256x8xf32>
    %cst_7 = arith.constant dense<0.000000e+00> : vector<128x256xf32>
    %17 = tpu.matmul %15, %16, %cst_7 {dimension_numbers = #tpu.dot_dimension_numbers<[1], [1], [0], [0], [0, 0, 1, 0], [], []>} : vector<128x8xf32>, vector<256x8xf32>, vector<128x256xf32> -> vector<128x256xf32>
    %cst_8 = arith.constant 0.353553385 : f32
    %18 = vector.broadcast %cst_8 : f32 to vector<128x256xf32>
    %19 = arith.mulf %17, %18 : vector<128x256xf32>
    %cst_9 = arith.constant -6.000000e+04 : f32
    %20 = vector.broadcast %cst_9 : f32 to vector<128x256xf32>
    %21 = arith.select %13, %20, %19 : vector<128x256xi1>, vector<128x256xf32>
    %cst_10 = arith.constant dense<0xFF800000> : vector<128xf32>
    %22 = vector.multi_reduction <maximumf>, %21, %cst_10 [1] : vector<128x256xf32> to vector<128xf32>
    %23 = vector.shape_cast %22 : vector<128xf32> to vector<128x1xf32>
    %24 = vector.broadcast %23 : vector<128x1xf32> to vector<128x256xf32>
    %25 = arith.subf %21, %24 : vector<128x256xf32>
    %26 = math.exp %25 : vector<128x256xf32>
    %cst_11 = arith.constant dense<0.000000e+00> : vector<128xf32>
    %27 = vector.multi_reduction <add>, %26, %cst_11 [1] : vector<128x256xf32> to vector<128xf32>
    %28 = vector.shape_cast %27 : vector<128xf32> to vector<128x1xf32>
    %29 = tpu.reciprocal %28 {approx = true} : vector<128x1xf32> -> vector<128x1xf32>
    %30 = vector.broadcast %29 : vector<128x1xf32> to vector<128x256xf32>
    %31 = arith.mulf %26, %30 : vector<128x256xf32>
    %32 = vector.extract_strided_slice %9 {offsets = [0, 0], sizes = [1, 256], strides = [1, 1]} : vector<4x256xf32> to vector<1x256xf32>
    %33 = vector.broadcast %32 : vector<1x256xf32> to vector<128x256xf32>
    %34 = arith.mulf %31, %33 : vector<128x256xf32>
    %35 = arith.addf %14, %34 : vector<128x256xf32>
    %36 = vector.extract_strided_slice %7 {offsets = [0, 8], sizes = [128, 8], strides = [1, 1]} : vector<128x32xf32> to vector<128x8xf32>
    %37 = vector.extract_strided_slice %8 {offsets = [0, 8], sizes = [256, 8], strides = [1, 1]} : vector<256x32xf32> to vector<256x8xf32>
    %cst_12 = arith.constant dense<0.000000e+00> : vector<128x256xf32>
    %38 = tpu.matmul %36, %37, %cst_12 {dimension_numbers = #tpu.dot_dimension_numbers<[1], [1], [0], [0], [0, 0, 1, 0], [], []>} : vector<128x8xf32>, vector<256x8xf32>, vector<128x256xf32> -> vector<128x256xf32>
    %cst_13 = arith.constant 0.353553385 : f32
    %39 = vector.broadcast %cst_13 : f32 to vector<128x256xf32>
    %40 = arith.mulf %38, %39 : vector<128x256xf32>
    %cst_14 = arith.constant -6.000000e+04 : f32
    %41 = vector.broadcast %cst_14 : f32 to vector<128x256xf32>
    %42 = arith.select %13, %41, %40 : vector<128x256xi1>, vector<128x256xf32>
    %cst_15 = arith.constant dense<0xFF800000> : vector<128xf32>
    %43 = vector.multi_reduction <maximumf>, %42, %cst_15 [1] : vector<128x256xf32> to vector<128xf32>
    %44 = vector.shape_cast %43 : vector<128xf32> to vector<128x1xf32>
    %45 = vector.broadcast %44 : vector<128x1xf32> to vector<128x256xf32>
    %46 = arith.subf %42, %45 : vector<128x256xf32>
    %47 = math.exp %46 : vector<128x256xf32>
    %cst_16 = arith.constant dense<0.000000e+00> : vector<128xf32>
    %48 = vector.multi_reduction <add>, %47, %cst_16 [1] : vector<128x256xf32> to vector<128xf32>
    %49 = vector.shape_cast %48 : vector<128xf32> to vector<128x1xf32>
    %50 = tpu.reciprocal %49 {approx = true} : vector<128x1xf32> -> vector<128x1xf32>
    %51 = vector.broadcast %50 : vector<128x1xf32> to vector<128x256xf32>
    %52 = arith.mulf %47, %51 : vector<128x256xf32>
    %53 = vector.extract_strided_slice %9 {offsets = [1, 0], sizes = [1, 256], strides = [1, 1]} : vector<4x256xf32> to vector<1x256xf32>
    %54 = vector.broadcast %53 : vector<1x256xf32> to vector<128x256xf32>
    %55 = arith.mulf %52, %54 : vector<128x256xf32>
    %56 = arith.addf %35, %55 : vector<128x256xf32>
    %57 = vector.extract_strided_slice %7 {offsets = [0, 16], sizes = [128, 8], strides = [1, 1]} : vector<128x32xf32> to vector<128x8xf32>
    %58 = vector.extract_strided_slice %8 {offsets = [0, 16], sizes = [256, 8], strides = [1, 1]} : vector<256x32xf32> to vector<256x8xf32>
    %cst_17 = arith.constant dense<0.000000e+00> : vector<128x256xf32>
    %59 = tpu.matmul %57, %58, %cst_17 {dimension_numbers = #tpu.dot_dimension_numbers<[1], [1], [0], [0], [0, 0, 1, 0], [], []>} : vector<128x8xf32>, vector<256x8xf32>, vector<128x256xf32> -> vector<128x256xf32>
    %cst_18 = arith.constant 0.353553385 : f32
    %60 = vector.broadcast %cst_18 : f32 to vector<128x256xf32>
    %61 = arith.mulf %59, %60 : vector<128x256xf32>
    %cst_19 = arith.constant -6.000000e+04 : f32
    %62 = vector.broadcast %cst_19 : f32 to vector<128x256xf32>
    %63 = arith.select %13, %62, %61 : vector<128x256xi1>, vector<128x256xf32>
    %cst_20 = arith.constant dense<0xFF800000> : vector<128xf32>
    %64 = vector.multi_reduction <maximumf>, %63, %cst_20 [1] : vector<128x256xf32> to vector<128xf32>
    %65 = vector.shape_cast %64 : vector<128xf32> to vector<128x1xf32>
    %66 = vector.broadcast %65 : vector<128x1xf32> to vector<128x256xf32>
    %67 = arith.subf %63, %66 : vector<128x256xf32>
    %68 = math.exp %67 : vector<128x256xf32>
    %cst_21 = arith.constant dense<0.000000e+00> : vector<128xf32>
    %69 = vector.multi_reduction <add>, %68, %cst_21 [1] : vector<128x256xf32> to vector<128xf32>
    %70 = vector.shape_cast %69 : vector<128xf32> to vector<128x1xf32>
    %71 = tpu.reciprocal %70 {approx = true} : vector<128x1xf32> -> vector<128x1xf32>
    %72 = vector.broadcast %71 : vector<128x1xf32> to vector<128x256xf32>
    %73 = arith.mulf %68, %72 : vector<128x256xf32>
    %74 = vector.extract_strided_slice %9 {offsets = [2, 0], sizes = [1, 256], strides = [1, 1]} : vector<4x256xf32> to vector<1x256xf32>
    %75 = vector.broadcast %74 : vector<1x256xf32> to vector<128x256xf32>
    %76 = arith.mulf %73, %75 : vector<128x256xf32>
    %77 = arith.addf %56, %76 : vector<128x256xf32>
    %78 = vector.extract_strided_slice %7 {offsets = [0, 24], sizes = [128, 8], strides = [1, 1]} : vector<128x32xf32> to vector<128x8xf32>
    %79 = vector.extract_strided_slice %8 {offsets = [0, 24], sizes = [256, 8], strides = [1, 1]} : vector<256x32xf32> to vector<256x8xf32>
    %cst_22 = arith.constant dense<0.000000e+00> : vector<128x256xf32>
    %80 = tpu.matmul %78, %79, %cst_22 {dimension_numbers = #tpu.dot_dimension_numbers<[1], [1], [0], [0], [0, 0, 1, 0], [], []>} : vector<128x8xf32>, vector<256x8xf32>, vector<128x256xf32> -> vector<128x256xf32>
    %cst_23 = arith.constant 0.353553385 : f32
    %81 = vector.broadcast %cst_23 : f32 to vector<128x256xf32>
    %82 = arith.mulf %80, %81 : vector<128x256xf32>
    %cst_24 = arith.constant -6.000000e+04 : f32
    %83 = vector.broadcast %cst_24 : f32 to vector<128x256xf32>
    %84 = arith.select %13, %83, %82 : vector<128x256xi1>, vector<128x256xf32>
    %cst_25 = arith.constant dense<0xFF800000> : vector<128xf32>
    %85 = vector.multi_reduction <maximumf>, %84, %cst_25 [1] : vector<128x256xf32> to vector<128xf32>
    %86 = vector.shape_cast %85 : vector<128xf32> to vector<128x1xf32>
    %87 = vector.broadcast %86 : vector<128x1xf32> to vector<128x256xf32>
    %88 = arith.subf %84, %87 : vector<128x256xf32>
    %89 = math.exp %88 : vector<128x256xf32>
    %cst_26 = arith.constant dense<0.000000e+00> : vector<128xf32>
    %90 = vector.multi_reduction <add>, %89, %cst_26 [1] : vector<128x256xf32> to vector<128xf32>
    %91 = vector.shape_cast %90 : vector<128xf32> to vector<128x1xf32>
    %92 = tpu.reciprocal %91 {approx = true} : vector<128x1xf32> -> vector<128x1xf32>
    %93 = vector.broadcast %92 : vector<128x1xf32> to vector<128x256xf32>
    %94 = arith.mulf %89, %93 : vector<128x256xf32>
    %95 = vector.extract_strided_slice %9 {offsets = [3, 0], sizes = [1, 256], strides = [1, 1]} : vector<4x256xf32> to vector<1x256xf32>
    %96 = vector.broadcast %95 : vector<1x256xf32> to vector<128x256xf32>
    %97 = arith.mulf %94, %96 : vector<128x256xf32>
    %98 = arith.addf %77, %97 : vector<128x256xf32>
    %cst_27 = arith.constant dense<0.000000e+00> : vector<128xf32>
    %99 = vector.multi_reduction <add>, %98, %cst_27 [1] : vector<128x256xf32> to vector<128xf32>
    %100 = vector.shape_cast %99 : vector<128xf32> to vector<128x1xf32>
    %101 = tpu.transpose %100, [1, 0] : vector<128x1xf32> -> vector<1x128xf32>
    %c0_28 = arith.constant 0 : index
    %c0_29 = arith.constant 0 : index
    %c0_30 = arith.constant 0 : index
    %102 = vector.load %arg4[%c0_28, %c0_29, %c0_30] : memref<1x1x128xi8, #tpu.memory_space<vmem>>, vector<1x1x128xi8>
    %103 = vector.shape_cast %102 : vector<1x1x128xi8> to vector<1x128xi8>
    %c0_i8_31 = arith.constant 0 : i8
    %104 = vector.broadcast %c0_i8_31 : i8 to vector<1x128xi8>
    %105 = arith.cmpi ne, %103, %104 : vector<1x128xi8>
    %cst_32 = arith.constant -6.000000e+04 : f32
    %106 = vector.broadcast %cst_32 : f32 to vector<1x128xf32>
    %107 = arith.select %105, %106, %101 : vector<1x128xi1>, vector<1x128xf32>
    %108 = arith.negf %107 : vector<1x128xf32>
    %109 = math.exp %108 : vector<1x128xf32>
    %cst_33 = arith.constant 1.000000e+00 : f32
    %110 = vector.broadcast %cst_33 : f32 to vector<1x128xf32>
    %111 = arith.addf %110, %109 : vector<1x128xf32>
    %112 = arith.divf %110, %111 : vector<1x128xf32>
    %c0_34 = arith.constant 0 : index
    %c0_35 = arith.constant 0 : index
    %c0_36 = arith.constant 0 : index
    %113 = vector.load %arg6[%c0_34, %c0_35, %c0_36] : memref<1x1x128xf32, #tpu.memory_space<vmem>>, vector<1x1x128xf32>
    %114 = vector.shape_cast %113 : vector<1x1x128xf32> to vector<1x128xf32>
    %115 = vector.shape_cast %112 : vector<1x128xf32> to vector<1x1x128xf32>
    tpu.vector_store %arg6[%c0_34, %c0_35, %c0_36], %115 {strides = array<i32>} : memref<1x1x128xf32, #tpu.memory_space<vmem>>, vector<1x1x128xf32>,
    return
  }
  func.func @transform_0(%arg0: i32, %arg1: i32) -> (i32, i32, i32) {
    %c0_i32 = arith.constant 0 : i32
    %c0_i32_0 = arith.constant 0 : i32
    %c0_i32_1 = arith.constant 0 : i32
    return %arg0, %c0_i32, %c0_i32_0 : i32, i32, i32
  }
  func.func @transform_1(%arg0: i32, %arg1: i32) -> (i32, i32, i32) {
    %c0_i32 = arith.constant 0 : i32
    %c0_i32_0 = arith.constant 0 : i32
    return %arg0, %arg1, %c0_i32 : i32, i32, i32
  }
  func.func @transform_2(%arg0: i32, %arg1: i32) -> (i32, i32, i32) {
    %c0_i32 = arith.constant 0 : i32
    %c0_i32_0 = arith.constant 0 : i32
    return %arg0, %c0_i32, %arg1 : i32, i32, i32
  }
  func.func @transform_3(%arg0: i32, %arg1: i32) -> (i32, i32) {
    %c0_i32 = arith.constant 0 : i32
    %c0_i32_0 = arith.constant 0 : i32
    %c0_i32_1 = arith.constant 0 : i32
    return %c0_i32, %c0_i32_0 : i32, i32
  }
  func.func @transform_4(%arg0: i32, %arg1: i32) -> (i32, i32, i32) {
    %c0_i32 = arith.constant 0 : i32
    %c0_i32_0 = arith.constant 0 : i32
    return %arg0, %c0_i32, %arg1 : i32, i32, i32
  }
}

</mosaic_0001>

<bundles_post_ra>
// kernel: tpu_custom_call.1
= control target key start
LH: loop header
LB: loop body
LE: loop exit
PB: predicated region body
PF: predicated region fallthrough
CT: control target
= control target key end

     0   :  { %9 = vsyncpa [#allocation5], 0  ;;  %s8291_s0 = inlined_call_operand.vmem [shape: f32[2,256,32], index: 0, kind: input, shape index: {}]   ;;  %s8292_s1 = inlined_call_operand.vmem [shape: s8[2,256,256], index: 1, kind: input, shape index: {}]   ;;  %s8293_s2 = inlined_call_operand.vmem [shape: s8[2,1,256], index: 2, kind: input, shape index: {}]   ;;  %s8294_s3 = inlined_call_operand.vmem [shape: f32[32,68], index: 3, kind: input, shape index: {}]   ;;  %s8295_s4 = inlined_call_operand.hbm [shape: f32[2,1,256], index: 4, kind: output, shape index: {}]  }
   0x1   :  { %11 = vsyncpa [#allocation5 + $0x1], 0  ;;  %s4997_s15 = smov 0   ;;  %s4999_s16 = smov 0  }
   0x2   :  { %s5001_s17 = smov 0   ;;  %s5003_s18 = smov 0  }
   0x3   :  { %s5005_s19 = smov 0   ;;  %s5007_s20 = smov 0  }
   0x4   :  { %s5009_s21 = smov 0   ;;  %s5011_s22 = smov 0  }
   0x5 LB: > { %8564 = sst [smem:[#allocation7_spill]] %s4941_s17  ;;  %s4024_s23 = sadd.s32 4294967295, %s4961_s22   ;;  %s4961_s22 = sphi %s5011_s22, %s17_s22   ;;  %s4957_s21 = sphi %s5009_s21, %s9225_s21   ;;  %s4953_s20 = sphi %s5007_s20, %s9224_s20   ;;  %s4949_s19 = sphi %s5005_s19, %s9223_s19   ;;  %s4945_s18 = sphi %s5003_s18, %s9222_s18   ;;  %s4941_s17 = sphi %s5001_s17, %s9221_s17   ;;  %s4937_s16 = sphi %s4999_s16, %s9227_s16   ;;  %s4933_s15 = sphi %s4997_s15, %s9226_s15  }
   0x6   : > { %8565 = sst [smem:[#allocation8_spill]] %s4953_s20  ;;  %s4025_s24 = sadd.s32 4294967294, %s4961_s22  }
   0x7   : > { %8566 = sst [smem:[#allocation9_spill]] %s4957_s21  ;;  %s26_s25 = sadd.s32 1, %s4953_s20 }
   0x8   : > { %p27_p0 = scmp.ge.s32.totalorder %s26_s25, 2  ;;  %s29_s26 = sadd.s32 1, %s4957_s21 }
   0x9   : > { %p151_p1 = scmp.ne.s32.totalorder %s4941_s17, %s4937_s16  ;;  %p152_p2 = scmp.eq.s32.totalorder %s4024_s23, 3 }
   0xa   : > { %s9229_s25 = smov (%p27_p0, %s26_s25), 0  ;;  %s9231_s26 = smov (!%p27_p0, %s29_s26), %s4957_s21 }
   0xb   : > { %8567 = sst [smem:[#allocation10_spill]] %s9229_s25  ;;  %s137_s27 = ssub.s32 %s4953_s20, %s9229_s25 }
   0xc   : > { %p5048_p3 = por %p152_p2, %p151_p1  ;;  %p31_p4 = scmp.ge.s32.totalorder %s9231_s26, 2 }
   0xd   : > { %p157_p5 = scmp.ne.s32.totalorder %s4937_s16, %s4933_s15  ;;  %p158_p6 = scmp.eq.s32.totalorder %s4025_s24, 3 }
   0xe   : > { %p4028_p7 = scmp.ge.s32.totalorder %s4961_s22, 1  ;;  %s9233_s26 = smov (%p31_p4, %s9231_s26), 0 }
   0xf   : > { %8569 = sst [smem:[#allocation11_spill]] %s9233_s26  ;;  %p5057_p8 = por %p158_p6, %p157_p5 }
  0x10   : > { %p211_p9 = scmp.lt.s32.totalorder %s4961_s22, 5  ;;  %s136_s30 = ssub.s32 %s4957_s21, %s9233_s26 }
  0x11   : > { %s141_s5 = sadd.s32 1, %s4941_s17  ;;  %s138_s6 = sor.u32 %s137_s27, %s136_s30 }
  0x12   : > { %p212_p10 = pnand %p4028_p7, %p211_p9  ;;  %p139_p11 = scmp.eq.s32.totalorder %s138_s6, 0 }
  0x14   : > { %s5066_s7 = scalar_select %p139_p11, %s4941_s17, %s141_s5  }
  0x15   : > { %215 = sbr.rel (%p212_p10) target bundleno = 2969 (0xb99), region = 36 }
  0x16   : > { %8571 = sst [smem:[#allocation12_spill]] %s5066_s7 }
  0x1a   : > { %p253_p12 = scmp.lt.s32.totalorder %s4949_s19, 1  ;;  %s4031_s9 = sshll.u32 %s4945_s18, 2 }
  0x1b   : > { %p261_p13 = scmp.lt.s32.totalorder %s4031_s9, 7  ;;  %p271_p0 = scmp.lt.s32.totalorder %s4945_s18, 1 }
  0x1c   : > { %s254_s10 = scalar_select %p253_p12, %s4949_s19, 1 }
  0x1d   : > { %s9235_s9 = smov (!%p261_p13, %s4031_s9), 7  ;;  %p4036_p1 = scmp.ne.s32.totalorder %s4945_s18, 0 }
  0x1e   : > { %s4330_s11 = sshll.u32 %s254_s10, 8  ;;  %s4033_s12 = sshll.u32 %s254_s10, 4 }
  0x1f   : > { %s5076_s23 = scalar_lea.vmem %s8291_s0, %s4330_s11  ;;  %s4035_s24 = sshll.u32 %s254_s10, 1 }
  0x20   : > { %s272_s27 = scalar_select %p271_p0, %s4945_s18, 1 }
  0x21   : > { %s4032_s30 = sshll.u32 %s9235_s9, 1  ;;  %s8572_s11 = sand.u32 1, %s4937_s16  }
  0x22   : > { %s265_s5 = sadd.s32 %s4033_s12, %s4032_s30  ;;  %s5079_s6 = sadd.s32 %s4035_s24, %s272_s27 }
  0x23   : > { %s4034_s8 = sshll.u32 %s265_s5, 3  ;;  %s275_s21 = scalar_lea.vmem %s8293_s2, %s5079_s6 }
  0x24   : > { %s5088_s17 = scalar_lea.vmem %s8292_s1, %s4034_s8  ;;  %s5092_s13 = scalar_lea.vmem [#allocation4], %s8572_s11 }
  0x25   : > { %281 = sbr.rel (%p4036_p1) target bundleno = 477 (0x1dd), region = 40  ;;  %s4963_s8 = smov (!%p4036_p1), 64  }
  0x2a   : > { %v317_v0 = vld [vmem:[%s8294_s3 + $0x18] sm:$0xff]  ;;  %v316_v1 = vld [vmem:[%s8294_s3 + $0x10] sm:$0xff]  ;;  %v315_v2 = vld [vmem:[%s8294_s3 + $0x8] sm:$0xff]  ;;  %vm318_vm0 = vcmask 261120   ;;  %vm528_vm1 = vcmask 523264   ;;  %vm756_vm2 = vcmask 1043456  }
  0x2b   : > { %427 = vmatpush.msra.mxu0 %v317_v0  ;;  %4331 = vmatpush.msra.mxu1 %v317_v0  ;;  %v314_v3 = vld [vmem:[%s8294_s3] sm:$0xff]  ;;  %v283_v8 = vld [vmem:[%s5076_s23 + $0x8] sm:$0xff]  ;;  %v284_v12 = vld [vmem:[%s5076_s23 + $0x10] sm:$0xff] }
  0x2c   : > { %4332 = vmatpush.msra.mxu2 %v317_v0  ;;  %4333 = vmatpush.msra.mxu3 %v317_v0  ;;  %v282_v4 = vld [vmem:[%s5076_s23] sm:$0xff]  ;;  %v291_v9 = vld [vmem:[%s5076_s23 + $0x48] sm:$0xff]  ;;  %v292_v13 = vld [vmem:[%s5076_s23 + $0x50] sm:$0xff] }
  0x2d   : > { %428 = vmatpush.msra.mxu0 %v316_v1  ;;  %4334 = vmatpush.msra.mxu1 %v316_v1  ;;  %v290_v5 = vld [vmem:[%s5076_s23 + $0x40] sm:$0xff]  ;;  %v299_v10 = vld [vmem:[%s5076_s23 + $0x88] sm:$0xff]  ;;  %v300_v14 = vld [vmem:[%s5076_s23 + $0x90] sm:$0xff] }
  0x2e   : > { %4335 = vmatpush.msra.mxu2 %v316_v1  ;;  %4336 = vmatpush.msra.mxu3 %v316_v1  ;;  %v298_v6 = vld [vmem:[%s5076_s23 + $0x80] sm:$0xff]  ;;  %v307_v11 = vld [vmem:[%s5076_s23 + $0xc8] sm:$0xff]  ;;  %v308_v15 = vld [vmem:[%s5076_s23 + $0xd0] sm:$0xff] }
  0x2f   : > { %429 = vmatpush.msra.mxu0 %v315_v2  ;;  %4337 = vmatpush.msra.mxu1 %v315_v2  ;;  %v306_v7 = vld [vmem:[%s5076_s23 + $0xc0] sm:$0xff]  ;;  %v285_v16 = vld [vmem:[%s5076_s23 + $0x18] sm:$0xff]  ;;  %v287_v24 = vld [vmem:[%s5076_s23 + $0x28] sm:$0xff] }
  0x30   : > { %4338 = vmatpush.msra.mxu2 %v315_v2  ;;  %4339 = vmatpush.msra.mxu3 %v315_v2  ;;  %v293_v17 = vld [vmem:[%s5076_s23 + $0x58] sm:$0xff]  ;;  %v286_v20 = vld [vmem:[%s5076_s23 + $0x20] sm:$0xff]  ;;  %v303_v25 = vld [vmem:[%s5076_s23 + $0xa8] sm:$0xff] }
  0x31   : > { %430 = vmatpush.msra.mxu0 %v314_v3  ;;  %4340 = vmatpush.msra.mxu1 %v314_v3  ;;  %v301_v18 = vld [vmem:[%s5076_s23 + $0x98] sm:$0xff]  ;;  %v302_v21 = vld [vmem:[%s5076_s23 + $0xa0] sm:$0xff]  ;;  %v295_v26 = vld [vmem:[%s5076_s23 + $0x68] sm:$0xff] }
  0x32   : > { %4341 = vmatpush.msra.mxu2 %v314_v3  ;;  %4037 = vmatmul.msk.f32.vlgmr.msra.gmra.mxu0 %vm318_vm0, %v282_v4  ;;  %v309_v19 = vld [vmem:[%s5076_s23 + $0xd8] sm:$0xff]  ;;  %v294_v22 = vld [vmem:[%s5076_s23 + $0x60] sm:$0xff]  ;;  %v311_v27 = vld [vmem:[%s5076_s23 + $0xe8] sm:$0xff] }
  0x33   : > { %4045 = vmatmul.msk.f32.vlgmr.msra.gmra.mxu1 %vm318_vm0, %v290_v5  ;;  %4053 = vmatmul.msk.f32.vlgmr.msra.gmra.mxu2 %vm318_vm0, %v298_v6  ;;  %v310_v23 = vld [vmem:[%s5076_s23 + $0xe0] sm:$0xff]  ;;  %v288_v28 = vld [vmem:[%s5076_s23 + $0x30] sm:$0xff]  ;;  %v289_v32 = vld [vmem:[%s5076_s23 + $0x38] sm:$0xff] }
  0x34   : > { %4342 = vmatpush.msra.mxu3 %v314_v3  ;;  %v304_v29 = vld [vmem:[%s5076_s23 + $0xb0] sm:$0xff]  ;;  %v305_v33 = vld [vmem:[%s5076_s23 + $0xb8] sm:$0xff] }
  0x35   : > { %4061 = vmatmul.msk.f32.vlgmr.msra.gmra.mxu3 %vm318_vm0, %v306_v7  ;;  %v296_v30 = vld [vmem:[%s5076_s23 + $0x70] sm:$0xff]  ;;  %v297_v34 = vld [vmem:[%s5076_s23 + $0x78] sm:$0xff] }
  0x36   : > { %v312_v31 = vld [vmem:[%s5076_s23 + $0xf0] sm:$0xff]  ;;  %v313_v35 = vld [vmem:[%s5076_s23 + $0xf8] sm:$0xff] }
  0x3a   : > { %4038 = vmatmul.msk.f32.gmra.mxu0 %vm318_vm0, %v283_v8 }
  0x3b   : > { %4046 = vmatmul.msk.f32.gmra.mxu1 %vm318_vm0, %v291_v9  ;;  %4054 = vmatmul.msk.f32.gmra.mxu2 %vm318_vm0, %v299_v10 }
  0x3d   : > { %4062 = vmatmul.msk.f32.gmra.mxu3 %vm318_vm0, %v307_v11 }
  0x42   : > { %4039 = vmatmul.msk.f32.gmra.mxu0 %vm318_vm0, %v284_v12 }
  0x43   : > { %4047 = vmatmul.msk.f32.gmra.mxu1 %vm318_vm0, %v292_v13  ;;  %4055 = vmatmul.msk.f32.gmra.mxu2 %vm318_vm0, %v300_v14 }
  0x45   : > { %4063 = vmatmul.msk.f32.gmra.mxu3 %vm318_vm0, %v308_v15 }
  0x4a   : > { %4040 = vmatmul.msk.f32.gmra.mxu0 %vm318_vm0, %v285_v16 }
  0x4b   : > { %4048 = vmatmul.msk.f32.gmra.mxu1 %vm318_vm0, %v293_v17  ;;  %4056 = vmatmul.msk.f32.gmra.mxu2 %vm318_vm0, %v301_v18 }
  0x4d   : > { %4064 = vmatmul.msk.f32.gmra.mxu3 %vm318_vm0, %v309_v19 }
  0x52   : > { %4041 = vmatmul.msk.f32.gmra.mxu0 %vm318_vm0, %v286_v20 }
  0x53   : > { %4057 = vmatmul.msk.f32.gmra.mxu2 %vm318_vm0, %v302_v21  ;;  %4049 = vmatmul.msk.f32.gmra.mxu1 %vm318_vm0, %v294_v22 }
  0x55   : > { %4065 = vmatmul.msk.f32.gmra.mxu3 %vm318_vm0, %v310_v23 }
  0x5a   : > { %4042 = vmatmul.msk.f32.gmra.mxu0 %vm318_vm0, %v287_v24 }
  0x5b   : > { %4058 = vmatmul.msk.f32.gmra.mxu2 %vm318_vm0, %v303_v25  ;;  %4050 = vmatmul.msk.f32.gmra.mxu1 %vm318_vm0, %v295_v26 }
  0x5d   : > { %4066 = vmatmul.msk.f32.gmra.mxu3 %vm318_vm0, %v311_v27 }
  0x62   : > { %4043 = vmatmul.msk.f32.gmra.mxu0 %vm318_vm0, %v288_v28 }
  0x63   : > { %4059 = vmatmul.msk.f32.gmra.mxu2 %vm318_vm0, %v304_v29  ;;  %4051 = vmatmul.msk.f32.gmra.mxu1 %vm318_vm0, %v296_v30 }
  0x65   : > { %4067 = vmatmul.msk.f32.gmra.mxu3 %vm318_vm0, %v312_v31 }
  0x6a   : > { %4044 = vmatmul.msk.f32.gmra.mxu0 %vm318_vm0, %v289_v32 }
  0x6b   : > { %4060 = vmatmul.msk.f32.gmra.mxu2 %vm318_vm0, %v305_v33  ;;  %4052 = vmatmul.msk.f32.gmra.mxu1 %vm318_vm0, %v297_v34 }
  0x6d   : > { %4068 = vmatmul.msk.f32.gmra.mxu3 %vm318_vm0, %v313_v35 }
  0xaf   : > { %v432_v36 = vpop.f32.mrf.mxu0 }
  0xb0   : > { %529 = vst.msk [vmem:[#allocation2] sm:$0xff] %vm528_vm1, %v432_v36  ;;  %v456_v37 = vpop.f32.mrf.mxu1  ;;  %593 = vrot.lane.b32.xlu0 %v432_v36, %s4963_s8 }
  0xb1   : > { %537 = vst.msk [vmem:[#allocation2 + $0x40] sm:$0xff] %vm528_vm1, %v456_v37  ;;  %609 = vrot.lane.b32.xlu2 %v456_v37, %s4963_s8 }
  0xb6   : > { %v480_v38 = vpop.f32.mrf.mxu2 }
  0xb7   : > { %545 = vst.msk [vmem:[#allocation2 + $0x80] sm:$0xff] %vm528_vm1, %v480_v38  ;;  %625 = vrot.lane.b32.xlu1 %v480_v38, %s4963_s8  ;;  %v435_v39 = vpop.f32.mrf.mxu0 }
  0xb8   : > { %530 = vst.msk [vmem:[#allocation2 + $0x8] sm:$0xff] %vm528_vm1, %v435_v39  ;;  %v459_v40 = vpop.f32.mrf.mxu1  ;;  %v504_v41 = vpop.f32.mrf.mxu3 }
  0xb9   : > { %538 = vst.msk [vmem:[#allocation2 + $0x48] sm:$0xff] %vm528_vm1, %v459_v40  ;;  %641 = vrot.lane.b32.xlu0 %v504_v41, %s4963_s8 }
  0xba   : > { %553 = vst.msk [vmem:[#allocation2 + $0xc0] sm:$0xff] %vm528_vm1, %v504_v41 }
  0xbe   : > { %v483_v42 = vpop.f32.mrf.mxu2 }
  0xbf   : > { %v438_v43 = vpop.f32.mrf.mxu0  ;;  %546 = vst.msk [vmem:[#allocation2 + $0x88] sm:$0xff] %vm528_vm1, %v483_v42  ;;  %627 = vrot.lane.b32.xlu2 %v483_v42, %s4963_s8 }
  0xc0   : > { %531 = vst.msk [vmem:[#allocation2 + $0x10] sm:$0xff] %vm528_vm1, %v438_v43  ;;  %v462_v44 = vpop.f32.mrf.mxu1  ;;  %597 = vrot.lane.b32.xlu1 %v438_v43, %s4963_s8  ;;  %v5185_v45 = vpop.f32.mrf.mxu3 }
  0xc1   : > { %539 = vst.msk [vmem:[#allocation2 + $0x50] sm:$0xff] %vm528_vm1, %v462_v44  ;;  %595 = vrot.lane.b32.xlu0 %v435_v39, %s4963_s8 }
  0xc2   : > { %554 = vst.msk [vmem:[#allocation2 + $0xc8] sm:$0xff] %vm528_vm1, %v5185_v45 }
  0xc6   : > { %v486_v46 = vpop.f32.mrf.mxu2 }
  0xc7   : > { %v441_v47 = vpop.f32.mrf.mxu0  ;;  %547 = vst.msk [vmem:[#allocation2 + $0x90] sm:$0xff] %vm528_vm1, %v486_v46 }
  0xc8   : > { %532 = vst.msk [vmem:[#allocation2 + $0x18] sm:$0xff] %vm528_vm1, %v441_v47  ;;  %v465_v48 = vpop.f32.mrf.mxu1  ;;  %613 = vrot.lane.b32.xlu1 %v462_v44, %s4963_s8  ;;  %v510_v49 = vpop.f32.mrf.mxu3 }
  0xc9   : > { %540 = vst.msk [vmem:[#allocation2 + $0x58] sm:$0xff] %vm528_vm1, %v465_v48  ;;  %615 = vrot.lane.b32.xlu2 %v465_v48, %s4963_s8  ;;  %611 = vrot.lane.b32.xlu0 %v459_v40, %s4963_s8 }
  0xca   : > { %555 = vst.msk [vmem:[#allocation2 + $0xd0] sm:$0xff] %vm528_vm1, %v510_v49 }
  0xce   : > { %v489_v50 = vpop.f32.mrf.mxu2 }
  0xcf   : > { %v444_v51 = vpop.f32.mrf.mxu0  ;;  %548 = vst.msk [vmem:[#allocation2 + $0x98] sm:$0xff] %vm528_vm1, %v489_v50 }
  0xd0   : > { %533 = vst.msk [vmem:[#allocation2 + $0x20] sm:$0xff] %vm528_vm1, %v444_v51  ;;  %599 = vrot.lane.b32.xlu1 %v441_v47, %s4963_s8  ;;  %v468_v52 = vpop.f32.mrf.mxu1  ;;  %v513_v53 = vpop.f32.mrf.mxu3 }
  0xd1   : > { %629 = vrot.lane.b32.xlu0 %v486_v46, %s4963_s8  ;;  %601 = vrot.lane.b32.xlu2 %v444_v51, %s4963_s8  ;;  %541 = vst.msk [vmem:[#allocation2 + $0x60] sm:$0xff] %vm528_vm1, %v468_v52 }
  0xd2   : > { %556 = vst.msk [vmem:[#allocation2 + $0xd8] sm:$0xff] %vm528_vm1, %v513_v53 }
  0xd6   : > { %v492_v54 = vpop.f32.mrf.mxu2 }
  0xd7   : > { %549 = vst.msk [vmem:[#allocation2 + $0xa0] sm:$0xff] %vm528_vm1, %v492_v54  ;;  %v447_v55 = vpop.f32.mrf.mxu0 }
  0xd8   : > { %631 = vrot.lane.b32.xlu1 %v489_v50, %s4963_s8  ;;  %534 = vst.msk [vmem:[#allocation2 + $0x28] sm:$0xff] %vm528_vm1, %v447_v55  ;;  %v471_v56 = vpop.f32.mrf.mxu1  ;;  %v516_v57 = vpop.f32.mrf.mxu3 }
  0xd9   : > { %617 = vrot.lane.b32.xlu0 %v468_v52, %s4963_s8  ;;  %633 = vrot.lane.b32.xlu2 %v492_v54, %s4963_s8  ;;  %542 = vst.msk [vmem:[#allocation2 + $0x68] sm:$0xff] %vm528_vm1, %v471_v56 }
  0xda   : > { %557 = vst.msk [vmem:[#allocation2 + $0xe0] sm:$0xff] %vm528_vm1, %v516_v57 }
  0xde   : > { %v495_v58 = vpop.f32.mrf.mxu2 }
  0xdf   : > { %550 = vst.msk [vmem:[#allocation2 + $0xa8] sm:$0xff] %vm528_vm1, %v495_v58  ;;  %v450_v59 = vpop.f32.mrf.mxu0 }
  0xe0   : > { %619 = vrot.lane.b32.xlu1 %v471_v56, %s4963_s8  ;;  %535 = vst.msk [vmem:[#allocation2 + $0x30] sm:$0xff] %vm528_vm1, %v450_v59  ;;  %v474_v60 = vpop.f32.mrf.mxu1  ;;  %v519_v61 = vpop.f32.mrf.mxu3 }
  0xe1   : > { %635 = vrot.lane.b32.xlu0 %v495_v58, %s4963_s8  ;;  %603 = vrot.lane.b32.xlu2 %v447_v55, %s4963_s8  ;;  %543 = vst.msk [vmem:[#allocation2 + $0x70] sm:$0xff] %vm528_vm1, %v474_v60 }
  0xe2   : > { %558 = vst.msk [vmem:[#allocation2 + $0xe8] sm:$0xff] %vm528_vm1, %v519_v61 }
  0xe6   : > { %v498_v62 = vpop.f32.mrf.mxu2 }
  0xe7   : > { %551 = vst.msk [vmem:[#allocation2 + $0xb0] sm:$0xff] %vm528_vm1, %v498_v62  ;;  %v453_v63 = vpop.f32.mrf.mxu0 }
  0xe8   : > { %637 = vrot.lane.b32.xlu1 %v498_v62, %s4963_s8  ;;  %536 = vst.msk [vmem:[#allocation2 + $0x38] sm:$0xff] %vm528_vm1, %v453_v63  ;;  %v522_v0 = vpop.f32.mrf.mxu3  ;;  %v477_v1 = vpop.f32.mrf.mxu1 }
  0xe9   : > { %621 = vrot.lane.b32.xlu2 %v474_v60, %s4963_s8  ;;  %605 = vrot.lane.b32.xlu0 %v450_v59, %s4963_s8  ;;  %559 = vst.msk [vmem:[#allocation2 + $0xf0] sm:$0xff] %vm528_vm1, %v522_v0 }
  0xea   : > { %544 = vst.msk [vmem:[#allocation2 + $0x78] sm:$0xff] %vm528_vm1, %v477_v1 }
  0xee   : > { %v501_v2 = vpop.f32.mrf.mxu2 }
  0xef   : > { %552 = vst.msk [vmem:[#allocation2 + $0xb8] sm:$0xff] %vm528_vm1, %v501_v2 }
  0xf0   : > { %607 = vrot.lane.b32.xlu1 %v453_v63, %s4963_s8  ;;  %v525_v4 = vpop.f32.mrf.mxu3 }
  0xf1   : > { %645 = vrot.lane.b32.xlu2 %v510_v49, %s4963_s8  ;;  %647 = vrot.lane.b32.xlu0 %v513_v53, %s4963_s8  ;;  %560 = vst.msk [vmem:[#allocation2 + $0xf8] sm:$0xff] %vm528_vm1, %v525_v4 }
  0xf8   : > { %643 = vrot.lane.b32.xlu1 %v5185_v45, %s4963_s8 }
  0xf9   : > { %651 = vrot.lane.b32.xlu2 %v519_v61, %s4963_s8  ;;  %653 = vrot.lane.b32.xlu0 %v522_v0, %s4963_s8 }
 0x100   : > { %649 = vrot.lane.b32.xlu1 %v516_v57, %s4963_s8 }
 0x101   : > { %639 = vrot.lane.b32.xlu2 %v501_v2, %s4963_s8  ;;  %623 = vrot.lane.b32.xlu0 %v477_v1, %s4963_s8 }
 0x108   : > { %655 = vrot.lane.b32.xlu1 %v525_v4, %s4963_s8 }
 0x10b   : > { %v610_v3 = vpop.permute.xlu2 %609 }
 0x119   : > { %v628_v5 = vpop.permute.xlu2 %627 }
 0x122   : > { %v594_v6 = vpop.permute.xlu0 %593 }
 0x123   : > { %v616_v7 = vpop.permute.xlu2 %615 }
 0x127   : > { %689 = vxpose.xlu2.b32.start [1/16] (narrow) %v594_v6, 8 }
 0x129   : > { %v626_v8 = vpop.permute.xlu1 %625 }
 0x12a   : > { %721 = vxpose.xlu0.b32.start [1/16] (narrow) %v626_v8, 8 }
 0x12b   : > { %v642_v9 = vpop.permute.xlu0 %641  ;;  %v602_v10 = vpop.permute.xlu2 %601 }
 0x132   : > { %722 = vxpose.xlu0.b32.cont [2/16] (narrow) %v628_v5, 8  ;;  %v598_v11 = vpop.permute.xlu1 %597 }
 0x133   : > { %v596_v12 = vpop.permute.xlu0 %595  ;;  %v634_v14 = vpop.permute.xlu2 %633 }
 0x134   : > { %690 = vxpose.xlu2.b32.cont [2/16] (narrow) %v596_v12, 8 }
 0x13a   : > { %v614_v13 = vpop.permute.xlu1 %613 }
 0x13b   : > { %v612_v15 = vpop.permute.xlu0 %611  ;;  %v604_v18 = vpop.permute.xlu2 %603 }
 0x13c   : > { %691 = vxpose.xlu2.b32.cont [3/16] (narrow) %v598_v11, 8 }
 0x142   : > { %v600_v16 = vpop.permute.xlu1 %599 }
 0x143   : > { %v630_v17 = vpop.permute.xlu0 %629  ;;  %v622_v21 = vpop.permute.xlu2 %621 }
 0x144   : > { %692 = vxpose.xlu2.b32.cont [4/16] (narrow) %v600_v16, 8  ;;  %723 = vxpose.xlu0.b32.cont [3/16] (narrow) %v630_v17, 8 }
 0x14a   : > { %v632_v19 = vpop.permute.xlu1 %631 }
 0x14b   : > { %v618_v20 = vpop.permute.xlu0 %617  ;;  %v646_v24 = vpop.permute.xlu2 %645 }
 0x14c   : > { %693 = vxpose.xlu2.b32.cont [5/16] (narrow) %v602_v10, 8  ;;  %724 = vxpose.xlu0.b32.cont [4/16] (narrow) %v632_v19, 8 }
 0x152   : > { %v620_v22 = vpop.permute.xlu1 %619 }
 0x153   : > { %v636_v23 = vpop.permute.xlu0 %635  ;;  %v652_v27 = vpop.permute.xlu2 %651 }
 0x154   : > { %694 = vxpose.xlu2.b32.cont [6/16] (narrow) %v604_v18, 8  ;;  %725 = vxpose.xlu0.b32.cont [5/16] (narrow) %v634_v14, 8 }
 0x15a   : > { %v638_v25 = vpop.permute.xlu1 %637 }
 0x15b   : > { %v606_v26 = vpop.permute.xlu0 %605  ;;  %v640_v29 = vpop.permute.xlu2 %639 }
 0x15c   : > { %726 = vxpose.xlu0.b32.cont [6/16] (narrow) %v636_v23, 8  ;;  %695 = vxpose.xlu2.b32.cont [7/16] (narrow) %v606_v26, 8 }
 0x162   : > { %v608_v28 = vpop.permute.xlu1 %607 }
 0x163   : > { %v648_v31 = vpop.permute.xlu0 %647 }
 0x164   : > { %727 = vxpose.xlu0.b32.cont [7/16] (narrow) %v638_v25, 8  ;;  %696 = vxpose.xlu2.b32.cont [8/16] (narrow) %v608_v28, 8 }
 0x16a   : > { %v644_v30 = vpop.permute.xlu1 %643 }
 0x16b   : > { %v654_v33 = vpop.permute.xlu0 %653 }
 0x16c   : > { %728 = vxpose.xlu0.b32.cont [8/16] (narrow) %v640_v29, 8  ;;  %697 = vxpose.xlu2.b32.cont [9/16] (narrow) %v610_v3, 8 }
 0x172   : > { %v650_v32 = vpop.permute.xlu1 %649 }
 0x173   : > { %v624_v34 = vpop.permute.xlu0 %623 }
 0x174   : > { %729 = vxpose.xlu0.b32.cont [9/16] (narrow) %v642_v9, 8  ;;  %698 = vxpose.xlu2.b32.cont [10/16] (narrow) %v612_v15, 8 }
 0x17a   : > { %v656_v35 = vpop.permute.xlu1 %655 }
 0x17c   : > { %699 = vxpose.xlu2.b32.cont [11/16] (narrow) %v614_v13, 8  ;;  %730 = vxpose.xlu0.b32.cont [10/16] (narrow) %v644_v30, 8 }
 0x184   : > { %700 = vxpose.xlu2.b32.cont [12/16] (narrow) %v616_v7, 8  ;;  %731 = vxpose.xlu0.b32.cont [11/16] (narrow) %v646_v24, 8 }
 0x18c   : > { %701 = vxpose.xlu2.b32.cont [13/16] (narrow) %v618_v20, 8  ;;  %732 = vxpose.xlu0.b32.cont [12/16] (narrow) %v648_v31, 8 }
 0x194   : > { %702 = vxpose.xlu2.b32.cont [14/16] (narrow) %v620_v22, 8  ;;  %733 = vxpose.xlu0.b32.cont [13/16] (narrow) %v650_v32, 8 }
 0x19c   : > { %703 = vxpose.xlu2.b32.cont [15/16] (narrow) %v622_v21, 8  ;;  %734 = vxpose.xlu0.b32.cont [14/16] (narrow) %v652_v27, 8 }
 0x1a4   : > { %704 = vxpose.xlu2.b32.end [16/16] (narrow) %v624_v34, 8  ;;  %735 = vxpose.xlu0.b32.cont [15/16] (narrow) %v654_v33, 8 }
 0x1ac   : > { %736 = vxpose.xlu0.b32.end [16/16] (narrow) %v656_v35, 8 }
 0x1c5   : > { %v705_v37 = vpop.trf.xlu2 }
 0x1d8   : > { %v737_v36 = vpop.trf.xlu0 }
 0x1d9   : > { %v755_v38 = vrot.slane %v737_v36, 4 }
 0x1db   : > { %v757_v39 = vsel %vm756_vm2, %v705_v37, %v755_v38 }
 0x1dc   : > { %759 = vst [vmem:[#allocation3] sm:$0xff] %v757_v39 }
 0x1dd PF: > { %v5239_v40 = vld [vmem:[#allocation2 + $0x10] sm:$0xff]  ;;  %v5241_v41 = vld [vmem:[#allocation2] sm:$0xff]  ;;  %s4964_s23 = smov 96   ;;  %v5251_v43 = vld [vmem:[#allocation2 + $0x18] sm:$0xff]  ;;  %s4069_s24 = sshll.u32 %s4945_s18, 7  ;;  %vm8301_vm3 = vcmask 64512  }
 0x1de   : > { %863 = vrot.lane.b32.xlu1 %v5239_v40, %s4964_s23  ;;  %v5247_v42 = vld [vmem:[#allocation2 + $0x20] sm:$0xff]  ;;  %v5253_v44 = vld [vmem:[#allocation2 + $0x8] sm:$0xff]  ;;  %v5263_v46 = vld [vmem:[#allocation2 + $0x38] sm:$0xff]  ;;  %s5368_s27 = scalar_lea.vmem [#allocation2], %s4069_s24  ;;  %s4965_s30 = smov 120  }
 0x1df   : > { %v5259_v45 = vld [vmem:[#allocation2 + $0x28] sm:$0xff]  ;;  %v5265_v47 = vld [vmem:[#allocation2 + $0x30] sm:$0xff]  ;;  %v5271_v48 = vld [vmem:[#allocation2 + $0x40] sm:$0xff]  ;;  %s4966_s5 = smov 88   ;;  %s4967_s11 = smov 112  }
 0x1e0   : > { %v5275_v49 = vld [vmem:[#allocation2 + $0x50] sm:$0xff]  ;;  %v5277_v50 = vld [vmem:[#allocation2 + $0x48] sm:$0xff]  ;;  %v5283_v51 = vld [vmem:[#allocation2 + $0x58] sm:$0xff]  ;;  %s4970_s9 = smov 72   ;;  %s4971_s10 = smov 104  }
 0x1e1   : > { %v5287_v52 = vld [vmem:[#allocation2 + $0x68] sm:$0xff]  ;;  %v5289_v53 = vld [vmem:[#allocation2 + $0x60] sm:$0xff]  ;;  %v5295_v54 = vld [vmem:[#allocation2 + $0x70] sm:$0xff]  ;;  %s4327_s20 = sshll.u32 %s4949_s19, 1  ;;  %s3916_s7 = sshll.u32 %s5092_s13, 4  ;;  %s3917_s7 = int_to_ptr.vmem [resolvable:$true] %s3916_s7 }
 0x1e2   : > { %v5299_v55 = vld [vmem:[#allocation2 + $0x80] sm:$0xff]  ;;  %v5301_v56 = vld [vmem:[#allocation2 + $0x78] sm:$0xff]  ;;  %v5307_v57 = vld [vmem:[#allocation2 + $0x88] sm:$0xff]  ;;  %s3913_s25 = sadd.s32 %s4945_s18, %s4327_s20  ;;  %s9219_s18 = sand.u32 1, %s4937_s16  }
 0x1e3   : > { %v5311_v58 = vld [vmem:[#allocation2 + $0x98] sm:$0xff]  ;;  %v5313_v59 = vld [vmem:[#allocation2 + $0x90] sm:$0xff]  ;;  %v5319_v60 = vld [vmem:[#allocation2 + $0xa0] sm:$0xff]  ;;  %s3914_s26 = scalar_lea.hbm %s8295_s4, %s3913_s25  ;;  %s3904_s19 = scalar_lea.sflag [#allocation5], %s9219_s18 }
 0x1e4   : > { %v5323_v61 = vld [vmem:[#allocation2 + $0xb0] sm:$0xff]  ;;  %v5325_v62 = vld [vmem:[#allocation2 + $0xa8] sm:$0xff]  ;;  %v5331_v63 = vld [vmem:[#allocation2 + $0xb8] sm:$0xff]  ;;  %s3918_s8 = sshll.u32 %s3914_s26, 4  ;;  %s3919_s8 = int_to_ptr.hbm [resolvable:$true] %s3918_s8 }
 0x1e5   : > { %v5335_v0 = vld [vmem:[#allocation2 + $0xc8] sm:$0xff]  ;;  %v5337_v1 = vld [vmem:[#allocation2 + $0xc0] sm:$0xff]  ;;  %v5343_v2 = vld [vmem:[#allocation2 + $0xd0] sm:$0xff] }
 0x1e6   : > { %865 = vrot.lane.b32.xlu1 %v5251_v43, %s4964_s23  ;;  %v5347_v3 = vld [vmem:[#allocation2 + $0xe0] sm:$0xff]  ;;  %v5349_v4 = vld [vmem:[#allocation2 + $0xd8] sm:$0xff]  ;;  %v5355_v5 = vld [vmem:[#allocation2 + $0xe8] sm:$0xff] }
 0x1e7   : > { %v5359_v6 = vld [vmem:[#allocation2 + $0xf8] sm:$0xff]  ;;  %v5361_v7 = vld [vmem:[#allocation2 + $0xf0] sm:$0xff]  ;;  %v5371_v8 = vld [vmem:[%s5368_s27 + $0x8] sm:$0xff] }
 0x1e8   : > { %v5374_v9 = vld [vmem:[%s5368_s27] sm:$0xff]  ;;  %v5381_v10 = vld [vmem:[%s5368_s27 + $0x10] sm:$0xff]  ;;  %v5389_v12 = vld [vmem:[%s5368_s27 + $0x18] sm:$0xff] }
 0x1e9   : > { %v5386_v11 = vld [vmem:[%s5368_s27 + $0x20] sm:$0xff]  ;;  %v5398_v14 = vld [vmem:[%s5368_s27 + $0x30] sm:$0xff]  ;;  %v5403_v15 = vld [vmem:[%s5368_s27 + $0x38] sm:$0xff] }
 0x1ea   : > { %v5406_v16 = vld [vmem:[%s5368_s27 + $0x28] sm:$0xff]  ;;  %v5420_v19 = vld [vmem:[%s5368_s27 + $0x50] sm:$0xff]  ;;  %v5423_v20 = vld [vmem:[%s5368_s27 + $0x40] sm:$0xff] }
 0x1eb   : > { %v5413_v17 = vld [vmem:[%s5368_s27 + $0x48] sm:$0xff]  ;;  %v5434_v23 = vld [vmem:[%s5368_s27 + $0x60] sm:$0xff]  ;;  %v5442_v25 = vld [vmem:[%s5368_s27 + $0x58] sm:$0xff] }
 0x1ec   : > { %v5439_v24 = vld [vmem:[%s5368_s27 + $0x68] sm:$0xff]  ;;  %v5453_v29 = vld [vmem:[%s5368_s27 + $0x78] sm:$0xff]  ;;  %v5458_v30 = vld [vmem:[%s5368_s27 + $0x70] sm:$0xff] }
 0x1ee   : > { %873 = vrot.lane.b32.xlu1 %v5263_v46, %s4964_s23 }
 0x1f6   : > { %879 = vrot.lane.b32.xlu1 %v5275_v49, %s4964_s23 }
 0x1fe   : > { %885 = vrot.lane.b32.xlu1 %v5287_v52, %s4964_s23 }
 0x206   : > { %891 = vrot.lane.b32.xlu1 %v5299_v55, %s4964_s23 }
 0x20d   : > { %867 = vrot.lane.b32.xlu2 %v5247_v42, %s4964_s23 }
 0x20e   : > { %897 = vrot.lane.b32.xlu1 %v5311_v58, %s4964_s23 }
 0x215   : > { %869 = vrot.lane.b32.xlu2 %v5259_v45, %s4964_s23 }
 0x216   : > { %903 = vrot.lane.b32.xlu1 %v5323_v61, %s4964_s23 }
 0x21a   : > { %859 = vrot.lane.b32.xlu0 %v5241_v41, %s4964_s23 }
 0x21d   : > { %875 = vrot.lane.b32.xlu2 %v5271_v48, %s4964_s23 }
 0x21e   : > { %909 = vrot.lane.b32.xlu1 %v5335_v0, %s4964_s23 }
 0x222   : > { %861 = vrot.lane.b32.xlu0 %v5253_v44, %s4964_s23 }
 0x225   : > { %881 = vrot.lane.b32.xlu2 %v5283_v51, %s4964_s23 }
 0x226   : > { %915 = vrot.lane.b32.xlu1 %v5347_v3, %s4964_s23 }
 0x22a   : > { %871 = vrot.lane.b32.xlu0 %v5265_v47, %s4964_s23 }
 0x22d   : > { %887 = vrot.lane.b32.xlu2 %v5295_v54, %s4964_s23 }
 0x22e   : > { %921 = vrot.lane.b32.xlu1 %v5359_v6, %s4964_s23 }
 0x232   : > { %877 = vrot.lane.b32.xlu0 %v5277_v50, %s4964_s23 }
 0x235   : > { %893 = vrot.lane.b32.xlu2 %v5307_v57, %s4964_s23 }
 0x236   : > { %1711 = vrot.lane.b32.xlu1 %v5371_v8, %s4965_s30 }
 0x23a   : > { %883 = vrot.lane.b32.xlu0 %v5289_v53, %s4964_s23 }
 0x23d   : > { %899 = vrot.lane.b32.xlu2 %v5319_v60, %s4964_s23 }
 0x23e   : > { %1717 = vrot.lane.b32.xlu1 %v5386_v11, %s4965_s30 }
 0x242   : > { %889 = vrot.lane.b32.xlu0 %v5301_v56, %s4964_s23 }
 0x245   : > { %905 = vrot.lane.b32.xlu2 %v5331_v63, %s4964_s23 }
 0x246   : > { %1723 = vrot.lane.b32.xlu1 %v5403_v15, %s4965_s30 }
 0x24a   : > { %895 = vrot.lane.b32.xlu0 %v5313_v59, %s4964_s23 }
 0x24d   : > { %911 = vrot.lane.b32.xlu2 %v5343_v2, %s4964_s23 }
 0x24e   : > { %1729 = vrot.lane.b32.xlu1 %v5420_v19, %s4965_s30 }
 0x250   : > { %v5429_v21 = vpop.permute.xlu1 %863 }
 0x252   : > { %901 = vrot.lane.b32.xlu0 %v5325_v62, %s4964_s23 }
 0x255   : > { %917 = vrot.lane.b32.xlu2 %v5355_v5, %s4964_s23 }
 0x256   : > { %1735 = vrot.lane.b32.xlu1 %v5439_v24, %s4965_s30 }
 0x258   : > { %v5448_v27 = vpop.permute.xlu1 %865 }
 0x25a   : > { %907 = vrot.lane.b32.xlu0 %v5337_v1, %s4964_s23 }
 0x25d   : > { %1713 = vrot.lane.b32.xlu2 %v5381_v10, %s4965_s30 }
 0x25e   : > { %1741 = vrot.lane.b32.xlu1 %v5241_v41, %s4966_s5 }
 0x260   : > { %v874_v32 = vpop.permute.xlu1 %873 }
 0x262   : > { %913 = vrot.lane.b32.xlu0 %v5349_v4, %s4964_s23 }
 0x265   : > { %1721 = vrot.lane.b32.xlu2 %v5398_v14, %s4965_s30 }
 0x266   : > { %1747 = vrot.lane.b32.xlu1 %v5251_v43, %s4966_s5 }
 0x267   : > { %v5395_v13 = vpop.permute.xlu2 %867 }
 0x268   : > { %v880_v35 = vpop.permute.xlu1 %879 }
 0x26a   : > { %919 = vrot.lane.b32.xlu0 %v5361_v7, %s4964_s23  ;;  %s4881_s23 = sshra.s32 %s3919_s8, 4  ;;  %s4882_s23 = int_to_ptr.hbm [resolvable:$true] %s4881_s23 }
 0x26b   : > { %s4883_s24 = scalar_lea.hbm %s4882_s23, 1  ;;  %p4888_p6 = scmp.lt.s32.totalorder %s4882_s23, %s8295_s4 }
 0x26c   : > { %p4884_p2 = scmp.ne.s32.totalorder %s4882_s23, %s4883_s24 }
 0x26d   : > { %1727 = vrot.lane.b32.xlu2 %v5413_v17, %s4965_s30 }
 0x26e   : > { %1753 = vrot.lane.b32.xlu1 %v5265_v47, %s4966_s5  ;;  %p4885_p4 = pnand %p4884_p2, %p5048_p3 }
 0x26f   : > { %v5415_v18 = vpop.permute.xlu2 %869 }
 0x270   : > { %v886_v38 = vpop.permute.xlu1 %885  ;;  %p4886_p5 = pneg %p4885_p4 }
 0x272   : > { %1709 = vrot.lane.b32.xlu0 %v5374_v9, %s4965_s30 }
 0x275   : > { %1733 = vrot.lane.b32.xlu2 %v5434_v23, %s4965_s30 }
 0x276   : > { %1759 = vrot.lane.b32.xlu1 %v5277_v50, %s4966_s5 }
 0x277   : > { %v876_v26 = vpop.permute.xlu2 %875 }
 0x27a   : > { %1715 = vrot.lane.b32.xlu0 %v5389_v12, %s4965_s30 }
 0x27d   : > { %1739 = vrot.lane.b32.xlu2 %v5453_v29, %s4965_s30 }
 0x27e   : > { %1765 = vrot.lane.b32.xlu1 %v5289_v53, %s4966_s5 }
 0x27f   : > { %v882_v31 = vpop.permute.xlu2 %881 }
 0x282   : > { %1719 = vrot.lane.b32.xlu0 %v5406_v16, %s4965_s30 }
 0x285   : > { %1745 = vrot.lane.b32.xlu2 %v5239_v40, %s4966_s5  ;;  %v5484_v40 = vpop.permute.xlu1 %891 }
 0x286   : > { %1771 = vrot.lane.b32.xlu1 %v5301_v56, %s4966_s5 }
 0x287   : > { %v888_v34 = vpop.permute.xlu2 %887 }
 0x28a   : > { %1725 = vrot.lane.b32.xlu0 %v5423_v20, %s4965_s30 }
 0x28c   : > { %v5431_v22 = vpop.permute.xlu0 %859 }
 0x28d   : > { %1751 = vrot.lane.b32.xlu2 %v5259_v45, %s4966_s5  ;;  %v5496_v43 = vpop.permute.xlu1 %897 }
 0x28e   : > { %1777 = vrot.lane.b32.xlu1 %v5313_v59, %s4966_s5 }
 0x28f   : > { %v5476_v37 = vpop.permute.xlu2 %893 }
 0x292   : > { %1731 = vrot.lane.b32.xlu0 %v5442_v25, %s4965_s30 }
 0x294   : > { %v5450_v28 = vpop.permute.xlu0 %861 }
 0x295   : > { %1757 = vrot.lane.b32.xlu2 %v5271_v48, %s4966_s5 }
 0x296   : > { %1783 = vrot.lane.b32.xlu1 %v5325_v62, %s4966_s5 }
 0x29a   : > { %1737 = vrot.lane.b32.xlu0 %v5458_v30, %s4965_s30 }
 0x29c   : > { %v872_v33 = vpop.permute.xlu0 %871 }
 0x29d   : > { %1763 = vrot.lane.b32.xlu2 %v5283_v51, %s4966_s5 }
 0x29e   : > { %1789 = vrot.lane.b32.xlu1 %v5337_v1, %s4966_s5 }
 0x2a2   : > { %1743 = vrot.lane.b32.xlu0 %v5253_v44, %s4966_s5 }
 0x2a4   : > { %v878_v36 = vpop.permute.xlu0 %877 }
 0x2a5   : > { %1769 = vrot.lane.b32.xlu2 %v5295_v54, %s4966_s5 }
 0x2a6   : > { %1795 = vrot.lane.b32.xlu1 %v5349_v4, %s4966_s5 }
 0x2aa   : > { %1749 = vrot.lane.b32.xlu0 %v5247_v42, %s4966_s5  ;;  %v5487_v42 = vpop.permute.xlu2 %899 }
 0x2ac   : > { %v884_v39 = vpop.permute.xlu0 %883 }
 0x2ad   : > { %1775 = vrot.lane.b32.xlu2 %v5307_v57, %s4966_s5 }
 0x2ae   : > { %1801 = vrot.lane.b32.xlu1 %v5361_v7, %s4966_s5 }
 0x2b2   : > { %1755 = vrot.lane.b32.xlu0 %v5263_v46, %s4966_s5  ;;  %v5503_v45 = vpop.permute.xlu2 %905  ;;  %v904_v46 = vpop.permute.xlu1 %903 }
 0x2b4   : > { %v890_v41 = vpop.permute.xlu0 %889 }
 0x2b5   : > { %4070 = vmatpush.xpose.msk.msra.mxu0 %vm8301_vm3, %v890_v41  ;;  %1781 = vrot.lane.b32.xlu2 %v5319_v60, %s4966_s5 }
 0x2b9   : > { %4071 = vmatpush.xpose.msk.msra.mxu0 %vm8301_vm3, %v888_v34 }
 0x2ba   : > { %1761 = vrot.lane.b32.xlu0 %v5275_v49, %s4966_s5  ;;  %v912_v48 = vpop.permute.xlu2 %911  ;;  %v910_v49 = vpop.permute.xlu1 %909 }
 0x2bc   : > { %v5498_v44 = vpop.permute.xlu0 %895 }
 0x2bd   : > { %4072 = vmatpush.xpose.msk.msra.mxu0 %vm8301_vm3, %v886_v38  ;;  %1787 = vrot.lane.b32.xlu2 %v5331_v63, %s4966_s5 }
 0x2c1   : > { %4073 = vmatpush.xpose.msk.msra.mxu0 %vm8301_vm3, %v884_v39 }
 0x2c2   : > { %1767 = vrot.lane.b32.xlu0 %v5287_v52, %s4966_s5  ;;  %v918_v51 = vpop.permute.xlu2 %917  ;;  %v916_v52 = vpop.permute.xlu1 %915 }
 0x2c4   : > { %v5510_v47 = vpop.permute.xlu0 %901 }
 0x2c5   : > { %4074 = vmatpush.xpose.msk.msra.mxu0 %vm8301_vm3, %v882_v31  ;;  %1793 = vrot.lane.b32.xlu2 %v5343_v2, %s4966_s5 }
 0x2c9   : > { %4075 = vmatpush.xpose.msk.msra.mxu0 %vm8301_vm3, %v880_v35 }
 0x2ca   : > { %1773 = vrot.lane.b32.xlu0 %v5299_v55, %s4966_s5  ;;  %v5536_v54 = vpop.permute.xlu2 %1713  ;;  %v922_v55 = vpop.permute.xlu1 %921 }
 0x2cb   : > { %4102 = vmatpush.xpose.msk.msra.mxu1 %vm8301_vm3, %v922_v55 }
 0x2cc   : > { %v908_v50 = vpop.permute.xlu0 %907 }
 0x2cd   : > { %4076 = vmatpush.xpose.msk.msra.mxu0 %vm8301_vm3, %v878_v36  ;;  %1799 = vrot.lane.b32.xlu2 %v5355_v5, %s4966_s5 }
 0x2d1   : > { %4077 = vmatpush.xpose.msk.msra.mxu0 %vm8301_vm3, %v876_v26 }
 0x2d2   : > { %1779 = vrot.lane.b32.xlu0 %v5311_v58, %s4966_s5  ;;  %v5550_v57 = vpop.permute.xlu1 %1711  ;;  %v5557_v59 = vpop.permute.xlu2 %1721 }
 0x2d4   : > { %v914_v53 = vpop.permute.xlu0 %913 }
 0x2d5   : > { %4078 = vmatpush.xpose.msk.msra.mxu0 %vm8301_vm3, %v874_v32  ;;  %2407 = vrot.lane.b32.xlu2 %v5371_v8, %s4967_s11 }
 0x2d9   : > { %4079 = vmatpush.xpose.msk.msra.mxu0 %vm8301_vm3, %v872_v33 }
 0x2da   : > { %1785 = vrot.lane.b32.xlu0 %v5323_v61, %s4966_s5  ;;  %v5568_v60 = vpop.permute.xlu1 %1717  ;;  %v5575_v62 = vpop.permute.xlu2 %1727 }
 0x2dc   : > { %v920_v56 = vpop.permute.xlu0 %919 }
 0x2dd   : > { %4080 = vmatpush.xpose.msk.msra.mxu0 %vm8301_vm3, %v5415_v18  ;;  %4103 = vmatpush.xpose.msk.msra.mxu1 %vm8301_vm3, %v920_v56 }
 0x2e1   : > { %4081 = vmatpush.xpose.msk.msra.mxu0 %vm8301_vm3, %v5395_v13  ;;  %4104 = vmatpush.xpose.msk.msra.mxu1 %vm8301_vm3, %v918_v51 }
 0x2e2   : > { %1791 = vrot.lane.b32.xlu0 %v5335_v0, %s4966_s5  ;;  %v5582_v63 = vpop.permute.xlu1 %1723  ;;  %v5590_v1 = vpop.permute.xlu2 %1733 }
 0x2e4   : > { %v5552_v58 = vpop.permute.xlu0 %1709 }
 0x2e5   : > { %4082 = vmatpush.xpose.msk.msra.mxu0 %vm8301_vm3, %v5448_v27  ;;  %4105 = vmatpush.xpose.msk.msra.mxu1 %vm8301_vm3, %v916_v52 }
 0x2e9   : > { %4083 = vmatpush.xpose.msk.msra.mxu0 %vm8301_vm3, %v5429_v21  ;;  %4106 = vmatpush.xpose.msk.msra.mxu1 %vm8301_vm3, %v914_v53 }
 0x2ea   : > { %1797 = vrot.lane.b32.xlu0 %v5347_v3, %s4966_s5  ;;  %v5592_v2 = vpop.permute.xlu1 %1729  ;;  %v5601_v4 = vpop.permute.xlu2 %1739 }
 0x2ec   : > { %v5570_v61 = vpop.permute.xlu0 %1715 }
 0x2ed   : > { %4084 = vmatpush.xpose.msk.msra.mxu0 %vm8301_vm3, %v5450_v28  ;;  %4107 = vmatpush.xpose.msk.msra.mxu1 %vm8301_vm3, %v912_v48 }
 0x2f1   : > { %4085 = vmatpush.xpose.msk.msra.mxu0 %vm8301_vm3, %v5431_v22  ;;  %4108 = vmatpush.xpose.msk.msra.mxu1 %vm8301_vm3, %v910_v49 }
 0x2f2   : > { %1803 = vrot.lane.b32.xlu0 %v5359_v6, %s4966_s5  ;;  %v5603_v5 = vpop.permute.xlu1 %1735  ;;  %v5621_v18 = vpop.permute.xlu2 %1745  ;;  %s4887_s5 = scalar_lea.hbm %s8295_s4, 4 }
 0x2f3   : > { %p4889_p7 = scmp.lt.s32.totalorder %s4887_s5, %s4883_s24 }
 0x2f4   : > { %v5584_v0 = vpop.permute.xlu0 %1719  ;;  %4086 = vmatmul.msk.f32.vlgmr.msra.gmra.mxu0 %vm8301_vm3, %v5374_v9 }
 0x2f5   : > { %4109 = vmatpush.xpose.msk.msra.mxu1 %vm8301_vm3, %v908_v50  ;;  %p4890_p9 = por %p4889_p7, %p4888_p6 }
 0x2f7   : > { %p4891_p10 = pnand %p4890_p9, %p4886_p5 }
 0x2f9   : > { %4110 = vmatpush.xpose.msk.msra.mxu1 %vm8301_vm3, %v5503_v45 }
 0x2fa   : > { %v5613_v7 = vpop.permute.xlu1 %1741  ;;  %2405 = vrot.lane.b32.xlu0 %v5374_v9, %s4967_s11  ;;  %v1752_v26 = vpop.permute.xlu2 %1751 }
 0x2fc   : > { %v5594_v3 = vpop.permute.xlu0 %1725  ;;  %4087 = vmatmul.msk.f32.gmra.mxu0 %vm8301_vm3, %v5371_v8 }
 0x2fd   : > { %4111 = vmatpush.xpose.msk.msra.mxu1 %vm8301_vm3, %v904_v46 }
 0x301   : > { %4112 = vmatpush.xpose.msk.msra.mxu1 %vm8301_vm3, %v5510_v47 }
 0x302   : > { %v5629_v21 = vpop.permute.xlu1 %1747  ;;  %v1758_v31 = vpop.permute.xlu2 %1757 }
 0x304   : > { %v5605_v6 = vpop.permute.xlu0 %1731  ;;  %4088 = vmatmul.msk.f32.gmra.mxu0 %vm8301_vm3, %v5381_v10 }
 0x305   : > { %4113 = vmatpush.xpose.msk.msra.mxu1 %vm8301_vm3, %v5487_v42 }
 0x309   : > { %4114 = vmatpush.xpose.msk.msra.mxu1 %vm8301_vm3, %v5496_v43 }
 0x30a   : > { %v1754_v27 = vpop.permute.xlu1 %1753  ;;  %v1764_v34 = vpop.permute.xlu2 %1763 }
 0x30c   : > { %v5615_v13 = vpop.permute.xlu0 %1737  ;;  %4089 = vmatmul.msk.f32.gmra.mxu0 %vm8301_vm3, %v5389_v12 }
 0x30d   : > { %4115 = vmatpush.xpose.msk.msra.mxu1 %vm8301_vm3, %v5498_v44 }
 0x311   : > { %4116 = vmatpush.xpose.msk.msra.mxu1 %vm8301_vm3, %v5476_v37 }
 0x312   : > { %v1760_v32 = vpop.permute.xlu1 %1759 }
 0x314   : > { %v5631_v22 = vpop.permute.xlu0 %1743  ;;  %4090 = vmatmul.msk.f32.gmra.mxu0 %vm8301_vm3, %v5386_v11 }
 0x315   : > { %4117 = vmatpush.xpose.msk.msra.mxu1 %vm8301_vm3, %v5484_v40 }
 0x318   : > { %4118 = vmatmul.msk.f32.vlgmr.msra.gmra.mxu1 %vm8301_vm3, %v5374_v9 }
 0x31a   : > { %v1766_v35 = vpop.permute.xlu1 %1765 }
 0x31c   : > { %v1750_v28 = vpop.permute.xlu0 %1749  ;;  %4091 = vmatmul.msk.f32.gmra.mxu0 %vm8301_vm3, %v5406_v16 }
 0x320   : > { %4119 = vmatmul.msk.f32.gmra.mxu1 %vm8301_vm3, %v5371_v8  ;;  %v1770_v8 = vpop.permute.xlu2 %1769 }
 0x322   : > { %v1772_v9 = vpop.permute.xlu1 %1771 }
 0x323   : > { %4134 = vmatpush.xpose.msk.msra.mxu2 %vm8301_vm3, %v1772_v9 }
 0x324   : > { %v1756_v33 = vpop.permute.xlu0 %1755  ;;  %4092 = vmatmul.msk.f32.gmra.mxu0 %vm8301_vm3, %v5398_v14 }
 0x327   : > { %4135 = vmatpush.xpose.msk.msra.mxu2 %vm8301_vm3, %v1770_v8 }
 0x328   : > { %4120 = vmatmul.msk.f32.gmra.mxu1 %vm8301_vm3, %v5381_v10  ;;  %v5667_v40 = vpop.permute.xlu2 %1775 }
 0x32a   : > { %v5664_v39 = vpop.permute.xlu1 %1777 }
 0x32c   : > { %v1762_v36 = vpop.permute.xlu0 %1761  ;;  %4093 = vmatmul.msk.f32.gmra.mxu0 %vm8301_vm3, %v5403_v15 }
 0x330   : > { %4121 = vmatmul.msk.f32.gmra.mxu1 %vm8301_vm3, %v5389_v12  ;;  %v1782_v44 = vpop.permute.xlu2 %1781 }
 0x332   : > { %v1784_v42 = vpop.permute.xlu1 %1783 }
 0x334   : > { %v1768_v37 = vpop.permute.xlu0 %1767  ;;  %4094 = vmatmul.msk.f32.gmra.mxu0 %vm8301_vm3, %v5423_v20 }
 0x335   : > { %4136 = vmatpush.xpose.msk.msra.mxu2 %vm8301_vm3, %v1768_v37 }
 0x338   : > { %4122 = vmatmul.msk.f32.gmra.mxu1 %vm8301_vm3, %v5386_v11  ;;  %v1788_v47 = vpop.permute.xlu2 %1787 }
 0x339   : > { %4137 = vmatpush.xpose.msk.msra.mxu2 %vm8301_vm3, %v1766_v35 }
 0x33a   : > { %v1790_v45 = vpop.permute.xlu1 %1789 }
 0x33c   : > { %v5657_v38 = vpop.permute.xlu0 %1773  ;;  %4095 = vmatmul.msk.f32.gmra.mxu0 %vm8301_vm3, %v5413_v17 }
 0x33d   : > { %4138 = vmatpush.xpose.msk.msra.mxu2 %vm8301_vm3, %v1764_v34 }
 0x340   : > { %4123 = vmatmul.msk.f32.gmra.mxu1 %vm8301_vm3, %v5406_v16  ;;  %v1794_v50 = vpop.permute.xlu2 %1793 }
 0x341   : > { %4139 = vmatpush.xpose.msk.msra.mxu2 %vm8301_vm3, %v1762_v36  ;;  %v8576_v36 = vmov 0 }
 0x342   : > { %v1796_v49 = vpop.permute.xlu1 %1795 }
 0x344   : > { %v5669_v41 = vpop.permute.xlu0 %1779  ;;  %4096 = vmatmul.msk.f32.gmra.mxu0 %vm8301_vm3, %v5420_v19 }
 0x345   : > { %4140 = vmatpush.xpose.msk.msra.mxu2 %vm8301_vm3, %v1760_v32 }
 0x348   : > { %4124 = vmatmul.msk.f32.gmra.mxu1 %vm8301_vm3, %v5398_v14  ;;  %v1800_v52 = vpop.permute.xlu2 %1799 }
 0x349   : > { %4141 = vmatpush.xpose.msk.msra.mxu2 %vm8301_vm3, %v1758_v31 }
 0x34c   : > { %v1786_v43 = vpop.permute.xlu0 %1785  ;;  %4097 = vmatmul.msk.f32.gmra.mxu0 %vm8301_vm3, %v5442_v25 }
 0x34d   : > { %4142 = vmatpush.xpose.msk.msra.mxu2 %vm8301_vm3, %v1756_v33  ;;  %v8573_v33 = vmov 0 }
 0x350   : > { %4125 = vmatmul.msk.f32.gmra.mxu1 %vm8301_vm3, %v5403_v15 }
 0x351   : > { %4143 = vmatpush.xpose.msk.msra.mxu2 %vm8301_vm3, %v1754_v27 }
 0x354   : > { %v1792_v46 = vpop.permute.xlu0 %1791  ;;  %4098 = vmatmul.msk.f32.gmra.mxu0 %vm8301_vm3, %v5434_v23 }
 0x355   : > { %4144 = vmatpush.xpose.msk.msra.mxu2 %vm8301_vm3, %v1752_v26 }
 0x358   : > { %4126 = vmatmul.msk.f32.gmra.mxu1 %vm8301_vm3, %v5423_v20  ;;  %v1802_v20 = vpop.permute.xlu1 %1801 }
 0x359   : > { %4145 = vmatpush.xpose.msk.msra.mxu2 %vm8301_vm3, %v1750_v28 }
 0x35c   : > { %v1798_v48 = vpop.permute.xlu0 %1797  ;;  %4099 = vmatmul.msk.f32.gmra.mxu0 %vm8301_vm3, %v5439_v24 }
 0x35d   : > { %4146 = vmatpush.xpose.msk.msra.mxu2 %vm8301_vm3, %v5629_v21 }
 0x360   : > { %4127 = vmatmul.msk.f32.gmra.mxu1 %vm8301_vm3, %v5413_v17  ;;  %v811_v17 = vld [vmem:[%s5088_s17] sm:$0xff] }
 0x361   : > { %4147 = vmatpush.xpose.msk.msra.mxu2 %vm8301_vm3, %v5621_v18  ;;  %vm819_vm4 = vnez %v811_v17 }
 0x364   : > { %v1804_v51 = vpop.permute.xlu0 %1803  ;;  %4100 = vmatmul.msk.f32.gmra.mxu0 %vm8301_vm3, %v5458_v30 }
 0x365   : > { %4166 = vmatpush.xpose.msk.msra.mxu3 %vm8301_vm3, %v1804_v51  ;;  %4148 = vmatpush.xpose.msk.msra.mxu2 %vm8301_vm3, %v5631_v22 }
 0x368   : > { %4128 = vmatmul.msk.f32.gmra.mxu1 %vm8301_vm3, %v5420_v19  ;;  %v812_v19 = vld [vmem:[%s5088_s17 + $0x8] sm:$0xff] }
 0x369   : > { %4167 = vmatpush.xpose.msk.msra.mxu3 %vm8301_vm3, %v1802_v20  ;;  %4149 = vmatpush.xpose.msk.msra.mxu2 %vm8301_vm3, %v5613_v7  ;;  %vm820_vm5 = vnez %v812_v19  ;;  %v815_v19 = vld [vmem:[%s5088_s17 + $0x20] sm:$0xff] }
 0x36a   : > { %vm823_vm15 = vnez %v815_v19 }
 0x36c   : > { %4101 = vmatmul.msk.f32.gmra.mxu0 %vm8301_vm3, %v5453_v29  ;;  %4150 = vmatmul.msk.f32.vlgmr.msra.gmra.mxu2 %vm8301_vm3, %v5552_v58 }
 0x36d   : > { %4168 = vmatpush.xpose.msk.msra.mxu3 %vm8301_vm3, %v1800_v52 }
 0x370   : > { %4129 = vmatmul.msk.f32.gmra.mxu1 %vm8301_vm3, %v5442_v25  ;;  %v8320_v25 = vmov 0  }
 0x371   : > { %4169 = vmatpush.xpose.msk.msra.mxu3 %vm8301_vm3, %v1798_v48  ;;  %v5735_v53 = vsel %vm819_vm4, 16843009, %v8320_v25  ;;  %v1053_v21 = vpop.f32.mrf.mxu0 }
 0x372   : > { %v1206_v55 = vunpack.c.0.s8 %v5735_v53  ;;  %v1208_v22 = vunpack.c.1.s8 %v5735_v53  ;;  %v1166_v32 = vmul.f32 0.35355338, %v1053_v21  ;;  %v1210_v20 = vunpack.c.2.s8 %v5735_v53 }
 0x374   : > { %4151 = vmatmul.msk.f32.gmra.mxu2 %vm8301_vm3, %v5550_v57 }
 0x375   : > { %4170 = vmatpush.xpose.msk.msra.mxu3 %vm8301_vm3, %v1796_v49 }
 0x378   : > { %4130 = vmatmul.msk.f32.gmra.mxu1 %vm8301_vm3, %v5434_v23  ;;  %v5738_v23 = vsel %vm820_vm5, 16843009, %v8320_v25 }
 0x379   : > { %4171 = vmatpush.xpose.msk.msra.mxu3 %vm8301_vm3, %v1794_v50  ;;  %v1207_v56 = vunpack.c.0.s8 %v5738_v23  ;;  %v1209_v26 = vunpack.c.1.s8 %v5738_v23  ;;  %v1056_v37 = vpop.f32.mrf.mxu0  ;;  %v1211_v52 = vunpack.c.2.s8 %v5738_v23 }
 0x37b   : > { %v1240_v28 = vpack.c.b16 %v1209_v26, %v1208_v22 }
 0x37c   : > { %4152 = vmatmul.msk.f32.gmra.mxu2 %vm8301_vm3, %v5536_v54 }
 0x37d   : > { %4172 = vmatpush.xpose.msk.msra.mxu3 %vm8301_vm3, %v1792_v46  ;;  %v1241_v31 = vpack.c.b8 %v1240_v28, %v1240_v28  ;;  %v8582_v46 = vmov 0 }
 0x37f   : > { %vm1271_vm8 = vnez %v1241_v31  ;;  %v5887_v31 = vsel %vm823_vm15, 16843009, %v8320_v25 }
 0x380   : > { %4131 = vmatmul.msk.f32.gmra.mxu1 %vm8301_vm3, %v5439_v24  ;;  %v1238_v24 = vpack.c.b16 %v1207_v56, %v1206_v55  ;;  %v1287_v34 = vsel %vm1271_vm8, 16843009, %v8320_v25 }
 0x381   : > { %4173 = vmatpush.xpose.msk.msra.mxu3 %vm8301_vm3, %v1790_v45  ;;  %v1304_v8 = vunpack.c.0.s8 %v1287_v34 }
 0x382   : > { %v1239_v7 = vpack.c.b8 %v1238_v24, %v1238_v24 }
 0x383   : > { %vm5783_vm10 = vcmp.ne.s32.totalorder %v1304_v8, 0  ;;  %v8588_v8 = vmov 0 }
 0x384   : > { %4153 = vmatmul.msk.f32.gmra.mxu2 %vm8301_vm3, %v5570_v61  ;;  %vm1270_vm6 = vnez %v1239_v7 }
 0x385   : > { %4174 = vmatpush.xpose.msk.msra.mxu3 %vm8301_vm3, %v1788_v47  ;;  %v1286_v18 = vsel %vm1270_vm6, 16843009, %v8320_v25 }
 0x386   : > { %v1302_v27 = vunpack.c.0.s8 %v1286_v18 }
 0x388   : > { %4132 = vmatmul.msk.f32.gmra.mxu1 %vm8301_vm3, %v5458_v30  ;;  %v1303_v30 = vunpack.c.1.s8 %v1286_v18  ;;  %vm5758_vm7 = vcmp.ne.s32.totalorder %v1302_v27, 0 }
 0x389   : > { %4175 = vmatpush.xpose.msk.msra.mxu3 %vm8301_vm3, %v1786_v43  ;;  %v8574_v33 = vsel %vm5758_vm7, 4294967295, %v8573_v33  ;;  %v5771_v9 = vsel %vm5758_vm7, -60000.0, %v1166_v32  ;;  %v1168_v43 = vmul.f32 0.35355338, %v1056_v37 }
 0x38a   : > { %8575 = vst [vmem:[#allocation13_spill] sm:$0xff] %v8574_v33  ;;  %vm5765_vm9 = vcmp.ne.s32.totalorder %v1303_v30, 0 }
 0x38b   : > { %v8577_v36 = vsel %vm5765_vm9, 4294967295, %v8576_v36 }
 0x38c   : > { %4154 = vmatmul.msk.f32.gmra.mxu2 %vm8301_vm3, %v5568_v60  ;;  %8578 = vst [vmem:[#allocation14_spill] sm:$0xff] %v8577_v36  ;;  %v8644_v36 = vmov 0 }
 0x38d   : > { %4176 = vmatpush.xpose.msk.msra.mxu3 %vm8301_vm3, %v1784_v42  ;;  %v1305_v42 = vunpack.c.1.s8 %v1287_v34 }
 0x38f   : > { %vm5789_vm11 = vcmp.ne.s32.totalorder %v1305_v42, 0 }
 0x390   : > { %4133 = vmatmul.msk.f32.gmra.mxu1 %vm8301_vm3, %v5453_v29  ;;  %v8583_v46 = vsel %vm5789_vm11, 4294967295, %v8582_v46 }
 0x391   : > { %4177 = vmatpush.xpose.msk.msra.mxu3 %vm8301_vm3, %v1782_v44  ;;  %v8579_v44 = vmov 0  ;;  %8584 = vst [vmem:[#allocation16_spill] sm:$0xff] %v8583_v46 }
 0x392   : > { %v8580_v44 = vsel %vm5783_vm10, 4294967295, %v8579_v44 }
 0x393   : > { %8581 = vst [vmem:[#allocation15_spill] sm:$0xff] %v8580_v44 }
 0x394   : > { %4155 = vmatmul.msk.f32.gmra.mxu2 %vm8301_vm3, %v5584_v0 }
 0x395   : > { %4178 = vmatpush.xpose.msk.msra.mxu3 %vm8301_vm3, %v5669_v41  ;;  %v1118_v35 = vpop.f32.mrf.mxu1 }
 0x396   : > { %v1167_v29 = vmul.f32 0.35355338, %v1118_v35  ;;  %v8585_v35 = vmov 0 }
 0x398   : > { %v5777_v41 = vsel %vm5765_vm9, -60000.0, %v1167_v29  ;;  %v1228_v29 = vunpack.c.3.s8 %v5887_v31 }
 0x399   : > { %4179 = vmatpush.xpose.msk.msra.mxu3 %vm8301_vm3, %v5664_v39  ;;  %v1398_v39 = vmax.f32 %v5771_v9, %v5777_v41 }
 0x39b   : > { %1399 = vmax.xlane.f32.xlu2 %v1398_v39 }
 0x39c   : > { %4156 = vmatmul.msk.f32.gmra.mxu2 %vm8301_vm3, %v5557_v59 }
 0x39d   : > { %4180 = vmatpush.xpose.msk.msra.mxu3 %vm8301_vm3, %v5667_v40  ;;  %v1121_v45 = vpop.f32.mrf.mxu1  ;;  %v5795_v40 = vsel %vm5783_vm10, -60000.0, %v1168_v43 }
 0x39e   : > { %v1169_v47 = vmul.f32 0.35355338, %v1121_v45 }
 0x3a0   : > { %v5803_v48 = vsel %vm5789_vm11, -60000.0, %v1169_v47 }
 0x3a1   : > { %4181 = vmatpush.xpose.msk.msra.mxu3 %vm8301_vm3, %v5657_v38  ;;  %v1401_v38 = vmax.f32 %v5795_v40, %v5803_v48 }
 0x3a3   : > { %1402 = vmax.xlane.f32.xlu0 %v1401_v38 }
 0x3a4   : > { %4182 = vmatmul.msk.f32.vlgmr.msra.gmra.mxu3 %vm8301_vm3, %v5552_v58  ;;  %4157 = vmatmul.msk.f32.gmra.mxu2 %vm8301_vm3, %v5582_v63 }
 0x3a5   : > { %v1124_v50 = vpop.f32.mrf.mxu1 }
 0x3ac   : > { %4183 = vmatmul.msk.f32.gmra.mxu3 %vm8301_vm3, %v5550_v57  ;;  %4158 = vmatmul.msk.f32.gmra.mxu2 %vm8301_vm3, %v5594_v3  ;;  %v814_v57 = vld [vmem:[%s5088_s17 + $0x18] sm:$0xff] }
 0x3ad   : > { %vm822_vm13 = vnez %v814_v57  ;;  %v1127_v7 = vpop.f32.mrf.mxu1 }
 0x3ae   : > { %v1173_v27 = vmul.f32 0.35355338, %v1127_v7 }
 0x3b4   : > { %4184 = vmatmul.msk.f32.gmra.mxu3 %vm8301_vm3, %v5536_v54  ;;  %4159 = vmatmul.msk.f32.gmra.mxu2 %vm8301_vm3, %v5575_v62  ;;  %v813_v54 = vld [vmem:[%s5088_s17 + $0x10] sm:$0xff] }
 0x3b5   : > { %vm821_vm12 = vnez %v813_v54 }
 0x3b6   : > { %v5850_v58 = vsel %vm821_vm12, 16843009, %v8320_v25 }
 0x3b7   : > { %v1214_v57 = vunpack.c.0.s8 %v5850_v58 }
 0x3bc   : > { %4185 = vmatmul.msk.f32.gmra.mxu3 %vm8301_vm3, %v5570_v61  ;;  %4160 = vmatmul.msk.f32.gmra.mxu2 %vm8301_vm3, %v5592_v2 }
 0x3c4   : > { %4186 = vmatmul.msk.f32.gmra.mxu3 %vm8301_vm3, %v5568_v60  ;;  %4161 = vmatmul.msk.f32.gmra.mxu2 %vm8301_vm3, %v5605_v6  ;;  %v1218_v60 = vunpack.c.2.s8 %v5850_v58 }
 0x3cc   : > { %4187 = vmatmul.msk.f32.gmra.mxu3 %vm8301_vm3, %v5584_v0  ;;  %4162 = vmatmul.msk.f32.gmra.mxu2 %vm8301_vm3, %v5590_v1 }
 0x3d4   : > { %4188 = vmatmul.msk.f32.gmra.mxu3 %vm8301_vm3, %v5557_v59  ;;  %4163 = vmatmul.msk.f32.gmra.mxu2 %vm8301_vm3, %v5603_v5  ;;  %v5853_v59 = vsel %vm822_vm13, 16843009, %v8320_v25 }
 0x3d5   : > { %v1219_v61 = vunpack.c.2.s8 %v5853_v59  ;;  %v1221_v0 = vunpack.c.3.s8 %v5853_v59 }
 0x3dc   : > { %4189 = vmatmul.msk.f32.gmra.mxu3 %vm8301_vm3, %v5582_v63  ;;  %4164 = vmatmul.msk.f32.gmra.mxu2 %vm8301_vm3, %v5615_v13  ;;  %v1220_v63 = vunpack.c.3.s8 %v5850_v58 }
 0x3e4   : > { %4190 = vmatmul.msk.f32.gmra.mxu3 %vm8301_vm3, %v5594_v3  ;;  %4165 = vmatmul.msk.f32.gmra.mxu2 %vm8301_vm3, %v5601_v4  ;;  %v1212_v3 = vunpack.c.3.s8 %v5735_v53 }
 0x3ec   : > { %4191 = vmatmul.msk.f32.gmra.mxu3 %vm8301_vm3, %v5575_v62  ;;  %v5857_v62 = vpack.c.b16 %v1219_v61, %v1218_v60  ;;  %v1215_v60 = vunpack.c.0.s8 %v5853_v59 }
 0x3ef   : > { %v1918_v51 = vpop.f32.mrf.mxu2 }
 0x3f0   : > { %v2031_v56 = vmul.f32 0.35355338, %v1918_v51 }
 0x3f2   : > { %v5880_v28 = vsel %vm5758_vm7, -60000.0, %v2031_v56 }
 0x3f4   : > { %4192 = vmatmul.msk.f32.gmra.mxu3 %vm8301_vm3, %v5592_v2  ;;  %v5863_v2 = vpack.c.b16 %v1221_v0, %v1220_v63 }
 0x3f7   : > { %v1921_v21 = vpop.f32.mrf.mxu2 }
 0x3f8   : > { %v2033_v42 = vmul.f32 0.35355338, %v1921_v21 }
 0x3fa   : > { %v5921_v51 = vsel %vm5783_vm10, -60000.0, %v2033_v42 }
 0x3fc   : > { %4193 = vmatmul.msk.f32.gmra.mxu3 %vm8301_vm3, %v5605_v6  ;;  %v1213_v6 = vunpack.c.3.s8 %v5738_v23 }
 0x3fe   : > { %v1244_v49 = vpack.c.b16 %v1213_v6, %v1212_v3 }
 0x3ff   : > { %v1924_v63 = vpop.f32.mrf.mxu2 }
 0x400   : > { %v1245_v17 = vpack.c.b8 %v1244_v49, %v1244_v49  ;;  %v1171_v49 = vmul.f32 0.35355338, %v1124_v50  ;;  %v2035_v50 = vmul.f32 0.35355338, %v1924_v63  ;;  %v817_v63 = vld [vmem:[%s5088_s17 + $0x30] sm:$0xff] }
 0x402   : > { %vm1273_vm14 = vnez %v1245_v17  ;;  %v8591_v17 = vmov 0 }
 0x403   : > { %v1289_v18 = vsel %vm1273_vm14, 16843009, %v8320_v25  ;;  %vm825_vm14 = vnez %v817_v63 }
 0x404   : > { %4194 = vmatmul.msk.f32.gmra.mxu3 %vm8301_vm3, %v5590_v1  ;;  %v1059_v1 = vpop.f32.mrf.mxu0  ;;  %v1309_v22 = vunpack.c.1.s8 %v1289_v18  ;;  %v1308_v23 = vunpack.c.0.s8 %v1289_v18 }
 0x405   : > { %v1170_v6 = vmul.f32 0.35355338, %v1059_v1  ;;  %v8594_v1 = vmov 0 }
 0x406   : > { %vm5894_vm2 = vcmp.ne.s32.totalorder %v1309_v22, 0  ;;  %vm5900_vm4 = vcmp.ne.s32.totalorder %v1308_v23, 0 }
 0x407   : > { %v8586_v35 = vsel %vm5894_vm2, 4294967295, %v8585_v35  ;;  %v8589_v8 = vsel %vm5900_vm4, 4294967295, %v8588_v8  ;;  %v5912_v45 = vsel %vm5894_vm2, -60000.0, %v1173_v27 }
 0x408   : > { %8587 = vst [vmem:[#allocation17_spill] sm:$0xff] %v8586_v35  ;;  %v8621_v35 = vmov 0 }
 0x409   : > { %8590 = vst [vmem:[#allocation18_spill] sm:$0xff] %v8589_v8 }
 0x40c   : > { %4195 = vmatmul.msk.f32.gmra.mxu3 %vm8301_vm3, %v5603_v5  ;;  %v1242_v5 = vpack.c.b16 %v1211_v52, %v1210_v20  ;;  %v1062_v24 = vpop.f32.mrf.mxu0 }
 0x40d   : > { %v1172_v53 = vmul.f32 0.35355338, %v1062_v24 }
 0x40e   : > { %v1243_v55 = vpack.c.b8 %v1242_v5, %v1242_v5  ;;  %v1246_v5 = vpack.c.b16 %v1215_v60, %v1214_v57 }
 0x40f   : > { %v5908_v43 = vsel %vm5900_vm4, -60000.0, %v1172_v53 }
 0x410   : > { %vm1272_vm1 = vnez %v1243_v55  ;;  %v1407_v0 = vmax.f32 %v5908_v43, %v5912_v45  ;;  %v1247_v56 = vpack.c.b8 %v1246_v5, %v1246_v5  ;;  %v5989_v5 = vsel %vm825_vm14, 16843009, %v8320_v25 }
 0x411   : > { %v1288_v47 = vsel %vm1272_vm1, 16843009, %v8320_v25 }
 0x412   : > { %v1307_v54 = vunpack.c.1.s8 %v1288_v47  ;;  %v1306_v3 = vunpack.c.0.s8 %v1288_v47  ;;  %vm1274_vm8 = vnez %v1247_v56 }
 0x413   : > { %v1290_v27 = vsel %vm1274_vm8, 16843009, %v8320_v25 }
 0x414   : > { %4196 = vmatmul.msk.f32.gmra.mxu3 %vm8301_vm3, %v5615_v13  ;;  %v816_v13 = vld [vmem:[%s5088_s17 + $0x28] sm:$0xff]  ;;  %vm5929_vm5 = vcmp.ne.s32.totalorder %v1307_v54, 0  ;;  %vm5933_vm6 = vcmp.ne.s32.totalorder %v1306_v3, 0  ;;  %v1065_v53 = vpop.f32.mrf.mxu0  ;;  %v1310_v42 = vunpack.c.0.s8 %v1290_v27  ;;  %v8600_v3 = vmov 0 }
 0x415   : > { %vm824_vm0 = vnez %v816_v13  ;;  %v8592_v17 = vsel %vm5929_vm5, 4294967295, %v8591_v17  ;;  %v8595_v1 = vsel %vm5933_vm6, 4294967295, %v8594_v1  ;;  %v5939_v19 = vsel %vm5933_vm6, -60000.0, %v1170_v6 }
 0x416   : > { %v5890_v32 = vsel %vm824_vm0, 16843009, %v8320_v25  ;;  %8593 = vst [vmem:[#allocation19_spill] sm:$0xff] %v8592_v17  ;;  %v5943_v13 = vsel %vm5929_vm5, -60000.0, %v1171_v49  ;;  %v5949_v18 = vsel %vm5933_vm6, -60000.0, %v2035_v50  ;;  %vm5974_vm13 = vcmp.ne.s32.totalorder %v1310_v42, 0 }
 0x417   : > { %v1229_v37 = vunpack.c.3.s8 %v5890_v32  ;;  %8596 = vst [vmem:[#allocation20_spill] sm:$0xff] %v8595_v1  ;;  %v1404_v7 = vmax.f32 %v5939_v19, %v5943_v13  ;;  %v1174_v54 = vmul.f32 0.35355338, %v1065_v53  ;;  %v8601_v3 = vsel %vm5974_vm13, 4294967295, %v8600_v3 }
 0x418   : > { %8602 = vst [vmem:[#allocation22_spill] sm:$0xff] %v8601_v3 }
 0x419   : > { %v5904_v39 = vpack.c.b16 %v1229_v37, %v1228_v29  ;;  %v1311_v29 = vunpack.c.1.s8 %v1290_v27  ;;  %v5980_v6 = vsel %vm5974_vm13, -60000.0, %v1174_v54 }
 0x41b   : > { %vm5968_vm12 = vcmp.ne.s32.totalorder %v1311_v29, 0 }
 0x41c   : > { %4197 = vmatmul.msk.f32.gmra.mxu3 %vm8301_vm3, %v5601_v4 }
 0x427   : > { %v1983_v4 = vpop.f32.mrf.mxu3 }
 0x428   : > { %v2032_v26 = vmul.f32 0.35355338, %v1983_v4  ;;  %v1927_v4 = vpop.f32.mrf.mxu2 }
 0x42a   : > { %v5884_v30 = vsel %vm5765_vm9, -60000.0, %v2032_v26  ;;  %v2037_v26 = vmul.f32 0.35355338, %v1927_v4  ;;  %v1217_v4 = vunpack.c.1.s8 %v5853_v59  ;;  %v8606_v59 = vmov 0 }
 0x42b   : > { %v2095_v34 = vmax.f32 %v5880_v28, %v5884_v30 }
 0x42c   : > { %v5960_v47 = vsel %vm5900_vm4, -60000.0, %v2037_v26 }
 0x42d   : > { %2096 = vmax.xlane.f32.xlu2 %v2095_v34  ;;  %v1130_v34 = vpop.f32.mrf.mxu1 }
 0x42e   : > { %v1175_v57 = vmul.f32 0.35355338, %v1130_v34 }
 0x42f   : > { %v1986_v38 = vpop.f32.mrf.mxu3 }
 0x430   : > { %v2034_v61 = vmul.f32 0.35355338, %v1986_v38  ;;  %v5984_v49 = vsel %vm5968_vm12, -60000.0, %v1175_v57  ;;  %v1930_v29 = vpop.f32.mrf.mxu2 }
 0x432   : > { %v5925_v20 = vsel %vm5789_vm11, -60000.0, %v2034_v61  ;;  %v8597_v61 = vmov 0 }
 0x433   : > { %v2098_v52 = vmax.f32 %v5921_v51, %v5925_v20  ;;  %v8598_v61 = vsel %vm5968_vm12, 4294967295, %v8597_v61 }
 0x434   : > { %8599 = vst [vmem:[#allocation21_spill] sm:$0xff] %v8598_v61 }
 0x435   : > { %2099 = vmax.xlane.f32.xlu1 %v2098_v52  ;;  %1408 = vmax.xlane.f32.xlu2 %v1407_v0  ;;  %v818_v0 = vld [vmem:[%s5088_s17 + $0x38] sm:$0xff]  ;;  %v1410_v52 = vmax.f32 %v5980_v6, %v5984_v49  ;;  %v1133_v34 = vpop.f32.mrf.mxu1  ;;  %s4969_s17 = smov 80  }
 0x436   : > { %vm826_vm15 = vnez %v818_v0  ;;  %v2039_v0 = vmul.f32 0.35355338, %v1930_v29 }
 0x437   : > { %v1989_v55 = vpop.f32.mrf.mxu3  ;;  %v5992_v50 = vsel %vm826_vm15, 16843009, %v8320_v25 }
 0x438   : > { %v2036_v24 = vmul.f32 0.35355338, %v1989_v55  ;;  %v1236_v55 = vunpack.c.3.s8 %v5989_v5  ;;  %v1237_v56 = vunpack.c.3.s8 %v5992_v50 }
 0x43a   : > { %v5953_v21 = vsel %vm5929_vm5, -60000.0, %v2036_v24  ;;  %v5996_v24 = vpack.c.b16 %v1237_v56, %v1236_v55  ;;  %v1251_v56 = vpack.c.b8 %v5857_v62, %v5857_v62 }
 0x43b   : > { %v2101_v22 = vmax.f32 %v5949_v18, %v5953_v21 }
 0x43c   : > { %vm1276_vm14 = vnez %v1251_v56 }
 0x43d   : > { %2102 = vmax.xlane.f32.xlu0 %v2101_v22  ;;  %1405 = vmax.xlane.f32.xlu1 %v1404_v7  ;;  %v1216_v7 = vunpack.c.1.s8 %v5850_v58  ;;  %v8603_v58 = vmov 0 }
 0x43f   : > { %v1992_v23 = vpop.f32.mrf.mxu3  ;;  %v1248_v22 = vpack.c.b16 %v1217_v4, %v1216_v7 }
 0x440   : > { %v2038_v37 = vmul.f32 0.35355338, %v1992_v23  ;;  %v1068_v23 = vpop.f32.mrf.mxu0 }
 0x441   : > { %v1249_v26 = vpack.c.b8 %v1248_v22, %v1248_v22  ;;  %v1176_v42 = vmul.f32 0.35355338, %v1068_v23  ;;  %v6033_v22 = vsel %vm5974_vm13, -60000.0, %v2039_v0  ;;  %v1136_v23 = vpop.f32.mrf.mxu1 }
 0x442   : > { %v5964_v38 = vsel %vm5894_vm2, -60000.0, %v2038_v37  ;;  %v1179_v8 = vmul.f32 0.35355338, %v1136_v23 }
 0x443   : > { %v2104_v60 = vmax.f32 %v5960_v47, %v5964_v38  ;;  %vm1275_vm0 = vnez %v1249_v26 }
 0x444   : > { %v1291_v27 = vsel %vm1275_vm0, 16843009, %v8320_v25 }
 0x445   : > { %2105 = vmax.xlane.f32.xlu2 %v2104_v60  ;;  %v1313_v37 = vunpack.c.1.s8 %v1291_v27 }
 0x447   : > { %v1995_v53 = vpop.f32.mrf.mxu3  ;;  %vm6011_vm8 = vcmp.ne.s32.totalorder %v1313_v37, 0 }
 0x448   : > { %v8607_v59 = vsel %vm6011_vm8, 4294967295, %v8606_v59  ;;  %v2040_v57 = vmul.f32 0.35355338, %v1995_v53 }
 0x449   : > { %8608 = vst [vmem:[#allocation24_spill] sm:$0xff] %v8607_v59  ;;  %v1139_v56 = vpop.f32.mrf.mxu1 }
 0x44a   : > { %v6029_v7 = vsel %vm5968_vm12, -60000.0, %v2040_v57 }
 0x44b   : > { %v2107_v26 = vmax.f32 %v6033_v22, %v6029_v7 }
 0x44d   : > { %1411 = vmax.xlane.f32.xlu2 %v1410_v52  ;;  %v1933_v52 = vpop.f32.mrf.mxu2 }
 0x44e   : > { %v2041_v4 = vmul.f32 0.35355338, %v1933_v52 }
 0x44f   : > { %v1998_v60 = vpop.f32.mrf.mxu3 }
 0x450   : > { %v2042_v55 = vmul.f32 0.35355338, %v1998_v60 }
 0x451   : > { %2411 = vrot.lane.b32.xlu0 %v5389_v12, %s4967_s11  ;;  %v1312_v12 = vunpack.c.0.s8 %v1291_v27  ;;  %v1071_v27 = vpop.f32.mrf.mxu0 }
 0x452   : > { %v6039_v53 = vsel %vm6011_vm8, -60000.0, %v2042_v55  ;;  %v1178_v61 = vmul.f32 0.35355338, %v1071_v27  ;;  %v1225_v27 = vunpack.c.1.s8 %v5890_v32 }
 0x453   : > { %vm6007_vm1 = vcmp.ne.s32.totalorder %v1312_v12, 0  ;;  %v1292_v12 = vsel %vm1276_vm14, 16843009, %v8320_v25 }
 0x454   : > { %v8604_v58 = vsel %vm6007_vm1, 4294967295, %v8603_v58  ;;  %v6043_v62 = vsel %vm6007_vm1, -60000.0, %v2041_v4  ;;  %v1314_v57 = vunpack.c.0.s8 %v1292_v12 }
 0x455   : > { %8605 = vst [vmem:[#allocation23_spill] sm:$0xff] %v8604_v58  ;;  %v2110_v29 = vmax.f32 %v6043_v62, %v6039_v53 }
 0x456   : > { %2409 = vrot.lane.b32.xlu1 %v5381_v10, %s4967_s11  ;;  %v1177_v10 = vmul.f32 0.35355338, %v1133_v34  ;;  %v1253_v34 = vpack.c.b8 %v5863_v2, %v5863_v2  ;;  %vm6055_vm3 = vcmp.ne.s32.totalorder %v1314_v57, 0  ;;  %v8612_v2 = vmov 0 }
 0x457   : > { %v2001_v37 = vpop.f32.mrf.mxu3  ;;  %v8613_v2 = vsel %vm6055_vm3, 4294967295, %v8612_v2  ;;  %v8618_v57 = vmov 0  ;;  %v6116_v23 = vsel %vm6055_vm3, -60000.0, %v1178_v61  ;;  %v1227_v61 = vunpack.c.2.s8 %v5890_v32 }
 0x458   : > { %v6021_v54 = vsel %vm6011_vm8, -60000.0, %v1177_v10  ;;  %v1936_v10 = vpop.f32.mrf.mxu2  ;;  %vm1277_vm15 = vnez %v1253_v34  ;;  %v2044_v60 = vmul.f32 0.35355338, %v2001_v37  ;;  %8614 = vst [vmem:[#allocation26_spill] sm:$0xff] %v8613_v2  ;;  %v1181_v37 = vmul.f32 0.35355338, %v1139_v56 }
 0x459   : > { %v2043_v0 = vmul.f32 0.35355338, %v1936_v10  ;;  %v1293_v52 = vsel %vm1277_vm15, 16843009, %v8320_v25  ;;  %v1074_v55 = vpop.f32.mrf.mxu0  ;;  %v8615_v10 = vmov 0  ;;  %v1223_v56 = vunpack.c.0.s8 %v5890_v32 }
 0x45a   : > { %v1317_v34 = vunpack.c.1.s8 %v1293_v52 }
 0x45c   : > { %vm6073_vm15 = vcmp.ne.s32.totalorder %v1317_v34, 0 }
 0x45d   : > { %v8619_v57 = vsel %vm6073_vm15, 4294967295, %v8618_v57 }
 0x45e   : > { %8620 = vst [vmem:[#allocation28_spill] sm:$0xff] %v8619_v57 }
 0x460   : > { %v1939_v58 = vpop.f32.mrf.mxu2 }
 0x465   : > { %2413 = vrot.lane.b32.xlu2 %v5386_v11, %s4967_s11  ;;  %v6017_v11 = vsel %vm6007_vm1, -60000.0, %v1176_v42  ;;  %v1315_v42 = vunpack.c.1.s8 %v1292_v12  ;;  %v1180_v12 = vmul.f32 0.35355338, %v1074_v55  ;;  %v1222_v55 = vunpack.c.0.s8 %v5887_v31 }
 0x466   : > { %v1413_v63 = vmax.f32 %v6017_v11, %v6021_v54 }
 0x467   : > { %vm6050_vm0 = vcmp.ne.s32.totalorder %v1315_v42, 0 }
 0x468   : > { %v6061_v4 = vsel %vm6050_vm0, -60000.0, %v2044_v60 }
 0x47b   : > { %1414 = vmax.xlane.f32.xlu0 %v1413_v63  ;;  %v8609_v63 = vmov 0 }
 0x47c   : > { %v8610_v63 = vsel %vm6050_vm0, 4294967295, %v8609_v63 }
 0x47d   : > { %8611 = vst [vmem:[#allocation25_spill] sm:$0xff] %v8610_v63  ;;  %v2045_v63 = vmul.f32 0.35355338, %v1939_v58 }
 0x480   : > { %2108 = vmax.xlane.f32.xlu1 %v2107_v26  ;;  %v1316_v26 = vunpack.c.0.s8 %v1293_v52 }
 0x482   : > { %vm6069_vm14 = vcmp.ne.s32.totalorder %v1316_v26, 0  ;;  %v1254_v26 = vpack.c.b16 %v1223_v56, %v1222_v55  ;;  %v8624_v55 = vmov 0 }
 0x483   : > { %2111 = vmax.xlane.f32.xlu0 %v2110_v29  ;;  %v6065_v29 = vsel %vm6055_vm3, -60000.0, %v2043_v0  ;;  %v8616_v10 = vsel %vm6069_vm14, 4294967295, %v8615_v10  ;;  %v6079_v60 = vsel %vm6069_vm14, -60000.0, %v1180_v12  ;;  %v6083_v0 = vsel %vm6073_vm15, -60000.0, %v1181_v37  ;;  %v2004_v12 = vpop.f32.mrf.mxu3 }
 0x484   : > { %v2113_v42 = vmax.f32 %v6065_v29, %v6061_v4  ;;  %8617 = vst [vmem:[#allocation27_spill] sm:$0xff] %v8616_v10  ;;  %v1419_v52 = vmax.f32 %v6079_v60, %v6083_v0  ;;  %v1255_v34 = vpack.c.b8 %v1254_v26, %v1254_v26  ;;  %v1224_v26 = vunpack.c.1.s8 %v5887_v31 }
 0x485   : > { %v2046_v2 = vmul.f32 0.35355338, %v2004_v12  ;;  %v6144_v58 = vsel %vm6069_vm14, -60000.0, %v2045_v63 }
 0x486   : > { %vm1278_vm1 = vnez %v1255_v34 }
 0x487   : > { %v1294_v37 = vsel %vm1278_vm1, 16843009, %v8320_v25 }
 0x488   : > { %v1319_v59 = vunpack.c.1.s8 %v1294_v37 }
 0x48a   : > { %vm6100_vm13 = vcmp.ne.s32.totalorder %v1319_v59, 0  ;;  %v6120_v59 = vsel %vm6050_vm0, -60000.0, %v1179_v8 }
 0x48b   : > { %v8625_v55 = vsel %vm6100_vm13, 4294967295, %v8624_v55  ;;  %v2007_v34 = vpop.f32.mrf.mxu3 }
 0x48c   : > { %8626 = vst [vmem:[#allocation30_spill] sm:$0xff] %v8625_v55 }
 0x48e   : > { %2114 = vmax.xlane.f32.xlu2 %v2113_v42  ;;  %v1077_v42 = vpop.f32.mrf.mxu0 }
 0x48f   : > { %v1182_v3 = vmul.f32 0.35355338, %v1077_v42  ;;  %v1416_v42 = vmax.f32 %v6116_v23, %v6120_v59 }
 0x496   : > { %1420 = vmax.xlane.f32.xlu2 %v1419_v52  ;;  %v1142_v52 = vpop.f32.mrf.mxu1  ;;  %v1080_v32 = vpop.f32.mrf.mxu0 }
 0x497   : > { %2415 = vrot.lane.b32.xlu0 %v5406_v16, %s4967_s11  ;;  %v1318_v16 = vunpack.c.0.s8 %v1294_v37  ;;  %v1942_v37 = vpop.f32.mrf.mxu2 }
 0x498   : > { %v2047_v25 = vmul.f32 0.35355338, %v1942_v37  ;;  %v2010_v37 = vpop.f32.mrf.mxu3 }
 0x499   : > { %2417 = vrot.lane.b32.xlu1 %v5398_v14, %s4967_s11  ;;  %v1183_v14 = vmul.f32 0.35355338, %v1142_v52  ;;  %vm6096_vm8 = vcmp.ne.s32.totalorder %v1318_v16, 0  ;;  %v1256_v52 = vpack.c.b16 %v1225_v27, %v1224_v26  ;;  %v2048_v16 = vmul.f32 0.35355338, %v2007_v34 }
 0x49a   : > { %v8622_v35 = vsel %vm6096_vm8, 4294967295, %v8621_v35  ;;  %v6134_v44 = vsel %vm6096_vm8, -60000.0, %v2047_v25  ;;  %v6138_v26 = vsel %vm6073_vm15, -60000.0, %v2046_v2  ;;  %v8629_v34 = vmov 0  }
 0x49b   : > { %8623 = vst [vmem:[#allocation29_spill] sm:$0xff] %v8622_v35  ;;  %v6110_v56 = vsel %vm6100_vm13, -60000.0, %v1183_v14  ;;  %v1226_v14 = vunpack.c.2.s8 %v5887_v31  ;;  %v1257_v8 = vpack.c.b8 %v1256_v52, %v1256_v52  ;;  %v6130_v1 = vsel %vm6100_vm13, -60000.0, %v2048_v16 }
 0x49c   : > { %8628 = vst [vmem:[#allocation32_spill] sm:$0xff] %v6110_v56  ;;  %v2119_v31 = vmax.f32 %v6134_v44, %v6130_v1  ;;  %v2116_v27 = vmax.f32 %v6144_v58, %v6138_v26  ;;  %v2050_v16 = vmul.f32 0.35355338, %v2010_v37  ;;  %v8638_v35 = vmov 0 }
 0x49d   : > { %v1258_v17 = vpack.c.b16 %v1227_v61, %v1226_v14  ;;  %vm1279_vm1 = vnez %v1257_v8  ;;  %v8630_v14 = vmov 0  ;;  %v8633_v8 = vmov 0 }
 0x49e   : > { %v1145_v12 = vpop.f32.mrf.mxu1 }
 0x49f   : > { %v1259_v25 = vpack.c.b8 %v1258_v17, %v1258_v17  ;;  %v1083_v17 = vpop.f32.mrf.mxu0 }
 0x4a7   : > { %v1086_v10 = vpop.f32.mrf.mxu0 }
 0x4ae   : > { %2419 = vrot.lane.b32.xlu2 %v5403_v15, %s4967_s11  ;;  %v6106_v15 = vsel %vm6096_vm8, -60000.0, %v1182_v3  ;;  %vm1280_vm8 = vnez %v1259_v25 }
 0x4af   : > { %8627 = vst [vmem:[#allocation31_spill] sm:$0xff] %v6106_v15  ;;  %v1422_v3 = vmax.f32 %v6106_v15, %v6110_v56  ;;  %v1296_v61 = vsel %vm1280_vm8, 16843009, %v8629_v34 }
 0x4b0   : > { %v1322_v25 = vunpack.c.0.s8 %v1296_v61 }
 0x4b2   : > { %vm6168_vm8 = vcmp.ne.s32.totalorder %v1322_v25, 0  ;;  %v4812_v25 = vld [vmem:[%s5368_s27 + $0x48] sm:$0xff] }
 0x4b3   : > { %v8639_v35 = vsel %vm6168_vm8, 4294967295, %v8638_v35 }
 0x4b4   : > { %8640 = vst [vmem:[#allocation37_spill] sm:$0xff] %v8639_v35 }
 0x4c1   : > { %1423 = vmax.xlane.f32.xlu0 %v1422_v3  ;;  %v1295_v3 = vsel %vm1279_vm1, 16843009, %v8629_v34 }
 0x4c2   : > { %v1321_v2 = vunpack.c.1.s8 %v1295_v3  ;;  %v1320_v52 = vunpack.c.0.s8 %v1295_v3  ;;  %v1323_v3 = vunpack.c.1.s8 %v1296_v61 }
 0x4c3   : > { %1417 = vmax.xlane.f32.xlu1 %v1416_v42  ;;  %v1945_v42 = vpop.f32.mrf.mxu2 }
 0x4c4   : > { %vm6149_vm13 = vcmp.ne.s32.totalorder %v1321_v2, 0  ;;  %v2049_v63 = vmul.f32 0.35355338, %v1945_v42  ;;  %vm6154_vm14 = vcmp.ne.s32.totalorder %v1320_v52, 0  ;;  %v1186_v2 = vmul.f32 0.35355338, %v1083_v17 }
 0x4c5   : > { %v8631_v14 = vsel %vm6149_vm13, 4294967295, %v8630_v14  ;;  %v8634_v8 = vsel %vm6154_vm14, 4294967295, %v8633_v8  ;;  %vm6172_vm1 = vcmp.ne.s32.totalorder %v1323_v3, 0  ;;  %v1261_v3 = vpack.c.b8 %v5904_v39, %v5904_v39 }
 0x4c6   : > { %8632 = vst [vmem:[#allocation33_spill] sm:$0xff] %v8631_v14  ;;  %v6164_v37 = vsel %vm6154_vm14, -60000.0, %v2049_v63  ;;  %v6178_v61 = vsel %vm6168_vm8, -60000.0, %v1186_v2  ;;  %v4813_v2 = vld [vmem:[%s5368_s27 + $0x50] sm:$0xff]  ;;  %v8647_v39 = vmov 0 }
 0x4c7   : > { %8635 = vst [vmem:[#allocation34_spill] sm:$0xff] %v8634_v8  ;;  %vm1281_vm15 = vnez %v1261_v3 }
 0x4c8   : > { %8637 = vst [vmem:[#allocation36_spill] sm:$0xff] %v6164_v37 }
 0x4c9   : > { %2120 = vmax.xlane.f32.xlu0 %v2119_v31  ;;  %v1148_v31 = vpop.f32.mrf.mxu1 }
 0x4ca   : > { %v1187_v42 = vmul.f32 0.35355338, %v1148_v31  ;;  %v4811_v31 = vld [vmem:[%s5368_s27 + $0x40] sm:$0xff] }
 0x4cb   : > { %2117 = vmax.xlane.f32.xlu1 %v2116_v27  ;;  %v6160_v27 = vsel %vm6149_vm13, -60000.0, %v2050_v16  ;;  %v8641_v16 = vmov 0  ;;  %v1948_v57 = vpop.f32.mrf.mxu2 }
 0x4cc   : > { %8636 = vst [vmem:[#allocation35_spill] sm:$0xff] %v6160_v27  ;;  %v2122_v52 = vmax.f32 %v6164_v37, %v6160_v27  ;;  %v8642_v16 = vsel %vm6172_vm1, 4294967295, %v8641_v16  ;;  %v6182_v63 = vsel %vm6172_vm1, -60000.0, %v1187_v42  ;;  %v1297_v42 = vsel %vm1281_vm15, 16843009, %v8629_v34 }
 0x4cd   : > { %8643 = vst [vmem:[#allocation38_spill] sm:$0xff] %v8642_v16  ;;  %v1428_v17 = vmax.f32 %v6178_v61, %v6182_v63  ;;  %v1324_v46 = vunpack.c.0.s8 %v1297_v42  ;;  %v1325_v33 = vunpack.c.1.s8 %v1297_v42  ;;  %v1184_v42 = vmul.f32 0.35355338, %v1080_v32 }
 0x4cf   : > { %vm6195_vm3 = vcmp.ne.s32.totalorder %v1324_v46, 0  ;;  %vm6199_vm0 = vcmp.ne.s32.totalorder %v1325_v33, 0  ;;  %v1231_v33 = vunpack.c.0.s8 %v5992_v50 }
 0x4d0   : > { %v8645_v36 = vsel %vm6195_vm3, 4294967295, %v8644_v36  ;;  %v8648_v39 = vsel %vm6199_vm0, 4294967295, %v8647_v39 }
 0x4d1   : > { %v1151_v55 = vpop.f32.mrf.mxu1  ;;  %8646 = vst [vmem:[#allocation39_spill] sm:$0xff] %v8645_v36  ;;  %v8657_v36 = vmov 0 }
 0x4d2   : > { %8649 = vst [vmem:[#allocation40_spill] sm:$0xff] %v8648_v39  ;;  %v6237_v39 = vpop.f32.mrf.mxu0 }
 0x4d3   : > { %v1951_v27 = vpop.f32.mrf.mxu2 }
 0x4d4   : > { %v2053_v32 = vmul.f32 0.35355338, %v1951_v27 }
 0x4d7   : > { %2123 = vmax.xlane.f32.xlu2 %v2122_v52  ;;  %v2013_v52 = vpop.f32.mrf.mxu3 }
 0x4da   : > { %v1092_v35 = vpop.f32.mrf.mxu0 }
 0x4dd   : > { %2421 = vrot.lane.b32.xlu0 %v4811_v31, %s4967_s11  ;;  %v1189_v31 = vmul.f32 0.35355338, %v1151_v55  ;;  %v1185_v55 = vmul.f32 0.35355338, %v1145_v12 }
 0x4df   : > { %1429 = vmax.xlane.f32.xlu2 %v1428_v17  ;;  %v1188_v17 = vmul.f32 0.35355338, %v1086_v10  ;;  %v6209_v3 = vsel %vm6199_vm0, -60000.0, %v1189_v31  ;;  %v1230_v10 = vunpack.c.0.s8 %v5989_v5  ;;  %v6221_v31 = vsel %vm6149_vm13, -60000.0, %v1185_v55 }
 0x4e0   : > { %8651 = vst [vmem:[#allocation42_spill] sm:$0xff] %v6209_v3  ;;  %v2052_v55 = vmul.f32 0.35355338, %v2013_v52 }
 0x4e1   : > { %v1262_v12 = vpack.c.b16 %v1231_v33, %v1230_v10  ;;  %v2051_v33 = vmul.f32 0.35355338, %v1948_v57 }
 0x4e2   : > { %v6243_v14 = vsel %vm6172_vm1, -60000.0, %v2052_v55  ;;  %v8654_v55 = vmov 0 }
 0x4e3   : > { %v1263_v8 = vpack.c.b8 %v1262_v12, %v1262_v12  ;;  %v6247_v52 = vsel %vm6168_vm8, -60000.0, %v2051_v33 }
 0x4e4   : > { %2423 = vrot.lane.b32.xlu1 %v4812_v25, %s4967_s11  ;;  %v6205_v25 = vsel %vm6195_vm3, -60000.0, %v1188_v17  ;;  %v6217_v17 = vsel %vm6154_vm14, -60000.0, %v1184_v42  ;;  %v6233_v42 = vsel %vm6195_vm3, -60000.0, %v2053_v32  ;;  %v2125_v57 = vmax.f32 %v6247_v52, %v6243_v14 }
 0x4e5   : > { %8650 = vst [vmem:[#allocation41_spill] sm:$0xff] %v6205_v25  ;;  %v1431_v46 = vmax.f32 %v6205_v25, %v6209_v3  ;;  %v1425_v3 = vmax.f32 %v6217_v17, %v6221_v31  ;;  %vm1282_vm15 = vnez %v1263_v8 }
 0x4e6   : > { %8653 = vst [vmem:[#allocation44_spill] sm:$0xff] %v6233_v42  ;;  %v1298_v12 = vsel %vm1282_vm15, 16843009, %v8629_v34 }
 0x4f7   : > { %2425 = vrot.lane.b32.xlu2 %v4813_v2, %s4967_s11  ;;  %v2016_v2 = vpop.f32.mrf.mxu3 }
 0x4f8   : > { %v2054_v37 = vmul.f32 0.35355338, %v2016_v2  ;;  %v1232_v2 = vunpack.c.1.s8 %v5989_v5 }
 0x4fa   : > { %v6227_v25 = vsel %vm6199_vm0, -60000.0, %v2054_v37  ;;  %v6239_v37 = vpop.f32.mrf.mxu1 }
 0x4fb   : > { %8652 = vst [vmem:[#allocation43_spill] sm:$0xff] %v6227_v25  ;;  %v2128_v27 = vmax.f32 %v6233_v42, %v6227_v25  ;;  %v8662_v25 = vmov 0  ;;  %v1095_v42 = vpop.f32.mrf.mxu0 }
 0x4fc   : > { %v1194_v15 = vmul.f32 0.35355338, %v1095_v42 }
 0x502   : > { %v1157_v16 = vpop.f32.mrf.mxu1 }
 0x507   : > { %1432 = vmax.xlane.f32.xlu0 %v1431_v46  ;;  %v1233_v46 = vunpack.c.1.s8 %v5992_v50 }
 0x509   : > { %v1264_v10 = vpack.c.b16 %v1233_v46, %v1232_v2  ;;  %v1327_v2 = vunpack.c.1.s8 %v1298_v12  ;;  %v1954_v46 = vpop.f32.mrf.mxu2 }
 0x50a   : > { %v1160_v56 = vpop.f32.mrf.mxu1 }
 0x50b   : > { %v1265_v32 = vpack.c.b8 %v1264_v10, %v1264_v10  ;;  %vm6252_vm0 = vcmp.ne.s32.totalorder %v1327_v2, 0  ;;  %v2055_v10 = vmul.f32 0.35355338, %v1954_v46  ;;  %v1192_v2 = vmul.f32 0.35355338, %v1092_v35 }
 0x50c   : > { %v8655_v55 = vsel %vm6252_vm0, 4294967295, %v8654_v55  ;;  %v1193_v46 = vmul.f32 0.35355338, %v1157_v16  ;;  %v4814_v16 = vld [vmem:[%s5368_s27 + $0x58] sm:$0xff] }
 0x50d   : > { %vm1283_vm3 = vnez %v1265_v32  ;;  %8656 = vst [vmem:[#allocation45_spill] sm:$0xff] %v8655_v55 }
 0x50e   : > { %1426 = vmax.xlane.f32.xlu1 %v1425_v3  ;;  %v2019_v3 = vpop.f32.mrf.mxu3  ;;  %v1299_v33 = vsel %vm1283_vm3, 16843009, %v8629_v34 }
 0x50f   : > { %2129 = vmax.xlane.f32.xlu0 %v2128_v27  ;;  %v1326_v27 = vunpack.c.0.s8 %v1298_v12  ;;  %v2056_v8 = vmul.f32 0.35355338, %v2019_v3  ;;  %v1328_v32 = vunpack.c.0.s8 %v1299_v33  ;;  %v1329_v12 = vunpack.c.1.s8 %v1299_v33 }
 0x511   : > { %vm6257_vm8 = vcmp.ne.s32.totalorder %v1326_v27, 0  ;;  %vm6271_vm3 = vcmp.ne.s32.totalorder %v1328_v32, 0  ;;  %vm6275_vm15 = vcmp.ne.s32.totalorder %v1329_v12, 0  ;;  %v4815_v32 = vld [vmem:[%s5368_s27 + $0x60] sm:$0xff]  ;;  %v1234_v12 = vunpack.c.2.s8 %v5989_v5 }
 0x512   : > { %v8658_v36 = vsel %vm6257_vm8, 4294967295, %v8657_v36  ;;  %v6267_v3 = vsel %vm6257_vm8, -60000.0, %v2055_v10  ;;  %v8663_v25 = vsel %vm6271_vm3, 4294967295, %v8662_v25  ;;  %v6281_v33 = vsel %vm6271_vm3, -60000.0, %v1192_v2 }
 0x513   : > { %8659 = vst [vmem:[#allocation46_spill] sm:$0xff] %v8658_v36  ;;  %v6285_v35 = vsel %vm6275_vm15, -60000.0, %v1193_v46  ;;  %v1235_v2 = vunpack.c.2.s8 %v5992_v50  ;;  %v8670_v5 = vmov 0  ;;  %v8673_v50 = vmov 0 }
 0x514   : > { %8661 = vst [vmem:[#allocation48_spill] sm:$0xff] %v6267_v3  ;;  %v1437_v10 = vmax.f32 %v6281_v33, %v6285_v35 }
 0x515   : > { %8664 = vst [vmem:[#allocation49_spill] sm:$0xff] %v8663_v25 }
 0x516   : > { %2126 = vmax.xlane.f32.xlu1 %v2125_v57  ;;  %v6263_v57 = vsel %vm6252_vm0, -60000.0, %v2056_v8  ;;  %v8665_v8 = vmov 0  ;;  %8668 = vst [vmem:[#allocation51_spill] sm:$0xff] %v6281_v33  ;;  %v2022_v46 = vpop.f32.mrf.mxu3 }
 0x517   : > { %8660 = vst [vmem:[#allocation47_spill] sm:$0xff] %v6263_v57  ;;  %v2131_v27 = vmax.f32 %v6267_v3, %v6263_v57  ;;  %v8666_v8 = vsel %vm6275_vm15, 4294967295, %v8665_v8 }
 0x518   : > { %8667 = vst [vmem:[#allocation50_spill] sm:$0xff] %v8666_v8 }
 0x519   : > { %8669 = vst [vmem:[#allocation52_spill] sm:$0xff] %v6285_v35  ;;  %v1957_v35 = vpop.f32.mrf.mxu2 }
 0x520   : > { %2132 = vmax.xlane.f32.xlu2 %v2131_v27  ;;  %v1266_v27 = vpack.c.b16 %v1235_v2, %v1234_v12  ;;  %v2025_v2 = vpop.f32.mrf.mxu3 }
 0x521   : > { %v1960_v42 = vpop.f32.mrf.mxu2 }
 0x522   : > { %v1267_v57 = vpack.c.b8 %v1266_v27, %v1266_v27  ;;  %v2059_v27 = vmul.f32 0.35355338, %v1960_v42  ;;  %v2058_v42 = vmul.f32 0.35355338, %v2022_v46 }
 0x523   : > { %2427 = vrot.lane.b32.xlu0 %v4814_v16, %s4967_s11  ;;  %v4816_v16 = vld [vmem:[%s5368_s27 + $0x68] sm:$0xff] }
 0x524   : > { %vm1284_vm1 = vnez %v1267_v57 }
 0x525   : > { %v1300_v3 = vsel %vm1284_vm1, 16843009, %v8629_v34 }
 0x526   : > { %v1331_v33 = vunpack.c.1.s8 %v1300_v3 }
 0x528   : > { %1438 = vmax.xlane.f32.xlu2 %v1437_v10  ;;  %v1330_v10 = vunpack.c.0.s8 %v1300_v3  ;;  %vm6302_vm13 = vcmp.ne.s32.totalorder %v1331_v33, 0  ;;  %v2060_v3 = vmul.f32 0.35355338, %v2025_v2  ;;  %v1190_v33 = vmul.f32 0.35355338, %v6237_v39 }
 0x529   : > { %v8674_v50 = vsel %vm6302_vm13, 4294967295, %v8673_v50  ;;  %v1963_v46 = vpop.f32.mrf.mxu2 }
 0x52a   : > { %vm6298_vm14 = vcmp.ne.s32.totalorder %v1330_v10, 0  ;;  %8675 = vst [vmem:[#allocation54_spill] sm:$0xff] %v8674_v50  ;;  %v6318_v10 = vpop.permute.xlu2 %2407 }
 0x52b   : > { %v8671_v5 = vsel %vm6298_vm14, 4294967295, %v8670_v5  ;;  %v6308_v57 = vsel %vm6298_vm14, -60000.0, %v1194_v15  ;;  %v6322_v15 = vsel %vm6302_vm13, -60000.0, %v2060_v3 }
 0x52c   : > { %8672 = vst [vmem:[#allocation53_spill] sm:$0xff] %v8671_v5 }
 0x52f   : > { %2429 = vrot.lane.b32.xlu1 %v4815_v32, %s4967_s11  ;;  %v1195_v32 = vmul.f32 0.35355338, %v1160_v56 }
 0x531   : > { %v6312_v12 = vsel %vm6302_vm13, -60000.0, %v1195_v32  ;;  %v6326_v32 = vsel %vm6298_vm14, -60000.0, %v2059_v27  ;;  %v2057_v27 = vmul.f32 0.35355338, %v1957_v35 }
 0x532   : > { %8676 = vst [vmem:[#allocation55_spill] sm:$0xff] %v6312_v12  ;;  %v1440_v56 = vmax.f32 %v6308_v57, %v6312_v12  ;;  %v6330_v12 = vsel %vm6257_vm8, -60000.0, %v1190_v33  ;;  %v2137_v39 = vmax.f32 %v6326_v32, %v6322_v15  ;;  %v1400_v3 = vpop.xlane.xlu2 %1399  ;;  %v6344_v33 = vsel %vm6275_vm15, -60000.0, %v2058_v42 }
 0x533   : > { %v1446_v5 = vsub.f32 %v5771_v9, %v1400_v3  ;;  %v1447_v36 = vsub.f32 %v5777_v41, %v1400_v3  ;;  %v2061_v41 = vmul.f32 0.35355338, %v1963_v46  ;;  %v8680_v3 = vmov 0 }
 0x535   : > { %v1478_v42 = vmul.f32 1.442695, %v1446_v5  ;;  %v1480_v9 = vmul.f32 1.442695, %v1447_v36  ;;  %v4817_v36 = vld [vmem:[%s5368_s27 + $0x70] sm:$0xff] }
 0x537   : > { %4423 = vpow2.f32 %v1478_v42 }
 0x538   : > { %4425 = vpow2.f32 %v1480_v9 }
 0x540   : > { %2431 = vrot.lane.b32.xlu2 %v4816_v16, %s4967_s11  ;;  %v1191_v16 = vmul.f32 0.35355338, %v6239_v37 }
 0x542   : > { %v6334_v2 = vsel %vm6252_vm0, -60000.0, %v1191_v16 }
 0x543   : > { %v1434_v37 = vmax.f32 %v6330_v12, %v6334_v2 }
 0x54d   : > { %1441 = vmax.xlane.f32.xlu0 %v1440_v56  ;;  %v1269_v56 = vpack.c.b8 %v5996_v24, %v5996_v24  ;;  %v6351_v24 = vsel %vm6271_vm3, -60000.0, %v2057_v27 }
 0x54e   : > { %v2134_v35 = vmax.f32 %v6351_v24, %v6344_v33 }
 0x54f   : > { %vm1285_vm1 = vnez %v1269_v56 }
 0x550   : > { %v1301_v16 = vsel %vm1285_vm1, 16843009, %v8629_v34  ;;  %v8677_v34 = vmov 0 }
 0x551   : > { %v1333_v50 = vunpack.c.1.s8 %v1301_v16 }
 0x553   : > { %vm6355_vm1 = vcmp.ne.s32.totalorder %v1333_v50, 0 }
 0x554   : > { %v8678_v34 = vsel %vm6355_vm1, 4294967295, %v8677_v34 }
 0x555   : > { %2138 = vmax.xlane.f32.xlu0 %v2137_v39  ;;  %v2028_v39 = vpop.f32.mrf.mxu3  ;;  %8679 = vst [vmem:[#allocation56_spill] sm:$0xff] %v8678_v34 }
 0x556   : > { %v2062_v56 = vmul.f32 0.35355338, %v2028_v39 }
 0x558   : > { %v6365_v27 = vsel %vm6355_vm1, -60000.0, %v2062_v56 }
 0x559   : > { %1435 = vmax.xlane.f32.xlu1 %v1434_v37  ;;  %v1332_v37 = vunpack.c.0.s8 %v1301_v16  ;;  %v6375_v16 = vpop.eup %4423 }
 0x55a   : > { %8683 = vst [vmem:[#allocation58_spill] sm:$0xff] %v6375_v16  ;;  %v6377_v39 = vpop.eup %4425 }
 0x55b   : > { %vm6359_vm14 = vcmp.ne.s32.totalorder %v1332_v37, 0  ;;  %8684 = vst [vmem:[#allocation59_spill] sm:$0xff] %v6377_v39  ;;  %v1542_v46 = vadd.f32 %v6377_v39, %v6375_v16  ;;  %v4818_v37 = vld [vmem:[%s5368_s27 + $0x78] sm:$0xff] }
 0x55c   : > { %v8681_v3 = vsel %vm6359_vm14, 4294967295, %v8680_v3  ;;  %v6369_v5 = vsel %vm6359_vm14, -60000.0, %v2061_v41 }
 0x55d   : > { %8682 = vst [vmem:[#allocation57_spill] sm:$0xff] %v8681_v3  ;;  %v2140_v50 = vmax.f32 %v6369_v5, %v6365_v27 }
 0x561   : > { %2135 = vmax.xlane.f32.xlu1 %v2134_v35  ;;  %v6381_v35 = vpop.permute.xlu0 %2405 }
 0x569   : > { %2141 = vmax.xlane.f32.xlu2 %v2140_v50  ;;  %2433 = vrot.lane.b32.xlu0 %v4817_v36, %s4967_s11  ;;  %v1403_v56 = vpop.xlane.xlu0 %1402  ;;  %v2100_v36 = vpop.xlane.xlu1 %2099 }
 0x56a   : > { %v1448_v42 = vsub.f32 %v5795_v40, %v1403_v56  ;;  %v1449_v9 = vsub.f32 %v5803_v48, %v1403_v56  ;;  %v2145_v25 = vsub.f32 %v5921_v51, %v2100_v36  ;;  %v2146_v39 = vsub.f32 %v5925_v20, %v2100_v36  ;;  %v2097_v20 = vpop.xlane.xlu2 %2096 }
 0x56c   : > { %v1482_v41 = vmul.f32 1.442695, %v1448_v42  ;;  %v1484_v50 = vmul.f32 1.442695, %v1449_v9  ;;  %v2181_v16 = vmul.f32 1.442695, %v2146_v39  ;;  %v1098_v9 = vpop.f32.mrf.mxu0  ;;  %v2144_v39 = vsub.f32 %v5884_v30, %v2097_v20 }
 0x56d   : > { %v1196_v36 = vmul.f32 0.35355338, %v1098_v9 }
 0x56e   : > { %4427 = vpow2.f32 %v1482_v41  ;;  %v1163_v41 = vpop.f32.mrf.mxu1 }
 0x56f   : > { %4429 = vpow2.f32 %v1484_v50 }
 0x571   : > { %1543 = vadd.xlane.f32.xlu2 %v1542_v46  ;;  %v6389_v46 = vld [vmem:[#allocation2] sm:$0xff] }
 0x574   : > { %v6393_v40 = vpop.eup %4427 }
 0x575   : > { %8685 = vst [vmem:[#allocation60_spill] sm:$0xff] %v6393_v40  ;;  %v6395_v48 = vpop.eup %4429 }
 0x576   : > { %8686 = vst [vmem:[#allocation61_spill] sm:$0xff] %v6395_v48  ;;  %v1545_v51 = vadd.f32 %v6395_v48, %v6393_v40  ;;  %v6409_v40 = vsel %vm6359_vm14, -60000.0, %v1196_v36  ;;  %vm8730_vm14 = vcmask 64512  }
 0x57a   : > { %2435 = vrot.lane.b32.xlu1 %v4818_v37, %s4967_s11  ;;  %v2179_v37 = vmul.f32 1.442695, %v2145_v25  ;;  %v2143_v25 = vsub.f32 %v5880_v28, %v2097_v20 }
 0x57c   : > { %4431 = vpow2.f32 %v2179_v37  ;;  %v2103_v37 = vpop.xlane.xlu0 %2102  ;;  %v2175_v48 = vmul.f32 1.442695, %v2143_v25 }
 0x57d   : > { %4433 = vpow2.f32 %v2181_v16  ;;  %v1197_v16 = vmul.f32 0.35355338, %v1163_v41  ;;  %v2147_v28 = vsub.f32 %v5949_v18, %v2103_v37  ;;  %v2148_v30 = vsub.f32 %v5953_v21, %v2103_v37  ;;  %v1409_v41 = vpop.xlane.xlu2 %1408 }
 0x57e   : > { %4435 = vpow2.f32 %v2175_v48  ;;  %v1453_v18 = vsub.f32 %v5912_v45, %v1409_v41 }
 0x57f   : > { %v6413_v8 = vsel %vm6355_vm1, -60000.0, %v1197_v16  ;;  %v2183_v9 = vmul.f32 1.442695, %v2147_v28  ;;  %v2185_v25 = vmul.f32 1.442695, %v2148_v30  ;;  %v6431_v28 = vld [vmem:[#allocation2 + $0x8] sm:$0xff]  ;;  %vm8771_vm1 = vmmov %vm8730_vm14 }
 0x580   : > { %v1443_v20 = vmax.f32 %v6409_v40, %v6413_v8  ;;  %v1492_v16 = vmul.f32 1.442695, %v1453_v18  ;;  %vm8795_vm13 = vmmov %vm8771_vm1 }
 0x581   : > { %vm8796_vm3 = vmmov %vm8771_vm1 }
 0x582   : > { %v6399_v56 = vpop.eup %4431  ;;  %vm8797_vm15 = vmmov %vm8771_vm1 }
 0x583   : > { %8687 = vst [vmem:[#allocation62_spill] sm:$0xff] %v6399_v56  ;;  %v6401_v42 = vpop.eup %4433  ;;  %vm8806_vm8 = vmmov %vm8771_vm1 }
 0x584   : > { %8688 = vst [vmem:[#allocation63_spill] sm:$0xff] %v6401_v42  ;;  %v2242_v50 = vadd.f32 %v6401_v42, %v6399_v56  ;;  %vm8817_vm0 = vmmov %vm8771_vm1 }
 0x585   : > { %vm8821_vm12 = vmmov %vm8817_vm0 }
 0x586   : > { %vm8832_vm4 = vmmov %vm8817_vm0 }
 0x589   : > { %2437 = vrot.lane.b32.xlu2 %v6389_v46, %s4969_s17 }
 0x593   : > { %1546 = vadd.xlane.f32.xlu0 %v1545_v51  ;;  %v2177_v51 = vmul.f32 1.442695, %v2144_v39  ;;  %v6419_v39 = vpop.eup %4435 }
 0x594   : > { %8689 = vst [vmem:[#allocation64_spill] sm:$0xff] %v6419_v39 }
 0x595   : > { %4437 = vpow2.f32 %v2177_v51 }
 0x596   : > { %4439 = vpow2.f32 %v2183_v9 }
 0x597   : > { %4441 = vpow2.f32 %v2185_v25  ;;  %v6443_v25 = vpop.permute.xlu0 %2411 }
 0x59b   : > { %2243 = vadd.xlane.f32.xlu0 %v2242_v50  ;;  %v1452_v50 = vsub.f32 %v5908_v43, %v1409_v41  ;;  %v6422_v36 = vpop.eup %4437  ;;  %v1406_v41 = vpop.xlane.xlu1 %1405 }
 0x59c   : > { %8690 = vst [vmem:[#allocation65_spill] sm:$0xff] %v6422_v36  ;;  %v2239_v48 = vadd.f32 %v6422_v36, %v6419_v39  ;;  %v6427_v37 = vpop.eup %4439  ;;  %v6457_v39 = vld [vmem:[#allocation2 + $0x18] sm:$0xff] }
 0x59d   : > { %v1490_v21 = vmul.f32 1.442695, %v1452_v50  ;;  %8691 = vst [vmem:[#allocation66_spill] sm:$0xff] %v6427_v37  ;;  %v6429_v51 = vpop.eup %4441 }
 0x59e   : > { %8692 = vst [vmem:[#allocation67_spill] sm:$0xff] %v6429_v51  ;;  %v2245_v43 = vadd.f32 %v6429_v51, %v6427_v37 }
 0x59f   : > { %4443 = vpow2.f32 %v1490_v21  ;;  %v6453_v51 = vpop.xlane.xlu0 %1414 }
 0x5a0   : > { %4445 = vpow2.f32 %v1492_v16 }
 0x5a3   : > { %v6445_v18 = vpop.permute.xlu1 %2409 }
 0x5a4   : > { %1444 = vmax.xlane.f32.xlu1 %v1443_v20  ;;  %v2106_v20 = vpop.xlane.xlu2 %2105 }
 0x5a5   : > { %v6437_v45 = vpop.eup %4443 }
 0x5a6   : > { %8693 = vst [vmem:[#allocation68_spill] sm:$0xff] %v6437_v45  ;;  %v6439_v30 = vpop.eup %4445 }
 0x5a7   : > { %8694 = vst [vmem:[#allocation69_spill] sm:$0xff] %v6439_v30  ;;  %v1551_v9 = vadd.f32 %v6439_v30, %v6437_v45 }
 0x5ab   : > { %v2109_v45 = vpop.xlane.xlu1 %2108 }
 0x5ac   : > { %2240 = vadd.xlane.f32.xlu1 %v2239_v48  ;;  %v1412_v50 = vpop.xlane.xlu2 %1411  ;;  %v6448_v48 = vld [vmem:[#allocation2 + $0x10] sm:$0xff]  ;;  %v2152_v37 = vsub.f32 %v6029_v7, %v2109_v45  ;;  %v1450_v7 = vsub.f32 %v5939_v19, %v1406_v41 }
 0x5ad   : > { %v1454_v21 = vsub.f32 %v5980_v6, %v1412_v50  ;;  %v1455_v16 = vsub.f32 %v5984_v49, %v1412_v50  ;;  %v2112_v49 = vpop.xlane.xlu0 %2111 }
 0x5ae   : > { %v2193_v6 = vmul.f32 1.442695, %v2152_v37 }
 0x5af   : > { %2439 = vrot.lane.b32.xlu0 %v6431_v28, %s4969_s17  ;;  %v1496_v30 = vmul.f32 1.442695, %v1455_v16  ;;  %v1486_v16 = vmul.f32 1.442695, %v1450_v7 }
 0x5b2   : > { %2246 = vadd.xlane.f32.xlu2 %v2245_v43  ;;  %v1494_v43 = vmul.f32 1.442695, %v1454_v21  ;;  %v1451_v21 = vsub.f32 %v5943_v13, %v1406_v41  ;;  %v2154_v41 = vsub.f32 %v6039_v53, %v2112_v49 }
 0x5b4   : > { %4447 = vpow2.f32 %v1494_v43 }
 0x5b5   : > { %4449 = vpow2.f32 %v1496_v30  ;;  %v6470_v37 = vpop.permute.xlu0 %2415 }
 0x5ba   : > { %1552 = vadd.xlane.f32.xlu2 %v1551_v9  ;;  %v2151_v9 = vsub.f32 %v6033_v22, %v2109_v45  ;;  %v6461_v42 = vpop.eup %4447 }
 0x5bb   : > { %8695 = vst [vmem:[#allocation70_spill] sm:$0xff] %v6461_v42  ;;  %v6463_v50 = vpop.eup %4449 }
 0x5bc   : > { %v2191_v36 = vmul.f32 1.442695, %v2151_v9  ;;  %8696 = vst [vmem:[#allocation71_spill] sm:$0xff] %v6463_v50  ;;  %v1554_v22 = vadd.f32 %v6463_v50, %v6461_v42  ;;  %v2149_v9 = vsub.f32 %v5960_v47, %v2106_v20  ;;  %v2153_v42 = vsub.f32 %v6043_v62, %v2112_v49 }
 0x5bd   : > { %v6481_v19 = vpop.xlane.xlu0 %1423 }
 0x5be   : > { %4451 = vpow2.f32 %v2191_v36  ;;  %v1488_v36 = vmul.f32 1.442695, %v1451_v21  ;;  %v2187_v50 = vmul.f32 1.442695, %v2149_v9  ;;  %v2195_v47 = vmul.f32 1.442695, %v2153_v42 }
 0x5bf   : > { %4453 = vpow2.f32 %v2193_v6  ;;  %v2150_v6 = vsub.f32 %v5964_v38, %v2106_v20  ;;  %v2197_v38 = vmul.f32 1.442695, %v2154_v41  ;;  %v4823_v41 = vld [vmem:[#allocation2 + $0x78] sm:$0xff] }
 0x5c0   : > { %4455 = vpow2.f32 %v1486_v16  ;;  %v6489_v16 = vpop.permute.xlu2 %2413 }
 0x5c1   : > { %4457 = vpow2.f32 %v1488_v36  ;;  %v2189_v13 = vmul.f32 1.442695, %v2150_v6 }
 0x5c2   : > { %4459 = vpow2.f32 %v2187_v50 }
 0x5c3   : > { %4461 = vpow2.f32 %v2189_v13 }
 0x5c4   : > { %v6467_v30 = vpop.eup %4451  ;;  %4463 = vpow2.f32 %v2195_v47 }
 0x5c5   : > { %2441 = vrot.lane.b32.xlu1 %v6448_v48, %s4969_s17  ;;  %8697 = vst [vmem:[#allocation72_spill] sm:$0xff] %v6467_v30  ;;  %v6472_v45 = vpop.eup %4453  ;;  %v6494_v36 = vpop.xlane.xlu0 %2120  ;;  %4465 = vpow2.f32 %v2197_v38 }
 0x5c6   : > { %8698 = vst [vmem:[#allocation73_spill] sm:$0xff] %v6472_v45  ;;  %v2251_v43 = vadd.f32 %v6472_v45, %v6467_v30  ;;  %v6485_v7 = vpop.eup %4455 }
 0x5c7   : > { %8699 = vst [vmem:[#allocation74_spill] sm:$0xff] %v6485_v7  ;;  %v6487_v21 = vpop.eup %4457 }
 0x5c8   : > { %8700 = vst [vmem:[#allocation75_spill] sm:$0xff] %v6487_v21  ;;  %v6497_v49 = vpop.eup %4459  ;;  %v6501_v50 = vpop.xlane.xlu2 %2114 }
 0x5c9   : > { %8701 = vst [vmem:[#allocation76_spill] sm:$0xff] %v6497_v49  ;;  %v6499_v9 = vpop.eup %4461  ;;  %v2155_v56 = vsub.f32 %v6065_v29, %v6501_v50 }
 0x5ca   : > { %8702 = vst [vmem:[#allocation77_spill] sm:$0xff] %v6499_v9  ;;  %v6503_v13 = vpop.eup %4463 }
 0x5cb   : > { %8703 = vst [vmem:[#allocation78_spill] sm:$0xff] %v6503_v13  ;;  %v6508_v47 = vpop.eup %4465 }
 0x5cc   : > { %8704 = vst [vmem:[#allocation79_spill] sm:$0xff] %v6508_v47  ;;  %v2254_v38 = vadd.f32 %v6508_v47, %v6503_v13 }
 0x5d2   : > { %2443 = vrot.lane.b32.xlu2 %v6457_v39, %s4969_s17 }
 0x5d9   : > { %1555 = vadd.xlane.f32.xlu0 %v1554_v22  ;;  %v6479_v22 = vpop.permute.xlu1 %2417 }
 0x5e1   : > { %2252 = vadd.xlane.f32.xlu0 %v2251_v43  ;;  %v1418_v20 = vpop.xlane.xlu1 %1417  ;;  %v1548_v43 = vadd.f32 %v6487_v21, %v6485_v7  ;;  %v4824_v7 = vld [vmem:[#allocation2 + $0xf8] sm:$0xff] }
 0x5e2   : > { %v1458_v62 = vsub.f32 %v6116_v23, %v1418_v20  ;;  %v1459_v53 = vsub.f32 %v6120_v59, %v1418_v20  ;;  %v2248_v23 = vadd.f32 %v6499_v9, %v6497_v49  ;;  %v6510_v59 = vpop.permute.xlu0 %2421 }
 0x5e4   : > { %v1502_v42 = vmul.f32 1.442695, %v1458_v62  ;;  %v1504_v6 = vmul.f32 1.442695, %v1459_v53  ;;  %v1421_v62 = vpop.xlane.xlu2 %1420 }
 0x5e5   : > { %v1461_v47 = vsub.f32 %v6083_v0, %v1421_v62 }
 0x5e6   : > { %4467 = vpow2.f32 %v1502_v42 }
 0x5e7   : > { %4469 = vpow2.f32 %v1504_v6  ;;  %v1508_v13 = vmul.f32 1.442695, %v1461_v47 }
 0x5e9   : > { %v2118_v49 = vpop.xlane.xlu1 %2117 }
 0x5ea   : > { %v6518_v53 = vpop.xlane.xlu0 %1432 }
 0x5ec   : > { %v6514_v20 = vpop.eup %4467  ;;  %v6522_v42 = vpop.permute.xlu2 %2419 }
 0x5ed   : > { %8705 = vst [vmem:[#allocation80_spill] sm:$0xff] %v6514_v20 }
 0x5ef   : > { %1549 = vadd.xlane.f32.xlu1 %v1548_v43  ;;  %v6516_v43 = vpop.eup %4469 }
 0x5f0   : > { %8706 = vst [vmem:[#allocation81_spill] sm:$0xff] %v6516_v43  ;;  %v1560_v9 = vadd.f32 %v6516_v43, %v6514_v20  ;;  %v2157_v43 = vsub.f32 %v6144_v58, %v2118_v49 }
 0x5f2   : > { %v6525_v6 = vpop.xlane.xlu0 %2129  ;;  %v2203_v20 = vmul.f32 1.442695, %v2157_v43 }
 0x5f4   : > { %v6528_v21 = vpop.xlane.xlu2 %2123 }
 0x5f5   : > { %3163 = vrot.lane.b32.xlu0 %v4823_v41, %s4970_s9 }
 0x5f7   : > { %2249 = vadd.xlane.f32.xlu1 %v2248_v23  ;;  %v1460_v23 = vsub.f32 %v6079_v60, %v1421_v62  ;;  %v2158_v60 = vsub.f32 %v6138_v26, %v2118_v49  ;;  %v6541_v62 = vpop.permute.xlu1 %2423 }
 0x5f9   : > { %v2205_v45 = vmul.f32 1.442695, %v2158_v60 }
 0x5fb   : > { %2255 = vadd.xlane.f32.xlu2 %v2254_v38  ;;  %v1506_v38 = vmul.f32 1.442695, %v1460_v23 }
 0x5fc   : > { %v6539_v47 = vpop.xlane.xlu2 %1429 }
 0x5fd   : > { %4471 = vpow2.f32 %v1506_v38 }
 0x5fe   : > { %4473 = vpow2.f32 %v1508_v13 }
 0x5ff   : > { %4475 = vpow2.f32 %v2203_v20  ;;  %v1427_v43 = vpop.xlane.xlu1 %1426 }
 0x600   : > { %4477 = vpow2.f32 %v2205_v45  ;;  %v1457_v45 = vsub.f32 %v6021_v54, %v6453_v51  ;;  %v2159_v54 = vsub.f32 %v6134_v44, %v6494_v36  ;;  %v1464_v44 = vsub.f32 %v6217_v17, %v1427_v43 }
 0x603   : > { %1561 = vadd.xlane.f32.xlu2 %v1560_v9  ;;  %v6532_v9 = vpop.permute.xlu0 %2427  ;;  %v6535_v30 = vpop.eup %4471 }
 0x604   : > { %8707 = vst [vmem:[#allocation82_spill] sm:$0xff] %v6535_v30  ;;  %v6537_v0 = vpop.eup %4473  ;;  %v6552_v23 = vpop.permute.xlu2 %2425 }
 0x605   : > { %8708 = vst [vmem:[#allocation83_spill] sm:$0xff] %v6537_v0  ;;  %v1563_v13 = vadd.f32 %v6537_v0, %v6535_v30  ;;  %v6548_v26 = vpop.eup %4475 }
 0x606   : > { %8709 = vst [vmem:[#allocation84_spill] sm:$0xff] %v6548_v26  ;;  %v6550_v49 = vpop.eup %4477 }
 0x607   : > { %8710 = vst [vmem:[#allocation85_spill] sm:$0xff] %v6550_v49  ;;  %v2260_v38 = vadd.f32 %v6550_v49, %v6548_v26  ;;  %v6562_v0 = vpop.xlane.xlu1 %2126 }
 0x60b   : > { %v6544_v58 = vpop.xlane.xlu0 %1441 }
 0x60c   : > { %v6564_v30 = vpop.xlane.xlu2 %2132 }
 0x60f   : > { %v6578_v26 = vpop.permute.xlu1 %2429 }
 0x610   : > { %3195 = vrot.lane.b32.xlu1 %v4824_v7, %s4970_s9 }
 0x613   : > { %v6560_v20 = vpop.xlane.xlu0 %2138 }
 0x61b   : > { %2467 = vrot.lane.b32.xlu2 %v4823_v41, %s4969_s17  ;;  %v1456_v41 = vsub.f32 %v6017_v11, %v6453_v51  ;;  %v2156_v11 = vsub.f32 %v6061_v4, %v6501_v50  ;;  %v6570_v49 = vpop.permute.xlu0 %2433  ;;  %v2160_v51 = vsub.f32 %v6130_v1, %v6494_v36  ;;  %v6582_v4 = vpop.xlane.xlu2 %1438 }
 0x61d   : > { %v1498_v60 = vmul.f32 1.442695, %v1456_v41  ;;  %v2201_v41 = vmul.f32 1.442695, %v2156_v11  ;;  %v1514_v11 = vmul.f32 1.442695, %v1464_v44 }
 0x61f   : > { %1564 = vadd.xlane.f32.xlu0 %v1563_v13  ;;  %v1500_v13 = vmul.f32 1.442695, %v1457_v45  ;;  %4479 = vpow2.f32 %v1498_v60  ;;  %v2207_v60 = vmul.f32 1.442695, %v2159_v54  ;;  %v6593_v54 = vpop.xlane.xlu1 %1435 }
 0x621   : > { %4481 = vpow2.f32 %v1500_v13  ;;  %v2209_v13 = vmul.f32 1.442695, %v2160_v51 }
 0x623   : > { %v6588_v36 = vpop.xlane.xlu0 %1546 }
 0x624   : > { %8713 = vst [vmem:[#allocation88_spill] sm:$0xff] %v6588_v36 }
 0x625   : > { %v6576_v45 = vpop.eup %4479 }
 0x626   : > { %8711 = vst [vmem:[#allocation86_spill] sm:$0xff] %v6576_v45 }
 0x627   : > { %2261 = vadd.xlane.f32.xlu0 %v2260_v38  ;;  %v2199_v38 = vmul.f32 1.442695, %v2155_v56  ;;  %v6580_v29 = vpop.eup %4481  ;;  %v1465_v56 = vsub.f32 %v6221_v31, %v1427_v43  ;;  %v6611_v44 = vpop.xlane.xlu1 %2135 }
 0x628   : > { %8712 = vst [vmem:[#allocation87_spill] sm:$0xff] %v6580_v29  ;;  %v1557_v1 = vadd.f32 %v6580_v29, %v6576_v45 }
 0x629   : > { %4483 = vpow2.f32 %v2199_v38  ;;  %v1516_v38 = vmul.f32 1.442695, %v1465_v56 }
 0x62a   : > { %4485 = vpow2.f32 %v2201_v41  ;;  %v6599_v41 = vpop.permute.xlu2 %2431 }
 0x62b   : > { %4487 = vpow2.f32 %v2207_v60  ;;  %v6607_v43 = vpop.xlane.xlu0 %2243 }
 0x62c   : > { %4489 = vpow2.f32 %v2209_v13  ;;  %8718 = vst [vmem:[#allocation93_spill] sm:$0xff] %v6607_v43 }
 0x62d   : > { %4491 = vpow2.f32 %v1514_v11 }
 0x62e   : > { %4493 = vpow2.f32 %v1516_v38 }
 0x62f   : > { %v6591_v50 = vpop.eup %4483  ;;  %v6621_v38 = vpop.permute.xlu1 %2435 }
 0x630   : > { %8714 = vst [vmem:[#allocation89_spill] sm:$0xff] %v6591_v50  ;;  %v6595_v51 = vpop.eup %4485 }
 0x631   : > { %8715 = vst [vmem:[#allocation90_spill] sm:$0xff] %v6595_v51  ;;  %v6597_v17 = vpop.eup %4487  ;;  %v2257_v31 = vadd.f32 %v6595_v51, %v6591_v50 }
 0x632   : > { %8716 = vst [vmem:[#allocation91_spill] sm:$0xff] %v6597_v17  ;;  %v6601_v60 = vpop.eup %4489  ;;  %v6615_v56 = vpop.xlane.xlu2 %2141 }
 0x633   : > { %8717 = vst [vmem:[#allocation92_spill] sm:$0xff] %v6601_v60  ;;  %v6609_v13 = vpop.eup %4491  ;;  %v6619_v51 = vpop.permute.xlu0 %2439 }
 0x634   : > { %8719 = vst [vmem:[#allocation94_spill] sm:$0xff] %v6609_v13 }
 0x637   : > { %v6631_v45 = vpop.xlane.xlu1 %1444 }
 0x63a   : > { %1558 = vadd.xlane.f32.xlu1 %v1557_v1  ;;  %v6613_v1 = vpop.eup %4493 }
 0x63b   : > { %2499 = vrot.lane.b32.xlu0 %v4824_v7, %s4969_s17  ;;  %v2263_v7 = vadd.f32 %v6601_v60, %v6597_v17  ;;  %8720 = vst [vmem:[#allocation95_spill] sm:$0xff] %v6613_v1  ;;  %v1569_v11 = vadd.f32 %v6613_v1, %v6609_v13  ;;  %v6627_v60 = vpop.xlane.xlu2 %1543  ;;  %v2164_v1 = vsub.f32 %v6243_v14, %v6562_v0  ;;  %v4825_v13 = vld [vmem:[#allocation2 + $0x70] sm:$0xff] }
 0x63c   : > { %8721 = vst [vmem:[#allocation96_spill] sm:$0xff] %v6627_v60 }
 0x642   : > { %2258 = vadd.xlane.f32.xlu1 %v2257_v31  ;;  %v1466_v31 = vsub.f32 %v6178_v61, %v6539_v47 }
 0x643   : > { %v6637_v61 = vpop.permute.xlu2 %2437 }
 0x644   : > { %2264 = vadd.xlane.f32.xlu2 %v2263_v7  ;;  %v1467_v7 = vsub.f32 %v6182_v63, %v6539_v47  ;;  %v1518_v17 = vmul.f32 1.442695, %v1466_v31  ;;  %v2217_v47 = vmul.f32 1.442695, %v2164_v1 }
 0x646   : > { %v1520_v29 = vmul.f32 1.442695, %v1467_v7  ;;  %4495 = vpow2.f32 %v1518_v17  ;;  %v6646_v17 = vpop.xlane.xlu1 %2240 }
 0x647   : > { %8726 = vst [vmem:[#allocation101_spill] sm:$0xff] %v6646_v17 }
 0x648   : > { %4497 = vpow2.f32 %v1520_v29 }
 0x64c   : > { %1570 = vadd.xlane.f32.xlu2 %v1569_v11  ;;  %v6629_v50 = vpop.xlane.xlu0 %1555  ;;  %v2163_v11 = vsub.f32 %v6247_v52, %v6562_v0  ;;  %v6640_v31 = vpop.eup %4495  ;;  %v6652_v0 = vld [vmem:[#allocation2 + $0xf0] sm:$0xff] }
 0x64d   : > { %8722 = vst [vmem:[#allocation97_spill] sm:$0xff] %v6629_v50  ;;  %v6650_v52 = vpop.xlane.xlu2 %2246 }
 0x64e   : > { %v2215_v63 = vmul.f32 1.442695, %v2163_v11  ;;  %8723 = vst [vmem:[#allocation98_spill] sm:$0xff] %v6640_v31  ;;  %v6644_v50 = vpop.eup %4497 }
 0x64f   : > { %8725 = vst [vmem:[#allocation100_spill] sm:$0xff] %v6644_v50  ;;  %v1572_v14 = vadd.f32 %v6644_v50, %v6640_v31  ;;  %v8733_v31 = vld [vmem:[#allocation31_spill] sm:$0xff] }
 0x650   : > { %4499 = vpow2.f32 %v2215_v63  ;;  %8727 = vst [vmem:[#allocation102_spill] sm:$0xff] %v6650_v52  ;;  %v8734_v52 = vld [vmem:[#allocation32_spill] sm:$0xff] }
 0x651   : > { %4501 = vpow2.f32 %v2217_v47  ;;  %v1463_v17 = vsub.f32 %v8734_v52, %v6481_v19 }
 0x653   : > { %v1512_v36 = vmul.f32 1.442695, %v1463_v17 }
 0x654   : > { %v6642_v7 = vpop.xlane.xlu0 %2252 }
 0x655   : > { %8724 = vst [vmem:[#allocation99_spill] sm:$0xff] %v6642_v7  ;;  %v6660_v7 = vpop.permute.xlu1 %2441  ;;  %v6665_v47 = vpop.xlane.xlu2 %1552 }
 0x656   : > { %v6656_v29 = vpop.eup %4499  ;;  %8731 = vst [vmem:[#allocation105_spill] sm:$0xff] %v6665_v47 }
 0x657   : > { %8728 = vst [vmem:[#allocation103_spill] sm:$0xff] %v6656_v29  ;;  %v6658_v11 = vpop.eup %4501 }
 0x658   : > { %8729 = vst [vmem:[#allocation104_spill] sm:$0xff] %v6658_v11  ;;  %v2269_v63 = vadd.f32 %v6658_v11, %v6656_v29  ;;  %v8736_v11 = vld [vmem:[#allocation35_spill] sm:$0xff]  ;;  %v8737_v29 = vld [vmem:[#allocation44_spill] sm:$0xff] }
 0x659   : > { %v2165_v47 = vsub.f32 %v8737_v29, %v6525_v6 }
 0x65b   : > { %3161 = vrot.lane.b32.xlu1 %v4825_v13, %s4970_s9  ;;  %v2219_v52 = vmul.f32 1.442695, %v2165_v47 }
 0x65d   : > { %v6673_v43 = vpop.permute.xlu2 %2443 }
 0x662   : > { %v6667_v50 = vpop.xlane.xlu1 %1549 }
 0x663   : > { %8732 = vst [vmem:[#allocation106_spill] sm:$0xff] %v6667_v50 }
 0x664   : > { %3193 = vrot.lane.b32.xlu2 %v6652_v0, %s4970_s9 }
 0x665   : > { %1573 = vadd.xlane.f32.xlu0 %v1572_v14  ;;  %v1462_v14 = vsub.f32 %v8733_v31, %v6481_v19  ;;  %v8738_v31 = vld [vmem:[#allocation43_spill] sm:$0xff] }
 0x666   : > { %v2166_v50 = vsub.f32 %v8738_v31, %v6525_v6 }
 0x667   : > { %v3164_v1 = vpop.permute.xlu0 %3163  ;;  %v1510_v60 = vmul.f32 1.442695, %v1462_v14 }
 0x668   : > { %4262 = vmatpush.xpose.msk.msrb.mxu2 %vm8730_vm14, %v3164_v1  ;;  %v8735_v1 = vld [vmem:[#allocation36_spill] sm:$0xff]  ;;  %v2221_v14 = vmul.f32 1.442695, %v2166_v50 }
 0x669   : > { %v2161_v3 = vsub.f32 %v8735_v1, %v6528_v21  ;;  %4503 = vpow2.f32 %v1510_v60 }
 0x66a   : > { %4505 = vpow2.f32 %v1512_v36  ;;  %v6683_v34 = vpop.xlane.xlu1 %2249  ;;  %v1470_v36 = vsub.f32 %v6330_v12, %v6593_v54 }
 0x66b   : > { %8739 = vst [vmem:[#allocation31_spill] sm:$0xff] %v6683_v34  ;;  %v2211_v19 = vmul.f32 1.442695, %v2161_v3  ;;  %v1471_v3 = vsub.f32 %v6334_v2, %v6593_v54 }
 0x66c   : > { %v1526_v29 = vmul.f32 1.442695, %v1470_v36 }
 0x66d   : > { %2270 = vadd.xlane.f32.xlu0 %v2269_v63  ;;  %v2162_v63 = vsub.f32 %v8736_v11, %v6528_v21  ;;  %4507 = vpow2.f32 %v2211_v19  ;;  %v1528_v47 = vmul.f32 1.442695, %v1471_v3  ;;  %v8751_v3 = vld [vmem:[#allocation52_spill] sm:$0xff] }
 0x66e   : > { %v6689_v21 = vpop.xlane.xlu2 %2255 }
 0x66f   : > { %v2213_v17 = vmul.f32 1.442695, %v2162_v63  ;;  %v6685_v55 = vpop.eup %4503  ;;  %8742 = vst [vmem:[#allocation35_spill] sm:$0xff] %v6689_v21 }
 0x670   : > { %8740 = vst [vmem:[#allocation32_spill] sm:$0xff] %v6685_v55  ;;  %v6687_v1 = vpop.eup %4505 }
 0x671   : > { %8741 = vst [vmem:[#allocation36_spill] sm:$0xff] %v6687_v1  ;;  %4509 = vpow2.f32 %v2213_v17  ;;  %v1566_v50 = vadd.f32 %v6687_v1, %v6685_v55  ;;  %v8932_v1 = vld [vmem:[#allocation38_spill] sm:$0xff]  ;;  %v8935_v55 = vld [vmem:[#allocation37_spill] sm:$0xff] }
 0x672   : > { %4511 = vpow2.f32 %v2219_v52 }
 0x673   : > { %4513 = vpow2.f32 %v2221_v14  ;;  %v6699_v60 = vpop.eup %4507  ;;  %v8750_v14 = vld [vmem:[#allocation51_spill] sm:$0xff] }
 0x674   : > { %8743 = vst [vmem:[#allocation44_spill] sm:$0xff] %v6699_v60  ;;  %4515 = vpow2.f32 %v1526_v29  ;;  %v1472_v36 = vsub.f32 %v8750_v14, %v6582_v4 }
 0x675   : > { %4517 = vpow2.f32 %v1528_v47 }
 0x676   : > { %v6707_v2 = vpop.xlane.xlu2 %1561 }
 0x677   : > { %v6701_v11 = vpop.eup %4509  ;;  %8747 = vst [vmem:[#allocation109_spill] sm:$0xff] %v6707_v2 }
 0x678   : > { %8744 = vst [vmem:[#allocation43_spill] sm:$0xff] %v6701_v11  ;;  %v6703_v12 = vpop.eup %4511  ;;  %v2266_v63 = vadd.f32 %v6701_v11, %v6699_v60 }
 0x679   : > { %8745 = vst [vmem:[#allocation107_spill] sm:$0xff] %v6703_v12 }
 0x67e   : > { %v2468_v17 = vpop.permute.xlu2 %2467 }
 0x67f   : > { %4198 = vmatpush.xpose.msk.msrb.mxu0 %vm8730_vm14, %v2468_v17 }
 0x681   : > { %2465 = vrot.lane.b32.xlu0 %v4825_v13, %s4969_s17  ;;  %v6705_v13 = vpop.eup %4513 }
 0x682   : > { %v3196_v6 = vpop.permute.xlu1 %3195  ;;  %8746 = vst [vmem:[#allocation108_spill] sm:$0xff] %v6705_v13  ;;  %v2272_v54 = vadd.f32 %v6705_v13, %v6703_v12  ;;  %v6713_v31 = vpop.eup %4515 }
 0x683   : > { %4294 = vmatpush.xpose.msk.msrb.mxu3 %vm8730_vm14, %v3196_v6  ;;  %8748 = vst [vmem:[#allocation110_spill] sm:$0xff] %v6713_v31  ;;  %v6715_v19 = vpop.eup %4517  ;;  %v1473_v6 = vsub.f32 %v8751_v3, %v6582_v4 }
 0x684   : > { %8749 = vst [vmem:[#allocation111_spill] sm:$0xff] %v6715_v19  ;;  %v1578_v52 = vadd.f32 %v6715_v19, %v6713_v31 }
 0x685   : > { %1567 = vadd.xlane.f32.xlu1 %v1566_v50  ;;  %v1530_v50 = vmul.f32 1.442695, %v1472_v36  ;;  %v1532_v29 = vmul.f32 1.442695, %v1473_v6  ;;  %v8759_v6 = vld [vmem:[#allocation41_spill] sm:$0xff] }
 0x687   : > { %4519 = vpow2.f32 %v1530_v50  ;;  %v1468_v50 = vsub.f32 %v8759_v6, %v6518_v53  ;;  %v8763_v6 = vld [vmem:[#allocation47_spill] sm:$0xff] }
 0x688   : > { %4521 = vpow2.f32 %v1532_v29  ;;  %v8760_v29 = vld [vmem:[#allocation42_spill] sm:$0xff] }
 0x68d   : > { %2273 = vadd.xlane.f32.xlu2 %v2272_v54  ;;  %2267 = vadd.xlane.f32.xlu1 %v2266_v63  ;;  %v2169_v54 = vsub.f32 %v6351_v24, %v6611_v44  ;;  %v2170_v63 = vsub.f32 %v6344_v33, %v6611_v44  ;;  %v6730_v19 = vpop.eup %4519  ;;  %v6742_v33 = vld [vmem:[#allocation2 + $0x68] sm:$0xff] }
 0x68e   : > { %8753 = vst [vmem:[#allocation52_spill] sm:$0xff] %v6730_v19  ;;  %v6732_v14 = vpop.eup %4521 }
 0x68f   : > { %v2227_v17 = vmul.f32 1.442695, %v2169_v54  ;;  %8754 = vst [vmem:[#allocation112_spill] sm:$0xff] %v6732_v14  ;;  %v1581_v24 = vadd.f32 %v6732_v14, %v6730_v19  ;;  %v1469_v54 = vsub.f32 %v8760_v29, %v6518_v53 }
 0x691   : > { %4523 = vpow2.f32 %v2227_v17  ;;  %v1522_v17 = vmul.f32 1.442695, %v1468_v50  ;;  %v4828_v50 = vld [vmem:[#allocation2 + $0xe8] sm:$0xff] }
 0x692   : > { %v6724_v47 = vpop.xlane.xlu0 %1564 }
 0x693   : > { %8752 = vst [vmem:[#allocation51_spill] sm:$0xff] %v6724_v47 }
 0x695   : > { %1579 = vadd.xlane.f32.xlu2 %v1578_v52  ;;  %v2229_v52 = vmul.f32 1.442695, %v2170_v63 }
 0x697   : > { %4525 = vpow2.f32 %v2229_v52  ;;  %v6740_v4 = vpop.eup %4523  ;;  %v1524_v52 = vmul.f32 1.442695, %v1469_v54 }
 0x698   : > { %8756 = vst [vmem:[#allocation114_spill] sm:$0xff] %v6740_v4  ;;  %4527 = vpow2.f32 %v1522_v17 }
 0x699   : > { %4529 = vpow2.f32 %v1524_v52 }
 0x69a   : > { %v6734_v31 = vpop.xlane.xlu0 %2261 }
 0x69b   : > { %8755 = vst [vmem:[#allocation113_spill] sm:$0xff] %v6734_v31  ;;  %v8947_v31 = vld [vmem:[#allocation46_spill] sm:$0xff] }
 0x69d   : > { %v6746_v44 = vpop.eup %4525 }
 0x69e   : > { %8757 = vst [vmem:[#allocation115_spill] sm:$0xff] %v6746_v44 }
 0x6a6   : > { %2497 = vrot.lane.b32.xlu1 %v6652_v0, %s4969_s17  ;;  %v2278_v0 = vadd.f32 %v6746_v44, %v6740_v4  ;;  %v2168_v4 = vsub.f32 %v8763_v6, %v6564_v30 }
 0x6ab   : > { %1582 = vadd.xlane.f32.xlu0 %v1581_v24  ;;  %v2171_v24 = vsub.f32 %v6326_v32, %v6560_v20  ;;  %v2225_v32 = vmul.f32 1.442695, %v2168_v4 }
 0x6ad   : > { %3159 = vrot.lane.b32.xlu2 %v6742_v33, %s4970_s9  ;;  %v2500_v36 = vpop.permute.xlu0 %2499  ;;  %v6751_v3 = vpop.xlane.xlu1 %1558  ;;  %v2231_v53 = vmul.f32 1.442695, %v2171_v24 }
 0x6ae   : > { %4230 = vmatpush.xpose.msk.msrb.mxu1 %vm8730_vm14, %v2500_v36  ;;  %8758 = vst [vmem:[#allocation116_spill] sm:$0xff] %v6751_v3  ;;  %v2172_v36 = vsub.f32 %v6322_v15, %v6560_v20  ;;  %v6772_v15 = vpop.eup %4527  ;;  %v1476_v20 = vsub.f32 %v6409_v40, %v6631_v45  ;;  %v8944_v3 = vld [vmem:[#allocation45_spill] sm:$0xff] }
 0x6af   : > { %8766 = vst [vmem:[#allocation47_spill] sm:$0xff] %v6772_v15  ;;  %4531 = vpow2.f32 %v2231_v53  ;;  %v6776_v17 = vpop.eup %4529 }
 0x6b0   : > { %v2233_v29 = vmul.f32 1.442695, %v2172_v36  ;;  %8767 = vst [vmem:[#allocation117_spill] sm:$0xff] %v6776_v17  ;;  %v1538_v24 = vmul.f32 1.442695, %v1476_v20  ;;  %v1575_v4 = vadd.f32 %v6776_v17, %v6772_v15  ;;  %v4829_v36 = vld [vmem:[#allocation2 + $0x60] sm:$0xff]  ;;  %v2173_v17 = vsub.f32 %v6369_v5, %v6615_v56 }
 0x6b1   : > { %v4839_v15 = vld [vmem:[#allocation2 + $0x30] sm:$0xff] }
 0x6b2   : > { %4533 = vpow2.f32 %v2233_v29  ;;  %v6855_v5 = vld [vmem:[#allocation2 + $0xb0] sm:$0xff] }
 0x6b3   : > { %2279 = vadd.xlane.f32.xlu0 %v2278_v0  ;;  %v8762_v0 = vld [vmem:[#allocation48_spill] sm:$0xff] }
 0x6b4   : > { %v2167_v44 = vsub.f32 %v8762_v0, %v6564_v30  ;;  %v1477_v30 = vsub.f32 %v6413_v8, %v6631_v45 }
 0x6b5   : > { %v6767_v14 = vpop.xlane.xlu1 %2258  ;;  %v6784_v40 = vpop.eup %4531 }
 0x6b6   : > { %8764 = vst [vmem:[#allocation42_spill] sm:$0xff] %v6767_v14  ;;  %v2223_v54 = vmul.f32 1.442695, %v2167_v44  ;;  %v1540_v44 = vmul.f32 1.442695, %v1477_v30 }
 0x6b7   : > { %v6757_v63 = vpop.xlane.xlu2 %2264  ;;  %8768 = vst [vmem:[#allocation118_spill] sm:$0xff] %v6784_v40 }
 0x6b8   : > { %8761 = vst [vmem:[#allocation41_spill] sm:$0xff] %v6757_v63  ;;  %4535 = vpow2.f32 %v2223_v54  ;;  %v6786_v0 = vpop.eup %4533  ;;  %v6797_v54 = vld [vmem:[#allocation2 + $0xe0] sm:$0xff] }
 0x6b9   : > { %4537 = vpow2.f32 %v2225_v32  ;;  %8769 = vst [vmem:[#allocation119_spill] sm:$0xff] %v6786_v0  ;;  %v2281_v53 = vadd.f32 %v6786_v0, %v6784_v40  ;;  %v8941_v63 = vld [vmem:[#allocation39_spill] sm:$0xff] }
 0x6ba   : > { %4539 = vpow2.f32 %v1538_v24 }
 0x6bb   : > { %4541 = vpow2.f32 %v1540_v44 }
 0x6be   : > { %v6788_v8 = vpop.eup %4535 }
 0x6bf   : > { %v6770_v19 = vpop.xlane.xlu2 %1570  ;;  %8770 = vst [vmem:[#allocation120_spill] sm:$0xff] %v6788_v8  ;;  %v6791_v45 = vpop.eup %4537 }
 0x6c0   : > { %8765 = vst [vmem:[#allocation48_spill] sm:$0xff] %v6770_v19  ;;  %v2275_v29 = vadd.f32 %v6791_v45, %v6788_v8  ;;  %v6801_v32 = vpop.eup %4539  ;;  %v4838_v8 = vld [vmem:[#allocation2 + $0x50] sm:$0xff] }
 0x6c1   : > { %8772 = vst [vmem:[#allocation121_spill] sm:$0xff] %v6791_v45  ;;  %v6803_v20 = vpop.eup %4541 }
 0x6c2   : > { %8773 = vst [vmem:[#allocation122_spill] sm:$0xff] %v6801_v32  ;;  %v1587_v30 = vadd.f32 %v6803_v20, %v6801_v32  ;;  %v8778_v32 = vld [vmem:[#allocation55_spill] sm:$0xff] }
 0x6c3   : > { %8774 = vst [vmem:[#allocation123_spill] sm:$0xff] %v6803_v20  ;;  %v1475_v0 = vsub.f32 %v8778_v32, %v6544_v58 }
 0x6c5   : > { %v1536_v45 = vmul.f32 1.442695, %v1475_v0 }
 0x6c7   : > { %3191 = vrot.lane.b32.xlu0 %v4828_v50, %s4970_s9  ;;  %v3194_v6 = vpop.permute.xlu2 %3193 }
 0x6c8   : > { %4295 = vmatpush.xpose.msk.msrb.mxu3 %vm8771_vm1, %v3194_v6  ;;  %v4833_v6 = vld [vmem:[#allocation2 + $0x48] sm:$0xff] }
 0x6cd   : > { %v3162_v52 = vpop.permute.xlu1 %3161 }
 0x6ce   : > { %4263 = vmatpush.xpose.msk.msrb.mxu2 %vm8730_vm14, %v3162_v52  ;;  %v6807_v52 = vld [vmem:[#allocation2 + $0x58] sm:$0xff]  ;;  %vm8784_vm14 = vmmov %vm8771_vm1 }
 0x6cf   : > { %3157 = vrot.lane.b32.xlu0 %v4829_v36, %s4970_s9 }
 0x6d0   : > { %1576 = vadd.xlane.f32.xlu1 %v1575_v4  ;;  %v4832_v4 = vld [vmem:[#allocation2 + $0xd0] sm:$0xff] }
 0x6d6   : > { %2282 = vadd.xlane.f32.xlu2 %v2281_v53 }
 0x6d7   : > { %2493 = vrot.lane.b32.xlu0 %v6797_v54, %s4969_s17 }
 0x6d8   : > { %2276 = vadd.xlane.f32.xlu1 %v2275_v29  ;;  %v6811_v24 = vpop.xlane.xlu0 %1573  ;;  %v6821_v29 = vld [vmem:[#allocation2 + $0xc8] sm:$0xff] }
 0x6d9   : > { %8775 = vst [vmem:[#allocation124_spill] sm:$0xff] %v6811_v24  ;;  %v8938_v24 = vld [vmem:[#allocation40_spill] sm:$0xff] }
 0x6de   : > { %1588 = vadd.xlane.f32.xlu2 %v1587_v30  ;;  %v6826_v30 = vld [vmem:[#allocation2 + $0x40] sm:$0xff] }
 0x6df   : > { %2459 = vrot.lane.b32.xlu0 %v6807_v52, %s4969_s17 }
 0x6e0   : > { %v6814_v44 = vpop.xlane.xlu0 %2270 }
 0x6e1   : > { %8776 = vst [vmem:[#allocation125_spill] sm:$0xff] %v6814_v44 }
 0x6e7   : > { %3185 = vrot.lane.b32.xlu0 %v4832_v4, %s4970_s9 }
 0x6ef   : > { %3151 = vrot.lane.b32.xlu0 %v4833_v6, %s4970_s9 }
 0x6f1   : > { %2463 = vrot.lane.b32.xlu1 %v6742_v33, %s4969_s17  ;;  %v4836_v33 = vld [vmem:[#allocation2 + $0xd8] sm:$0xff] }
 0x6f3   : > { %v2466_v53 = vpop.permute.xlu0 %2465 }
 0x6f4   : > { %4199 = vmatpush.xpose.msk.msrb.mxu0 %vm8771_vm1, %v2466_v53  ;;  %v4837_v53 = vld [vmem:[#allocation2 + $0xb8] sm:$0xff] }
 0x6f6   : > { %2495 = vrot.lane.b32.xlu2 %v4828_v50, %s4969_s17  ;;  %v1474_v50 = vsub.f32 %v6308_v57, %v6544_v58  ;;  %v2174_v57 = vsub.f32 %v6365_v27, %v6615_v56  ;;  %v2235_v58 = vmul.f32 1.442695, %v2173_v17 }
 0x6f7   : > { %2487 = vrot.lane.b32.xlu0 %v6821_v29, %s4969_s17 }
 0x6f8   : > { %v6830_v20 = vpop.xlane.xlu1 %1567  ;;  %v1534_v40 = vmul.f32 1.442695, %v1474_v50  ;;  %v2237_v32 = vmul.f32 1.442695, %v2174_v57 }
 0x6f9   : > { %8777 = vst [vmem:[#allocation126_spill] sm:$0xff] %v6830_v20 }
 0x6fa   : > { %4543 = vpow2.f32 %v1534_v40 }
 0x6fb   : > { %4545 = vpow2.f32 %v1536_v45 }
 0x6fc   : > { %4547 = vpow2.f32 %v2235_v58  ;;  %v4842_v58 = vld [vmem:[#allocation2 + $0xc0] sm:$0xff] }
 0x6fd   : > { %4549 = vpow2.f32 %v2237_v32  ;;  %v4843_v32 = vld [vmem:[#allocation2 + $0xa0] sm:$0xff] }
 0x6fe   : > { %2461 = vrot.lane.b32.xlu2 %v4829_v36, %s4969_s17 }
 0x6ff   : > { %2453 = vrot.lane.b32.xlu0 %v6826_v30, %s4969_s17 }
 0x700   : > { %v6838_v36 = vpop.xlane.xlu2 %2273  ;;  %v6846_v13 = vpop.xlane.xlu1 %2267 }
 0x701   : > { %8779 = vst [vmem:[#allocation55_spill] sm:$0xff] %v6838_v36  ;;  %v6850_v0 = vpop.eup %4543 }
 0x702   : > { %8780 = vst [vmem:[#allocation127_spill] sm:$0xff] %v6846_v13  ;;  %v6852_v12 = vpop.eup %4545 }
 0x703   : > { %8782 = vst [vmem:[#allocation129_spill] sm:$0xff] %v6850_v0  ;;  %v1584_v56 = vadd.f32 %v6852_v12, %v6850_v0  ;;  %v6862_v40 = vpop.eup %4547  ;;  %v8919_v0 = vld [vmem:[#allocation27_spill] sm:$0xff] }
 0x704   : > { %8783 = vst [vmem:[#allocation130_spill] sm:$0xff] %v6852_v12  ;;  %v6865_v45 = vpop.eup %4549 }
 0x705   : > { %8785 = vst [vmem:[#allocation131_spill] sm:$0xff] %v6862_v40  ;;  %v2284_v57 = vadd.f32 %v6865_v45, %v6862_v40  ;;  %v4858_v40 = vld [vmem:[%s5368_s27 + $0x60] sm:$0xff] }
 0x706   : > { %3187 = vrot.lane.b32.xlu2 %v4836_v33, %s4970_s9  ;;  %8786 = vst [vmem:[#allocation132_spill] sm:$0xff] %v6865_v45 }
 0x707   : > { %3179 = vrot.lane.b32.xlu0 %v4837_v53, %s4970_s9 }
 0x708   : > { %v6848_v50 = vpop.xlane.xlu2 %1579 }
 0x709   : > { %8781 = vst [vmem:[#allocation128_spill] sm:$0xff] %v6848_v50  ;;  %v8926_v50 = vld [vmem:[#allocation33_spill] sm:$0xff] }
 0x70e   : > { %3153 = vrot.lane.b32.xlu2 %v4838_v8, %s4970_s9 }
 0x70f   : > { %3145 = vrot.lane.b32.xlu0 %v4839_v15, %s4970_s9 }
 0x710   : > { %v3160_v17 = vpop.permute.xlu2 %3159 }
 0x711   : > { %4264 = vmatpush.xpose.msk.msrb.mxu2 %vm8771_vm1, %v3160_v17 }
 0x716   : > { %2489 = vrot.lane.b32.xlu2 %v4832_v4, %s4969_s17  ;;  %v4841_v4 = vld [vmem:[#allocation2 + $0x28] sm:$0xff] }
 0x717   : > { %2481 = vrot.lane.b32.xlu0 %v6855_v5, %s4969_s17 }
 0x718   : > { %v2498_v27 = vpop.permute.xlu1 %2497 }
 0x719   : > { %4231 = vmatpush.xpose.msk.msrb.mxu1 %vm8784_vm14, %v2498_v27  ;;  %v4844_v27 = vld [vmem:[#allocation2 + $0x38] sm:$0xff]  ;;  %vm8791_vm14 = vmmov %vm8771_vm1 }
 0x71b   : > { %1585 = vadd.xlane.f32.xlu1 %v1584_v56  ;;  %v4849_v56 = vld [vmem:[#allocation2 + $0x90] sm:$0xff] }
 0x71e   : > { %2455 = vrot.lane.b32.xlu2 %v4833_v6, %s4969_s17  ;;  %v4845_v6 = vld [vmem:[#allocation2 + $0xa8] sm:$0xff] }
 0x71f   : > { %2447 = vrot.lane.b32.xlu0 %v4841_v4, %s4969_s17 }
 0x723   : > { %2285 = vadd.xlane.f32.xlu1 %v2284_v57 }
 0x726   : > { %3181 = vrot.lane.b32.xlu2 %v4842_v58, %s4970_s9 }
 0x727   : > { %3173 = vrot.lane.b32.xlu0 %v4843_v32, %s4970_s9 }
 0x72e   : > { %3147 = vrot.lane.b32.xlu2 %v4844_v27, %s4970_s9 }
 0x72f   : > { %3139 = vrot.lane.b32.xlu0 %v6457_v39, %s4970_s9  ;;  %v4846_v39 = vld [vmem:[#allocation2 + $0x20] sm:$0xff] }
 0x736   : > { %2483 = vrot.lane.b32.xlu2 %v4837_v53, %s4969_s17 }
 0x737   : > { %3137 = vrot.lane.b32.xlu0 %v6448_v48, %s4970_s9  ;;  %v6891_v48 = vld [vmem:[#allocation2 + $0x80] sm:$0xff] }
 0x73c   : > { %3189 = vrot.lane.b32.xlu1 %v6797_v54, %s4970_s9 }
 0x73e   : > { %2449 = vrot.lane.b32.xlu2 %v4839_v15, %s4969_s17  ;;  %v6897_v15 = vpop.xlane.xlu0 %1582 }
 0x73f   : > { %3135 = vrot.lane.b32.xlu0 %v6431_v28, %s4970_s9  ;;  %8788 = vst [vmem:[#allocation134_spill] sm:$0xff] %v6897_v15 }
 0x743   : > { %v6895_v28 = vpop.xlane.xlu1 %1576 }
 0x744   : > { %3155 = vrot.lane.b32.xlu1 %v6807_v52, %s4970_s9  ;;  %8787 = vst [vmem:[#allocation133_spill] sm:$0xff] %v6895_v28  ;;  %v4848_v52 = vld [vmem:[#allocation2 + $0x98] sm:$0xff] }
 0x746   : > { %3175 = vrot.lane.b32.xlu2 %v4845_v6, %s4970_s9 }
 0x747   : > { %3133 = vrot.lane.b32.xlu0 %v6389_v46, %s4970_s9  ;;  %v6903_v46 = vpop.xlane.xlu0 %2279 }
 0x748   : > { %8790 = vst [vmem:[#allocation136_spill] sm:$0xff] %v6903_v46 }
 0x74b   : > { %v6901_v54 = vpop.xlane.xlu1 %2276 }
 0x74c   : > { %2491 = vrot.lane.b32.xlu1 %v4836_v33, %s4969_s17  ;;  %8789 = vst [vmem:[#allocation135_spill] sm:$0xff] %v6901_v54  ;;  %v8924_v54 = vld [vmem:[#allocation29_spill] sm:$0xff] }
 0x74e   : > { %3141 = vrot.lane.b32.xlu2 %v4846_v39, %s4970_s9 }
 0x74f   : > { %2469 = vrot.lane.b32.xlu0 %v6891_v48, %s4969_s17  ;;  %v3192_v53 = vpop.permute.xlu0 %3191 }
 0x750   : > { %4296 = vmatpush.xpose.msk.msrb.mxu3 %vm8771_vm1, %v3192_v53 }
 0x754   : > { %2457 = vrot.lane.b32.xlu1 %v4838_v8, %s4969_s17  ;;  %v6912_v8 = vpop.xlane.xlu2 %2282 }
 0x755   : > { %8792 = vst [vmem:[#allocation137_spill] sm:$0xff] %v6912_v8 }
 0x756   : > { %2477 = vrot.lane.b32.xlu2 %v4843_v32, %s4969_s17 }
 0x75c   : > { %3183 = vrot.lane.b32.xlu1 %v6821_v29, %s4970_s9  ;;  %v4850_v29 = vld [vmem:[#allocation2 + $0x88] sm:$0xff]  ;;  %v6917_v17 = vpop.xlane.xlu2 %1588 }
 0x75d   : > { %8793 = vst [vmem:[#allocation138_spill] sm:$0xff] %v6917_v17 }
 0x75e   : > { %2475 = vrot.lane.b32.xlu2 %v4848_v52, %s4969_s17 }
 0x763   : > { %v2464_v33 = vpop.permute.xlu1 %2463 }
 0x764   : > { %3149 = vrot.lane.b32.xlu1 %v6826_v30, %s4970_s9  ;;  %4200 = vmatpush.xpose.msk.msrb.mxu0 %vm8791_vm14, %v2464_v33  ;;  %v3158_v30 = vpop.permute.xlu0 %3157  ;;  %vm8794_vm14 = vmmov %vm8771_vm1  ;;  %v2496_v57 = vpop.permute.xlu2 %2495 }
 0x765   : > { %4265 = vmatpush.xpose.msk.msrb.mxu2 %vm8794_vm14, %v3158_v30  ;;  %4232 = vmatpush.xpose.msk.msrb.mxu1 %vm8771_vm1, %v2496_v57  ;;  %v4851_v30 = vld [vmem:[%s5368_s27 + $0x18] sm:$0xff]  ;;  %vm8803_vm14 = vmmov %vm8771_vm1 }
 0x766   : > { %2473 = vrot.lane.b32.xlu2 %v4849_v56, %s4969_s17  ;;  %3107 = vrot.lane.b32.xlu0 %v4851_v30, %s4971_s10  ;;  %v4855_v30 = vld [vmem:[%s5368_s27 + $0x28] sm:$0xff] }
 0x76c   : > { %2485 = vrot.lane.b32.xlu1 %v4842_v58, %s4969_s17  ;;  %v2494_v32 = vpop.permute.xlu0 %2493  ;;  %v2462_v58 = vpop.permute.xlu2 %2461 }
 0x76d   : > { %4233 = vmatpush.xpose.msk.msrb.mxu1 %vm8795_vm13, %v2494_v32  ;;  %4201 = vmatpush.xpose.msk.msrb.mxu0 %vm8796_vm3, %v2462_v58  ;;  %v4853_v32 = vld [vmem:[%s5368_s27 + $0x10] sm:$0xff]  ;;  %vm8800_vm13 = vmmov %vm8771_vm1 }
 0x76e   : > { %2471 = vrot.lane.b32.xlu2 %v4850_v29, %s4969_s17  ;;  %vm8801_vm3 = vmmov %vm8771_vm1 }
 0x774   : > { %2451 = vrot.lane.b32.xlu1 %v4844_v27, %s4969_s17  ;;  %v2460_v27 = vpop.permute.xlu0 %2459  ;;  %v3188_v33 = vpop.permute.xlu2 %3187 }
 0x775   : > { %4202 = vmatpush.xpose.msk.msrb.mxu0 %vm8797_vm15, %v2460_v27  ;;  %vm8802_vm15 = vmmov %vm8771_vm1 }
 0x77c   : > { %3177 = vrot.lane.b32.xlu1 %v6855_v5, %s4970_s9  ;;  %v3186_v53 = vpop.permute.xlu0 %3185  ;;  %v4852_v5 = vld [vmem:[%s5368_s27] sm:$0xff] }
 0x77d   : > { %3101 = vrot.lane.b32.xlu2 %v4852_v5, %s4971_s10 }
 0x784   : > { %3143 = vrot.lane.b32.xlu1 %v4841_v4, %s4970_s9  ;;  %v3154_v4 = vpop.permute.xlu2 %3153  ;;  %v3152_v57 = vpop.permute.xlu0 %3151 }
 0x785   : > { %3105 = vrot.lane.b32.xlu2 %v4853_v32, %s4971_s10 }
 0x78c   : > { %2479 = vrot.lane.b32.xlu1 %v4845_v6, %s4969_s17  ;;  %v4854_v6 = vld [vmem:[%s5368_s27 + $0x30] sm:$0xff]  ;;  %v2490_v27 = vpop.permute.xlu2 %2489  ;;  %v2488_v5 = vpop.permute.xlu0 %2487 }
 0x78d   : > { %3113 = vrot.lane.b32.xlu0 %v4854_v6, %s4971_s10  ;;  %3111 = vrot.lane.b32.xlu2 %v4855_v30, %s4971_s10  ;;  %v4857_v6 = vld [vmem:[%s5368_s27 + $0x40] sm:$0xff] }
 0x78e   : > { %v6938_v58 = vpop.xlane.xlu1 %1585 }
 0x78f   : > { %8798 = vst [vmem:[#allocation139_spill] sm:$0xff] %v6938_v58 }
 0x794   : > { %2445 = vrot.lane.b32.xlu1 %v4846_v39, %s4969_s17  ;;  %v4856_v39 = vld [vmem:[%s5368_s27 + $0x48] sm:$0xff]  ;;  %v2456_v45 = vpop.permute.xlu2 %2455 }
 0x795   : > { %3119 = vrot.lane.b32.xlu0 %v4856_v39, %s4971_s10  ;;  %3117 = vrot.lane.b32.xlu2 %v4857_v6, %s4971_s10  ;;  %v4859_v39 = vld [vmem:[%s5368_s27 + $0x58] sm:$0xff] }
 0x796   : > { %v6946_v32 = vpop.xlane.xlu1 %2285 }
 0x797   : > { %8799 = vst [vmem:[#allocation140_spill] sm:$0xff] %v6946_v32 }
 0x79c   : > { %3171 = vrot.lane.b32.xlu1 %v4848_v52, %s4970_s9  ;;  %v2454_v52 = vpop.permute.xlu0 %2453  ;;  %v3182_v12 = vpop.permute.xlu2 %3181 }
 0x79d   : > { %3125 = vrot.lane.b32.xlu0 %v4858_v40, %s4971_s10  ;;  %3123 = vrot.lane.b32.xlu2 %v4859_v39, %s4971_s10  ;;  %v4862_v39 = vld [vmem:[%s5368_s27 + $0x8] sm:$0xff] }
 0x7a4   : > { %3169 = vrot.lane.b32.xlu1 %v4849_v56, %s4970_s9  ;;  %v4860_v56 = vld [vmem:[%s5368_s27 + $0x78] sm:$0xff]  ;;  %v3180_v6 = vpop.permute.xlu0 %3179 }
 0x7a5   : > { %3131 = vrot.lane.b32.xlu0 %v4860_v56, %s4971_s10  ;;  %v4863_v56 = vld [vmem:[%s5368_s27 + $0x20] sm:$0xff] }
 0x7ac   : > { %3167 = vrot.lane.b32.xlu1 %v4850_v29, %s4970_s9  ;;  %v4861_v29 = vld [vmem:[%s5368_s27 + $0x70] sm:$0xff] }
 0x7ad   : > { %3129 = vrot.lane.b32.xlu2 %v4861_v29, %s4971_s10  ;;  %v4864_v29 = vld [vmem:[%s5368_s27 + $0x38] sm:$0xff] }
 0x7ae   : > { %v3190_v30 = vpop.permute.xlu1 %3189 }
 0x7af   : > { %4297 = vmatpush.xpose.msk.msrb.mxu3 %vm8800_vm13, %v3190_v30  ;;  %v3148_v30 = vpop.permute.xlu2 %3147  ;;  %vm8804_vm13 = vmmov %vm8771_vm1 }
 0x7b3   : > { %4298 = vmatpush.xpose.msk.msrb.mxu3 %vm8801_vm3, %v3188_v33  ;;  %vm8805_vm3 = vmmov %vm8771_vm1 }
 0x7b4   : > { %3165 = vrot.lane.b32.xlu1 %v6891_v48, %s4970_s9  ;;  %v3146_v48 = vpop.permute.xlu0 %3145 }
 0x7b6   : > { %v3156_v40 = vpop.permute.xlu1 %3155 }
 0x7b7   : > { %4266 = vmatpush.xpose.msk.msrb.mxu2 %vm8802_vm15, %v3156_v40  ;;  %4299 = vmatpush.xpose.msk.msrb.mxu3 %vm8803_vm14, %v3186_v53  ;;  %v2484_v40 = vpop.permute.xlu2 %2483  ;;  %vm8807_vm15 = vmmov %vm8771_vm1 }
 0x7b8   : > { %vm8808_vm14 = vmmov %vm8771_vm1 }
 0x7bb   : > { %4267 = vmatpush.xpose.msk.msrb.mxu2 %vm8771_vm1, %v3154_v4 }
 0x7bc   : > { %3103 = vrot.lane.b32.xlu1 %v4862_v39, %s4971_s10  ;;  %v2482_v4 = vpop.permute.xlu0 %2481 }
 0x7be   : > { %v2492_v33 = vpop.permute.xlu1 %2491 }
 0x7bf   : > { %4234 = vmatpush.xpose.msk.msrb.mxu1 %vm8804_vm13, %v2492_v33  ;;  %4268 = vmatpush.xpose.msk.msrb.mxu2 %vm8805_vm3, %v3152_v57  ;;  %vm8809_vm13 = vmmov %vm8771_vm1  ;;  %v4865_v33 = vld [vmem:[%s5368_s27 + $0x50] sm:$0xff] }
 0x7c0   : > { %vm8811_vm3 = vmmov %vm8771_vm1 }
 0x7c3   : > { %4235 = vmatpush.xpose.msk.msrb.mxu1 %vm8806_vm8, %v2490_v27  ;;  %vm8810_vm8 = vmmov %vm8771_vm1  ;;  %v2450_v27 = vpop.permute.xlu2 %2449 }
 0x7c4   : > { %3109 = vrot.lane.b32.xlu1 %v4863_v56, %s4971_s10  ;;  %v2448_v39 = vpop.permute.xlu0 %2447  ;;  %v4866_v56 = vld [vmem:[%s5368_s27 + $0x68] sm:$0xff] }
 0x7c6   : > { %v2458_v53 = vpop.permute.xlu1 %2457 }
 0x7c7   : > { %4203 = vmatpush.xpose.msk.msrb.mxu0 %vm8807_vm15, %v2458_v53  ;;  %4236 = vmatpush.xpose.msk.msrb.mxu1 %vm8808_vm14, %v2488_v5  ;;  %vm8812_vm15 = vmmov %vm8771_vm1 }
 0x7c8   : > { %vm8813_vm14 = vmmov %vm8771_vm1 }
 0x7cb   : > { %4204 = vmatpush.xpose.msk.msrb.mxu0 %vm8771_vm1, %v2456_v45  ;;  %v3176_v45 = vpop.permute.xlu2 %3175 }
 0x7cc   : > { %3115 = vrot.lane.b32.xlu1 %v4864_v29, %s4971_s10 }
 0x7ce   : > { %v3184_v57 = vpop.permute.xlu1 %3183 }
 0x7cf   : > { %4300 = vmatpush.xpose.msk.msrb.mxu3 %vm8809_vm13, %v3184_v57  ;;  %4205 = vmatpush.xpose.msk.msrb.mxu0 %vm8810_vm8, %v2454_v52  ;;  %v3174_v52 = vpop.permute.xlu0 %3173  ;;  %vm8814_vm13 = vmmov %vm8771_vm1 }
 0x7d0   : > { %vm8815_vm8 = vmmov %vm8771_vm1 }
 0x7d3   : > { %4301 = vmatpush.xpose.msk.msrb.mxu3 %vm8811_vm3, %v3182_v12  ;;  %vm8816_vm3 = vmmov %vm8771_vm1  ;;  %v3142_v12 = vpop.permute.xlu2 %3141 }
 0x7d4   : > { %3121 = vrot.lane.b32.xlu1 %v4865_v33, %s4971_s10 }
 0x7d6   : > { %v3150_v5 = vpop.permute.xlu1 %3149 }
 0x7d7   : > { %4269 = vmatpush.xpose.msk.msrb.mxu2 %vm8812_vm15, %v3150_v5  ;;  %4302 = vmatpush.xpose.msk.msrb.mxu3 %vm8813_vm14, %v3180_v6  ;;  %vm8818_vm15 = vmmov %vm8817_vm0  ;;  %v3140_v6 = vpop.permute.xlu0 %3139 }
 0x7d8   : > { %vm8819_vm14 = vmmov %vm8817_vm0 }
 0x7db   : > { %4270 = vmatpush.xpose.msk.msrb.mxu2 %vm8771_vm1, %v3148_v30  ;;  %v2478_v57 = vpop.permute.xlu2 %2477  ;;  %vm8820_vm1 = vmmov %vm8817_vm0 }
 0x7dc   : > { %3127 = vrot.lane.b32.xlu1 %v4866_v56, %s4971_s10 }
 0x7de   : > { %v2486_v53 = vpop.permute.xlu1 %2485 }
 0x7df   : > { %4237 = vmatpush.xpose.msk.msrb.mxu1 %vm8814_vm13, %v2486_v53  ;;  %4271 = vmatpush.xpose.msk.msrb.mxu2 %vm8815_vm8, %v3146_v48  ;;  %v3138_v33 = vpop.permute.xlu0 %3137  ;;  %vm8822_vm13 = vmmov %vm8817_vm0 }
 0x7e0   : > { %vm8823_vm8 = vmmov %vm8817_vm0 }
 0x7e3   : > { %4238 = vmatpush.xpose.msk.msrb.mxu1 %vm8816_vm3, %v2484_v40  ;;  %vm8824_vm3 = vmmov %vm8817_vm0  ;;  %v2476_v40 = vpop.permute.xlu2 %2475 }
 0x7e6   : > { %v2452_v29 = vpop.permute.xlu1 %2451 }
 0x7e7   : > { %4206 = vmatpush.xpose.msk.msrb.mxu0 %vm8817_vm0, %v2452_v29  ;;  %4239 = vmatpush.xpose.msk.msrb.mxu1 %vm8818_vm15, %v2482_v4  ;;  %v3136_v4 = vpop.permute.xlu0 %3135  ;;  %vm8825_vm15 = vmmov %vm8817_vm0 }
 0x7eb   : > { %4207 = vmatpush.xpose.msk.msrb.mxu0 %vm8819_vm14, %v2450_v27  ;;  %vm8826_vm14 = vmmov %vm8817_vm0  ;;  %v2474_v27 = vpop.permute.xlu2 %2473 }
 0x7ee   : > { %v3178_v30 = vpop.permute.xlu1 %3177 }
 0x7ef   : > { %4303 = vmatpush.xpose.msk.msrb.mxu3 %vm8820_vm1, %v3178_v30  ;;  %4208 = vmatpush.xpose.msk.msrb.mxu0 %vm8821_vm12, %v2448_v39  ;;  %vm8827_vm1 = vmmov %vm8817_vm0 }
 0x7f0   : > { %vm8828_vm12 = vmmov %vm8817_vm0 }
 0x7f3   : > { %4304 = vmatpush.xpose.msk.msrb.mxu3 %vm8822_vm13, %v3176_v45  ;;  %v3134_v45 = vpop.permute.xlu0 %3133  ;;  %vm8829_vm13 = vmmov %vm8817_vm0  ;;  %v2472_v56 = vpop.permute.xlu2 %2471 }
 0x7f6   : > { %v3144_v48 = vpop.permute.xlu1 %3143 }
 0x7f7   : > { %4272 = vmatpush.xpose.msk.msrb.mxu2 %vm8823_vm8, %v3144_v48  ;;  %4305 = vmatpush.xpose.msk.msrb.mxu3 %vm8824_vm3, %v3174_v52  ;;  %vm8830_vm8 = vmmov %vm8817_vm0 }
 0x7f8   : > { %vm8831_vm3 = vmmov %vm8817_vm0 }
 0x7fb   : > { %4273 = vmatpush.xpose.msk.msrb.mxu2 %vm8817_vm0, %v3142_v12  ;;  %v2470_v53 = vpop.permute.xlu0 %2469 }
 0x7fe   : > { %v2480_v5 = vpop.permute.xlu1 %2479 }
 0x7ff   : > { %4240 = vmatpush.xpose.msk.msrb.mxu1 %vm8825_vm15, %v2480_v5  ;;  %4274 = vmatpush.xpose.msk.msrb.mxu2 %vm8826_vm14, %v3140_v6  ;;  %vm8833_vm15 = vmmov %vm8817_vm0 }
 0x800   : > { %vm8834_vm14 = vmmov %vm8817_vm0 }
 0x803   : > { %4241 = vmatpush.xpose.msk.msrb.mxu1 %vm8827_vm1, %v2478_v57  ;;  %4275 = vmatpush.xpose.msk.msrb.mxu2 %vm8828_vm12, %v3138_v33  ;;  %vm8835_vm1 = vmmov %vm8817_vm0 }
 0x804   : > { %vm8836_vm12 = vmmov %vm8817_vm0 }
 0x806   : > { %v2446_v39 = vpop.permute.xlu1 %2445 }
 0x807   : > { %4209 = vmatpush.xpose.msk.msrb.mxu0 %vm8829_vm13, %v2446_v39  ;;  %4242 = vmatpush.xpose.msk.msrb.mxu1 %vm8830_vm8, %v2476_v40  ;;  %vm8837_vm13 = vmmov %vm8817_vm0 }
 0x808   : > { %4276 = vmatpush.xpose.msk.msrb.mxu2 %vm8831_vm3, %v3136_v4  ;;  %vm8838_vm8 = vmmov %vm8817_vm0 }
 0x809   : > { %vm8839_vm3 = vmmov %vm8817_vm0 }
 0x80b   : > { %4210 = vmatpush.xpose.msk.msrb.mxu0 %vm8817_vm0, %v6673_v43  ;;  %4243 = vmatpush.xpose.msk.msrb.mxu1 %vm8832_vm4, %v2474_v27  ;;  %vm8840_vm4 = vmmov %vm8817_vm0 }
 0x80c   : > { %4277 = vmatpush.xpose.msk.msrb.mxu2 %vm8833_vm15, %v3134_v45  ;;  %vm8841_vm15 = vmmov %vm8817_vm0 }
 0x80f   : > { %4211 = vmatpush.xpose.msk.msrb.mxu0 %vm8834_vm14, %v6660_v7  ;;  %4244 = vmatpush.xpose.msk.msrb.mxu1 %vm8835_vm1, %v2472_v56  ;;  %vm8842_vm14 = vmmov %vm8817_vm0 }
 0x810   : > { %vm8843_vm1 = vmmov %vm8817_vm0 }
 0x813   : > { %4212 = vmatpush.xpose.msk.msrb.mxu0 %vm8836_vm12, %v6619_v51  ;;  %4245 = vmatpush.xpose.msk.msrb.mxu1 %vm8837_vm13, %v2470_v53  ;;  %vm8844_vm12 = vmmov %vm8817_vm0 }
 0x814   : > { %vm8845_vm13 = vmmov %vm8817_vm0 }
 0x816   : > { %4246 = vmatmul.msk.f32.vlgmr.msrb.gmra.mxu1 %vm8838_vm8, %v6381_v35  ;;  %vm8846_vm8 = vmmov %vm8817_vm0 }
 0x817   : > { %4213 = vmatpush.xpose.msk.msrb.mxu0 %vm8839_vm3, %v6637_v61  ;;  %vm8847_vm3 = vmmov %vm8817_vm0 }
 0x81a   : > { %4214 = vmatmul.msk.f32.vlgmr.msrb.gmra.mxu0 %vm8840_vm4, %v6381_v35  ;;  %vm8848_vm4 = vmmov %vm8817_vm0 }
 0x81e   : > { %4247 = vmatmul.msk.f32.gmra.mxu1 %vm8817_vm0, %v6318_v10 }
 0x822   : > { %4215 = vmatmul.msk.f32.gmra.mxu0 %vm8841_vm15, %v6318_v10  ;;  %v3172_v10 = vpop.permute.xlu1 %3171  ;;  %vm8849_vm15 = vmmov %vm8817_vm0 }
 0x823   : > { %4306 = vmatpush.xpose.msk.msrb.mxu3 %vm8817_vm0, %v3172_v10 }
 0x826   : > { %4248 = vmatmul.msk.f32.gmra.mxu1 %vm8842_vm14, %v6445_v18  ;;  %vm8850_vm14 = vmmov %vm8817_vm0 }
 0x82a   : > { %4216 = vmatmul.msk.f32.gmra.mxu0 %vm8843_vm1, %v6445_v18  ;;  %v3170_v35 = vpop.permute.xlu1 %3169  ;;  %vm8851_vm1 = vmmov %vm8817_vm0 }
 0x82b   : > { %4307 = vmatpush.xpose.msk.msrb.mxu3 %vm8851_vm1, %v3170_v35  ;;  %vm8859_vm1 = vmmov %vm8817_vm0 }
 0x82e   : > { %4249 = vmatmul.msk.f32.gmra.mxu1 %vm8844_vm12, %v6443_v25  ;;  %vm8852_vm12 = vmmov %vm8817_vm0 }
 0x832   : > { %4217 = vmatmul.msk.f32.gmra.mxu0 %vm8845_vm13, %v6443_v25  ;;  %vm8853_vm13 = vmmov %vm8817_vm0  ;;  %v3168_v25 = vpop.permute.xlu1 %3167 }
 0x836   : > { %4250 = vmatmul.msk.f32.gmra.mxu1 %vm8846_vm8, %v6489_v16  ;;  %vm8854_vm8 = vmmov %vm8817_vm0 }
 0x837   : > { %4308 = vmatpush.xpose.msk.msrb.mxu3 %vm8854_vm8, %v3168_v25  ;;  %vm8862_vm8 = vmmov %vm8817_vm0 }
 0x83a   : > { %4218 = vmatmul.msk.f32.gmra.mxu0 %vm8847_vm3, %v6489_v16  ;;  %vm8855_vm3 = vmmov %vm8817_vm0  ;;  %v3166_v18 = vpop.permute.xlu1 %3165 }
 0x83b   : > { %4309 = vmatpush.xpose.msk.msrb.mxu3 %vm8817_vm0, %v3166_v18 }
 0x83e   : > { %4251 = vmatmul.msk.f32.gmra.mxu1 %vm8848_vm4, %v6470_v37  ;;  %vm8856_vm4 = vmmov %vm8817_vm0 }
 0x842   : > { %4219 = vmatmul.msk.f32.gmra.mxu0 %vm8849_vm15, %v6470_v37  ;;  %vm8857_vm15 = vmmov %vm8817_vm0  ;;  %v3102_v37 = vpop.permute.xlu2 %3101 }
 0x843   : > { %4310 = vmatmul.msk.f32.vlgmr.msrb.gmra.mxu3 %vm8859_vm1, %v3102_v37  ;;  %vm8867_vm1 = vmmov %vm8817_vm0 }
 0x846   : > { %4252 = vmatmul.msk.f32.gmra.mxu1 %vm8850_vm14, %v6479_v22  ;;  %vm8858_vm14 = vmmov %vm8817_vm0 }
 0x847   : > { %4278 = vmatmul.msk.f32.vlgmr.msrb.gmra.mxu2 %vm8858_vm14, %v3102_v37  ;;  %vm8866_vm14 = vmmov %vm8817_vm0 }
 0x84a   : > { %4220 = vmatmul.msk.f32.gmra.mxu0 %vm8852_vm12, %v6479_v22  ;;  %vm8860_vm12 = vmmov %vm8817_vm0  ;;  %v3104_v22 = vpop.permute.xlu1 %3103  ;;  %v3106_v16 = vpop.permute.xlu2 %3105 }
 0x84e   : > { %4253 = vmatmul.msk.f32.gmra.mxu1 %vm8853_vm13, %v6522_v42  ;;  %vm8861_vm13 = vmmov %vm8817_vm0 }
 0x84f   : > { %4279 = vmatmul.msk.f32.gmra.mxu2 %vm8862_vm8, %v3104_v22  ;;  %vm8870_vm8 = vmmov %vm8817_vm0 }
 0x852   : > { %4221 = vmatmul.msk.f32.gmra.mxu0 %vm8855_vm3, %v6522_v42  ;;  %vm8863_vm3 = vmmov %vm8817_vm0  ;;  %v3110_v42 = vpop.permute.xlu1 %3109 }
 0x853   : > { %4311 = vmatmul.msk.f32.gmra.mxu3 %vm8863_vm3, %v3104_v22  ;;  %vm8871_vm3 = vmmov %vm8817_vm0 }
 0x856   : > { %4254 = vmatmul.msk.f32.gmra.mxu1 %vm8856_vm4, %v6510_v59  ;;  %vm8864_vm4 = vmmov %vm8817_vm0 }
 0x85a   : > { %4222 = vmatmul.msk.f32.gmra.mxu0 %vm8857_vm15, %v6510_v59  ;;  %vm8865_vm15 = vmmov %vm8817_vm0  ;;  %v3108_v59 = vpop.permute.xlu0 %3107  ;;  %v3116_v51 = vpop.permute.xlu1 %3115 }
 0x85b   : > { %4280 = vmatmul.msk.f32.gmra.mxu2 %vm8865_vm15, %v3106_v16  ;;  %4312 = vmatmul.msk.f32.gmra.mxu3 %vm8866_vm14, %v3106_v16  ;;  %vm8873_vm15 = vmmov %vm8817_vm0 }
 0x85c   : > { %vm8874_vm14 = vmmov %vm8817_vm0 }
 0x85e   : > { %4255 = vmatmul.msk.f32.gmra.mxu1 %vm8860_vm12, %v6541_v62  ;;  %vm8868_vm12 = vmmov %vm8817_vm0 }
 0x862   : > { %4223 = vmatmul.msk.f32.gmra.mxu0 %vm8861_vm13, %v6541_v62  ;;  %vm8869_vm13 = vmmov %vm8817_vm0  ;;  %v3114_v62 = vpop.permute.xlu0 %3113 }
 0x863   : > { %4281 = vmatmul.msk.f32.gmra.mxu2 %vm8870_vm8, %v3108_v59  ;;  %4313 = vmatmul.msk.f32.gmra.mxu3 %vm8871_vm3, %v3108_v59  ;;  %vm8878_vm8 = vmmov %vm8817_vm0  ;;  %v3122_v59 = vpop.permute.xlu1 %3121 }
 0x864   : > { %vm8879_vm3 = vmmov %vm8817_vm0 }
 0x866   : > { %4256 = vmatmul.msk.f32.gmra.mxu1 %vm8864_vm4, %v6552_v23  ;;  %vm8872_vm4 = vmmov %vm8817_vm0 }
 0x86a   : > { %4224 = vmatmul.msk.f32.gmra.mxu0 %vm8817_vm0, %v6552_v23  ;;  %v3120_v45 = vpop.permute.xlu0 %3119 }
 0x86b   : > { %4282 = vmatmul.msk.f32.gmra.mxu2 %vm8873_vm15, %v3110_v42  ;;  %4314 = vmatmul.msk.f32.gmra.mxu3 %vm8874_vm14, %v3110_v42  ;;  %vm8881_vm15 = vmmov %vm8817_vm0 }
 0x86c   : > { %vm8882_vm14 = vmmov %vm8817_vm0 }
 0x86e   : > { %4257 = vmatmul.msk.f32.gmra.mxu1 %vm8867_vm1, %v6532_v9  ;;  %vm8875_vm1 = vmmov %vm8817_vm0 }
 0x872   : > { %4225 = vmatmul.msk.f32.gmra.mxu0 %vm8868_vm12, %v6532_v9  ;;  %vm8876_vm12 = vmmov %vm8817_vm0  ;;  %v3112_v9 = vpop.permute.xlu2 %3111 }
 0x873   : > { %4315 = vmatmul.msk.f32.gmra.mxu3 %vm8878_vm8, %v3112_v9  ;;  %vm8888_vm8 = vmmov %vm8817_vm0 }
 0x876   : > { %4258 = vmatmul.msk.f32.gmra.mxu1 %vm8869_vm13, %v6578_v26  ;;  %vm8877_vm13 = vmmov %vm8817_vm0 }
 0x877   : > { %4283 = vmatmul.msk.f32.gmra.mxu2 %vm8877_vm13, %v3112_v9  ;;  %vm8887_vm13 = vmmov %vm8817_vm0 }
 0x87a   : > { %4226 = vmatmul.msk.f32.gmra.mxu0 %vm8872_vm4, %v6578_v26  ;;  %vm8880_vm4 = vmmov %vm8817_vm0  ;;  %v3118_v6 = vpop.permute.xlu2 %3117 }
 0x87b   : > { %4316 = vmatmul.msk.f32.gmra.mxu3 %vm8881_vm15, %v3114_v62  ;;  %vm8895_vm15 = vmmov %vm8817_vm0 }
 0x87e   : > { %4259 = vmatmul.msk.f32.gmra.mxu1 %vm8817_vm0, %v6599_v41 }
 0x87f   : > { %4284 = vmatmul.msk.f32.gmra.mxu2 %vm8817_vm0, %v3114_v62 }
 0x882   : > { %4227 = vmatmul.msk.f32.gmra.mxu0 %vm8875_vm1, %v6599_v41  ;;  %vm8883_vm1 = vmmov %vm8817_vm0 }
 0x886   : > { %4260 = vmatmul.msk.f32.gmra.mxu1 %vm8876_vm12, %v6570_v49  ;;  %vm8884_vm12 = vmmov %vm8817_vm0 }
 0x887   : > { %4285 = vmatmul.msk.f32.gmra.mxu2 %vm8883_vm1, %v3116_v51  ;;  %4317 = vmatmul.msk.f32.gmra.mxu3 %vm8884_vm12, %v3116_v51  ;;  %vm8899_vm1 = vmmov %vm8817_vm0 }
 0x888   : > { %vm8900_vm12 = vmmov %vm8817_vm0 }
 0x88a   : > { %4228 = vmatmul.msk.f32.gmra.mxu0 %vm8879_vm3, %v6570_v49  ;;  %vm8891_vm3 = vmmov %vm8817_vm0 }
 0x88e   : > { %4261 = vmatmul.msk.f32.gmra.mxu1 %vm8880_vm4, %v6621_v38  ;;  %vm8892_vm4 = vmmov %vm8817_vm0 }
 0x88f   : > { %4286 = vmatmul.msk.f32.gmra.mxu2 %vm8887_vm13, %v3118_v6  ;;  %4318 = vmatmul.msk.f32.gmra.mxu3 %vm8888_vm8, %v3118_v6 }
 0x892   : > { %4229 = vmatmul.msk.f32.gmra.mxu0 %vm8882_vm14, %v6621_v38 }
 0x893   : > { %v2679_v26 = vpop.f32.mrf.mxu1 }
 0x894   : > { %v2728_v23 = vmul.f32 0.35355338, %v2679_v26 }
 0x896   : > { %v7105_v61 = vsel %vm5765_vm9, -60000.0, %v2728_v23  ;;  %v8897_v23 = vld [vmem:[#allocation18_spill] sm:$0xff] }
 0x897   : > { %v2614_v41 = vpop.f32.mrf.mxu0  ;;  %4287 = vmatmul.msk.f32.gmra.mxu2 %vm8891_vm3, %v3120_v45  ;;  %4319 = vmatmul.msk.f32.gmra.mxu3 %vm8892_vm4, %v3120_v45  ;;  %vm8898_vm14 = vnez %v8897_v23  ;;  %vm8905_vm3 = vmmov %vm8817_vm0 }
 0x898   : > { %v2727_v49 = vmul.f32 0.35355338, %v2614_v41  ;;  %vm8906_vm4 = vmmov %vm8817_vm0 }
 0x89a   : > { %v7109_v52 = vsel %vm5758_vm7, -60000.0, %v2727_v49 }
 0x89b   : > { %v2791_v38 = vmax.f32 %v7109_v52, %v7105_v61  ;;  %v2682_v12 = vpop.f32.mrf.mxu1 }
 0x89c   : > { %v2730_v29 = vmul.f32 0.35355338, %v2682_v12  ;;  %v3124_v12 = vpop.permute.xlu2 %3123 }
 0x89d   : > { %2792 = vmax.xlane.f32.xlu1 %v2791_v38 }
 0x89e   : > { %v7117_v48 = vsel %vm5789_vm11, -60000.0, %v2730_v29 }
 0x89f   : > { %v2617_v30 = vpop.f32.mrf.mxu0  ;;  %4288 = vmatmul.msk.f32.gmra.mxu2 %vm8817_vm0, %v3122_v59  ;;  %4320 = vmatmul.msk.f32.gmra.mxu3 %vm8895_vm15, %v3122_v59 }
 0x8a0   : > { %v2729_v57 = vmul.f32 0.35355338, %v2617_v30  ;;  %v8901_v30 = vld [vmem:[#allocation21_spill] sm:$0xff] }
 0x8a1   : > { %vm8902_vm13 = vnez %v8901_v30 }
 0x8a2   : > { %v7121_v4 = vsel %vm5783_vm10, -60000.0, %v2729_v57 }
 0x8a3   : > { %v2794_v5 = vmax.f32 %v7121_v4, %v7117_v48  ;;  %v2685_v27 = vpop.f32.mrf.mxu1 }
 0x8a4   : > { %v2732_v39 = vmul.f32 0.35355338, %v2685_v27 }
 0x8a5   : > { %2795 = vmax.xlane.f32.xlu2 %v2794_v5  ;;  %v8903_v5 = vld [vmem:[#allocation22_spill] sm:$0xff] }
 0x8a6   : > { %v7129_v35 = vsel %vm5929_vm5, -60000.0, %v2732_v39  ;;  %vm8904_vm8 = vnez %v8903_v5 }
 0x8a7   : > { %v2620_v56 = vpop.f32.mrf.mxu0  ;;  %4289 = vmatmul.msk.f32.gmra.mxu2 %vm8899_vm1, %v3124_v12  ;;  %4321 = vmatmul.msk.f32.gmra.mxu3 %vm8900_vm12, %v3124_v12  ;;  %v3128_v12 = vpop.permute.xlu1 %3127  ;;  %vm8911_vm12 = vmmov %vm8899_vm1 }
 0x8a8   : > { %v2731_v53 = vmul.f32 0.35355338, %v2620_v56 }
 0x8aa   : > { %v7133_v18 = vsel %vm5933_vm6, -60000.0, %v2731_v53  ;;  %v3126_v53 = vpop.permute.xlu0 %3125 }
 0x8ab   : > { %v2797_v37 = vmax.f32 %v7133_v18, %v7129_v35  ;;  %v2688_v22 = vpop.f32.mrf.mxu1 }
 0x8ac   : > { %v2734_v16 = vmul.f32 0.35355338, %v2688_v22 }
 0x8ad   : > { %2798 = vmax.xlane.f32.xlu0 %v2797_v37 }
 0x8ae   : > { %v7141_v26 = vsel %vm5894_vm2, -60000.0, %v2734_v16  ;;  %v8907_v16 = vld [vmem:[#allocation24_spill] sm:$0xff] }
 0x8af   : > { %v2623_v42 = vpop.f32.mrf.mxu0  ;;  %4290 = vmatmul.msk.f32.gmra.mxu2 %vm8905_vm3, %v3126_v53  ;;  %4322 = vmatmul.msk.f32.gmra.mxu3 %vm8906_vm4, %v3126_v53  ;;  %vm8908_vm0 = vnez %v8907_v16 }
 0x8b0   : > { %v2733_v9 = vmul.f32 0.35355338, %v2623_v42  ;;  %v8909_v42 = vld [vmem:[#allocation23_spill] sm:$0xff] }
 0x8b1   : > { %vm8910_vm15 = vnez %v8909_v42 }
 0x8b2   : > { %v7145_v51 = vsel %vm8898_vm14, -60000.0, %v2733_v9  ;;  %v3132_v58 = vpop.permute.xlu0 %3131 }
 0x8b3   : > { %v2800_v41 = vmax.f32 %v7145_v51, %v7141_v26  ;;  %v2691_v49 = vpop.f32.mrf.mxu1 }
 0x8b4   : > { %v2736_v38 = vmul.f32 0.35355338, %v2691_v49 }
 0x8b5   : > { %2801 = vmax.xlane.f32.xlu1 %v2800_v41 }
 0x8b6   : > { %v7153_v57 = vsel %vm8902_vm13, -60000.0, %v2736_v38 }
 0x8b7   : > { %v2626_v29 = vpop.f32.mrf.mxu0  ;;  %4291 = vmatmul.msk.f32.gmra.mxu2 %vm8899_vm1, %v3128_v12  ;;  %4323 = vmatmul.msk.f32.gmra.mxu3 %vm8911_vm12, %v3128_v12  ;;  %vm8916_vm12 = vmmov %vm8899_vm1 }
 0x8b8   : > { %v2735_v6 = vmul.f32 0.35355338, %v2626_v29 }
 0x8ba   : > { %v7157_v27 = vsel %vm8904_vm8, -60000.0, %v2735_v6 }
 0x8bb   : > { %v2803_v39 = vmax.f32 %v7157_v27, %v7153_v57  ;;  %v2694_v45 = vpop.f32.mrf.mxu1 }
 0x8bc   : > { %v2738_v56 = vmul.f32 0.35355338, %v2694_v45 }
 0x8bd   : > { %2804 = vmax.xlane.f32.xlu2 %v2803_v39  ;;  %v8912_v39 = vld [vmem:[#allocation25_spill] sm:$0xff] }
 0x8be   : > { %v7165_v59 = vsel %vm8908_vm0, -60000.0, %v2738_v56  ;;  %vm8913_vm3 = vnez %v8912_v39  ;;  %v8914_v56 = vld [vmem:[#allocation26_spill] sm:$0xff] }
 0x8bf   : > { %v2629_v37 = vpop.f32.mrf.mxu0  ;;  %vm8915_vm4 = vnez %v8914_v56 }
 0x8c0   : > { %v2737_v22 = vmul.f32 0.35355338, %v2629_v37 }
 0x8c2   : > { %v7169_v9 = vsel %vm8910_vm15, -60000.0, %v2737_v22  ;;  %vm8920_vm15 = vnez %v8919_v0 }
 0x8c3   : > { %v2806_v41 = vmax.f32 %v7169_v9, %v7165_v59  ;;  %v2697_v49 = vpop.f32.mrf.mxu1 }
 0x8c4   : > { %v2740_v38 = vmul.f32 0.35355338, %v2697_v49  ;;  %v3130_v49 = vpop.permute.xlu2 %3129 }
 0x8c5   : > { %2807 = vmax.xlane.f32.xlu0 %v2806_v41  ;;  %4292 = vmatmul.msk.f32.gmra.mxu2 %vm8899_vm1, %v3130_v49 }
 0x8c6   : > { %v7177_v45 = vsel %vm8913_vm3, -60000.0, %v2740_v38  ;;  %4324 = vmatmul.msk.f32.gmra.mxu3 %vm8916_vm12, %v3130_v49  ;;  %vm8921_vm12 = vmmov %vm8899_vm1  ;;  %v8922_v49 = vld [vmem:[#allocation30_spill] sm:$0xff]  ;;  %v7221_v36 = vpop.f32.mrf.mxu3 }
 0x8c7   : > { %v2632_v29 = vpop.f32.mrf.mxu0 }
 0x8c8   : > { %v2739_v6 = vmul.f32 0.35355338, %v2632_v29  ;;  %v8917_v29 = vld [vmem:[#allocation28_spill] sm:$0xff] }
 0x8c9   : > { %vm8918_vm0 = vnez %v8917_v29 }
 0x8ca   : > { %v7181_v53 = vsel %vm8915_vm4, -60000.0, %v2739_v6  ;;  %v7219_v60 = vpop.f32.mrf.mxu2 }
 0x8cb   : > { %v2809_v37 = vmax.f32 %v7181_v53, %v7177_v45  ;;  %v2700_v22 = vpop.f32.mrf.mxu1 }
 0x8cc   : > { %v2742_v41 = vmul.f32 0.35355338, %v2700_v22 }
 0x8cd   : > { %2810 = vmax.xlane.f32.xlu1 %v2809_v37  ;;  %4293 = vmatmul.msk.f32.gmra.mxu2 %vm8899_vm1, %v3132_v58  ;;  %vm8927_vm1 = vnez %v8926_v50 }
 0x8ce   : > { %v7189_v38 = vsel %vm8918_vm0, -60000.0, %v2742_v41  ;;  %4325 = vmatmul.msk.f32.gmra.mxu3 %vm8921_vm12, %v3132_v58  ;;  %vm8923_vm0 = vnez %v8922_v49 }
 0x8cf   : > { %v2635_v32 = vpop.f32.mrf.mxu0 }
 0x8d0   : > { %v2741_v12 = vmul.f32 0.35355338, %v2635_v32 }
 0x8d2   : > { %v7193_v6 = vsel %vm8920_vm15, -60000.0, %v2741_v12  ;;  %vm8925_vm15 = vnez %v8924_v54  ;;  %v7233_v20 = vpop.f32.mrf.mxu2 }
 0x8d3   : > { %v2812_v17 = vmax.f32 %v7193_v6, %v7189_v38  ;;  %v2703_v37 = vpop.f32.mrf.mxu1 }
 0x8d4   : > { %v2744_v22 = vmul.f32 0.35355338, %v2703_v37 }
 0x8d5   : > { %2813 = vmax.xlane.f32.xlu2 %v2812_v17 }
 0x8d6   : > { %v7201_v41 = vsel %vm8923_vm0, -60000.0, %v2744_v22  ;;  %vm8933_vm0 = vnez %v8932_v1  ;;  %v7235_v44 = vpop.f32.mrf.mxu3 }
 0x8d7   : > { %v2638_v8 = vpop.f32.mrf.mxu0  ;;  %v3426_v43 = vmul.f32 0.35355338, %v7235_v44 }
 0x8d8   : > { %v2743_v32 = vmul.f32 0.35355338, %v2638_v8  ;;  %v8929_v8 = vld [vmem:[#allocation34_spill] sm:$0xff] }
 0x8d9   : > { %vm8930_vm12 = vnez %v8929_v8 }
 0x8da   : > { %v7205_v12 = vsel %vm8925_vm15, -60000.0, %v2743_v32  ;;  %vm8936_vm15 = vnez %v8935_v55 }
 0x8db   : > { %v2815_v28 = vmax.f32 %v7205_v12, %v7201_v41  ;;  %v2706_v17 = vpop.f32.mrf.mxu1 }
 0x8dc   : > { %v2746_v37 = vmul.f32 0.35355338, %v2706_v17 }
 0x8dd   : > { %2816 = vmax.xlane.f32.xlu0 %v2815_v28 }
 0x8de   : > { %v7211_v58 = vsel %vm8927_vm1, -60000.0, %v2746_v37  ;;  %vm8939_vm1 = vnez %v8938_v24  ;;  %v7247_v47 = vpop.f32.mrf.mxu2  ;;  %v7249_v21 = vpop.f32.mrf.mxu3  ;;  %v8953_v24 = vld [vmem:[#allocation49_spill] sm:$0xff] }
 0x8df   : > { %v2641_v46 = vpop.f32.mrf.mxu0  ;;  %8928 = vst [vmem:[#allocation14_spill] sm:$0xff] %v7211_v58 }
 0x8e0   : > { %v2745_v15 = vmul.f32 0.35355338, %v2641_v46 }
 0x8e2   : > { %v7215_v22 = vsel %vm8930_vm12, -60000.0, %v2745_v15 }
 0x8e3   : > { %8931 = vst [vmem:[#allocation13_spill] sm:$0xff] %v7215_v22  ;;  %v2818_v32 = vmax.f32 %v7215_v22, %v7211_v58  ;;  %v2709_v11 = vpop.f32.mrf.mxu1  ;;  %v8956_v22 = vld [vmem:[#allocation54_spill] sm:$0xff] }
 0x8e4   : > { %v2748_v28 = vmul.f32 0.35355338, %v2709_v11 }
 0x8e5   : > { %2819 = vmax.xlane.f32.xlu1 %v2818_v32 }
 0x8e6   : > { %v7225_v37 = vsel %vm8933_vm0, -60000.0, %v2748_v28  ;;  %vm8942_vm0 = vnez %v8941_v63 }
 0x8e7   : > { %v2644_v17 = vpop.f32.mrf.mxu0  ;;  %8934 = vst [vmem:[#allocation16_spill] sm:$0xff] %v7225_v37 }
 0x8e8   : > { %v2747_v46 = vmul.f32 0.35355338, %v2644_v17 }
 0x8ea   : > { %v7229_v15 = vsel %vm8936_vm15, -60000.0, %v2747_v46  ;;  %vm8945_vm15 = vnez %v8944_v3  ;;  %v8964_v3 = vld [vmem:[#allocation57_spill] sm:$0xff] }
 0x8eb   : > { %8937 = vst [vmem:[#allocation15_spill] sm:$0xff] %v7229_v15  ;;  %v2821_v13 = vmax.f32 %v7229_v15, %v7225_v37  ;;  %v2712_v19 = vpop.f32.mrf.mxu1  ;;  %v7263_v37 = vpop.f32.mrf.mxu3  ;;  %v8950_v15 = vld [vmem:[#allocation50_spill] sm:$0xff] }
 0x8ec   : > { %v2750_v11 = vmul.f32 0.35355338, %v2712_v19 }
 0x8ed   : > { %2822 = vmax.xlane.f32.xlu2 %v2821_v13 }
 0x8ee   : > { %v7239_v28 = vsel %vm8939_vm1, -60000.0, %v2750_v11  ;;  %vm8948_vm1 = vnez %v8947_v31 }
 0x8ef   : > { %v2647_v32 = vpop.f32.mrf.mxu0  ;;  %8940 = vst [vmem:[#allocation19_spill] sm:$0xff] %v7239_v28 }
 0x8f0   : > { %v2749_v17 = vmul.f32 0.35355338, %v2647_v32 }
 0x8f2   : > { %v7243_v46 = vsel %vm8942_vm0, -60000.0, %v2749_v17  ;;  %vm8951_vm0 = vnez %v8950_v15  ;;  %v8959_v15 = vld [vmem:[#allocation53_spill] sm:$0xff] }
 0x8f3   : > { %8943 = vst [vmem:[#allocation20_spill] sm:$0xff] %v7243_v46  ;;  %v2824_v14 = vmax.f32 %v7243_v46, %v7239_v28  ;;  %v2715_v2 = vpop.f32.mrf.mxu1  ;;  %v7261_v46 = vpop.f32.mrf.mxu2 }
 0x8f4   : > { %v2752_v13 = vmul.f32 0.35355338, %v2715_v2  ;;  %v7277_v58 = vpop.f32.mrf.mxu3 }
 0x8f5   : > { %2825 = vmax.xlane.f32.xlu0 %v2824_v14 }
 0x8f6   : > { %v7253_v11 = vsel %vm8945_vm15, -60000.0, %v2752_v13  ;;  %vm8954_vm15 = vnez %v8953_v24 }
 0x8f7   : > { %v2650_v19 = vpop.f32.mrf.mxu0  ;;  %8946 = vst [vmem:[#allocation17_spill] sm:$0xff] %v7253_v11 }
 0x8f8   : > { %v2751_v32 = vmul.f32 0.35355338, %v2650_v19 }
 0x8fa   : > { %v7257_v17 = vsel %vm8948_vm1, -60000.0, %v2751_v32  ;;  %vm8957_vm1 = vnez %v8956_v22 }
 0x8fb   : > { %8949 = vst [vmem:[#allocation18_spill] sm:$0xff] %v7257_v17  ;;  %v2827_v34 = vmax.f32 %v7257_v17, %v7253_v11  ;;  %v2718_v28 = vpop.f32.mrf.mxu1  ;;  %v7275_v63 = vpop.f32.mrf.mxu2 }
 0x8fc   : > { %v2754_v2 = vmul.f32 0.35355338, %v2718_v28 }
 0x8fd   : > { %2828 = vmax.xlane.f32.xlu1 %v2827_v34 }
 0x8fe   : > { %v7267_v13 = vsel %vm8951_vm0, -60000.0, %v2754_v2  ;;  %vm8960_vm0 = vnez %v8959_v15  ;;  %v8962_v15 = vld [vmem:[#allocation56_spill] sm:$0xff] }
 0x8ff   : > { %v2653_v14 = vpop.f32.mrf.mxu0  ;;  %8952 = vst [vmem:[#allocation21_spill] sm:$0xff] %v7267_v13 }
 0x900   : > { %v2753_v19 = vmul.f32 0.35355338, %v2653_v14 }
 0x902   : > { %v7271_v32 = vsel %vm8954_vm15, -60000.0, %v2753_v19 }
 0x903   : > { %8955 = vst [vmem:[#allocation22_spill] sm:$0xff] %v7271_v32  ;;  %v2830_v11 = vmax.f32 %v7271_v32, %v7267_v13  ;;  %v2721_v17 = vpop.f32.mrf.mxu1  ;;  %v7289_v24 = vpop.f32.mrf.mxu2 }
 0x904   : > { %v2756_v34 = vmul.f32 0.35355338, %v2721_v17  ;;  %v3433_v30 = vmul.f32 0.35355338, %v7289_v24 }
 0x905   : > { %2831 = vmax.xlane.f32.xlu2 %v2830_v11  ;;  %v7291_v11 = vpop.f32.mrf.mxu3 }
 0x906   : > { %v7281_v2 = vsel %vm8957_vm1, -60000.0, %v2756_v34  ;;  %vm8963_vm1 = vnez %v8962_v15 }
 0x907   : > { %v2656_v28 = vpop.f32.mrf.mxu0  ;;  %8958 = vst [vmem:[#allocation24_spill] sm:$0xff] %v7281_v2 }
 0x908   : > { %v2755_v14 = vmul.f32 0.35355338, %v2656_v28 }
 0x90a   : > { %v7285_v19 = vsel %vm8960_vm0, -60000.0, %v2755_v14  ;;  %vm8965_vm0 = vnez %v8964_v3 }
 0x90b   : > { %8961 = vst [vmem:[#allocation23_spill] sm:$0xff] %v7285_v19  ;;  %v2833_v13 = vmax.f32 %v7285_v19, %v7281_v2  ;;  %v2724_v32 = vpop.f32.mrf.mxu1 }
 0x90c   : > { %v2758_v49 = vmul.f32 0.35355338, %v2724_v32 }
 0x90d   : > { %2834 = vmax.xlane.f32.xlu0 %v2833_v13 }
 0x90e   : > { %v7297_v14 = vsel %vm8963_vm1, -60000.0, %v2758_v49 }
 0x90f   : > { %v2659_v17 = vpop.f32.mrf.mxu0 }
 0x910   : > { %v2757_v28 = vmul.f32 0.35355338, %v2659_v17  ;;  %v2793_v54 = vpop.xlane.xlu1 %2792  ;;  %v7305_v17 = vpop.f32.mrf.mxu2 }
 0x911   : > { %v2839_v34 = vsub.f32 %v7109_v52, %v2793_v54  ;;  %v2840_v22 = vsub.f32 %v7105_v61, %v2793_v54  ;;  %v7307_v54 = vpop.f32.mrf.mxu3  ;;  %v3435_v33 = vmul.f32 0.35355338, %v7305_v17 }
 0x912   : > { %v7301_v2 = vsel %vm8965_vm0, -60000.0, %v2757_v28 }
 0x913   : > { %v2836_v13 = vmax.f32 %v7301_v2, %v7297_v14  ;;  %v2871_v32 = vmul.f32 1.442695, %v2839_v34  ;;  %v2873_v19 = vmul.f32 1.442695, %v2840_v22 }
 0x915   : > { %4551 = vpow2.f32 %v2871_v32  ;;  %2837 = vmax.xlane.f32.xlu1 %v2836_v13 }
 0x916   : > { %4553 = vpow2.f32 %v2873_v19 }
 0x918   : > { %v2796_v52 = vpop.xlane.xlu2 %2795 }
 0x919   : > { %v2841_v61 = vsub.f32 %v7121_v4, %v2796_v52  ;;  %v2842_v49 = vsub.f32 %v7117_v48, %v2796_v52  ;;  %v7319_v4 = vpop.f32.mrf.mxu2  ;;  %v7321_v48 = vpop.f32.mrf.mxu3 }
 0x91a   : > { %v3438_v25 = vmul.f32 0.35355338, %v7321_v48 }
 0x91b   : > { %v7311_v15 = vpop.eup %4551  ;;  %v2875_v28 = vmul.f32 1.442695, %v2841_v61  ;;  %v2877_v3 = vmul.f32 1.442695, %v2842_v49 }
 0x91c   : > { %8966 = vst [vmem:[#allocation25_spill] sm:$0xff] %v7311_v15  ;;  %v7313_v31 = vpop.eup %4553 }
 0x91d   : > { %8967 = vst [vmem:[#allocation26_spill] sm:$0xff] %v7313_v31  ;;  %4555 = vpow2.f32 %v2875_v28  ;;  %v2935_v22 = vadd.f32 %v7313_v31, %v7311_v15 }
 0x91e   : > { %4557 = vpow2.f32 %v2877_v3 }
 0x91f   : > { %2936 = vadd.xlane.f32.xlu2 %v2935_v22 }
 0x920   : > { %v2799_v19 = vpop.xlane.xlu0 %2798 }
 0x921   : > { %v2843_v34 = vsub.f32 %v7133_v18, %v2799_v19  ;;  %v2844_v13 = vsub.f32 %v7129_v35, %v2799_v19  ;;  %v7333_v15 = vpop.f32.mrf.mxu2 }
 0x923   : > { %v7323_v32 = vpop.eup %4555  ;;  %v2879_v52 = vmul.f32 1.442695, %v2843_v34  ;;  %v2881_v61 = vmul.f32 1.442695, %v2844_v13  ;;  %v7337_v13 = vpop.f32.mrf.mxu3 }
 0x924   : > { %v7325_v49 = vpop.eup %4557 }
 0x925   : > { %8968 = vst [vmem:[#allocation28_spill] sm:$0xff] %v7325_v49  ;;  %4559 = vpow2.f32 %v2879_v52  ;;  %v2938_v3 = vadd.f32 %v7325_v49, %v7323_v32 }
 0x926   : > { %4561 = vpow2.f32 %v2881_v61 }
 0x927   : > { %2939 = vadd.xlane.f32.xlu0 %v2938_v3 }
 0x928   : > { %v2802_v28 = vpop.xlane.xlu1 %2801 }
 0x929   : > { %v2845_v18 = vsub.f32 %v7145_v51, %v2802_v28  ;;  %v2846_v35 = vsub.f32 %v7141_v26, %v2802_v28  ;;  %v7349_v49 = vpop.f32.mrf.mxu2 }
 0x92a   : > { %v3441_v5 = vmul.f32 0.35355338, %v7349_v49 }
 0x92b   : > { %v7331_v22 = vpop.eup %4559  ;;  %v2883_v19 = vmul.f32 1.442695, %v2845_v18  ;;  %v2885_v31 = vmul.f32 1.442695, %v2846_v35 }
 0x92c   : > { %v7335_v34 = vpop.eup %4561  ;;  %v7487_v49 = vsel %vm8930_vm12, -60000.0, %v3441_v5  ;;  %v8996_v5 = vld [vmem:[#allocation14_spill] sm:$0xff] }
 0x92d   : > { %8969 = vst [vmem:[#allocation27_spill] sm:$0xff] %v7335_v34  ;;  %4563 = vpow2.f32 %v2883_v19  ;;  %v2941_v52 = vadd.f32 %v7335_v34, %v7331_v22 }
 0x92e   : > { %4565 = vpow2.f32 %v2885_v31  ;;  %v7351_v31 = vpop.f32.mrf.mxu3 }
 0x92f   : > { %2942 = vadd.xlane.f32.xlu1 %v2941_v52 }
 0x930   : > { %v2805_v61 = vpop.xlane.xlu2 %2804 }
 0x931   : > { %v2847_v51 = vsub.f32 %v7157_v27, %v2805_v61  ;;  %v2848_v26 = vsub.f32 %v7153_v57, %v2805_v61 }
 0x933   : > { %v7343_v3 = vpop.eup %4563  ;;  %v2887_v28 = vmul.f32 1.442695, %v2847_v51  ;;  %v2889_v18 = vmul.f32 1.442695, %v2848_v26 }
 0x934   : > { %8970 = vst [vmem:[#allocation33_spill] sm:$0xff] %v7343_v3  ;;  %v7345_v35 = vpop.eup %4565 }
 0x935   : > { %8971 = vst [vmem:[#allocation34_spill] sm:$0xff] %v7345_v35  ;;  %4567 = vpow2.f32 %v2887_v28  ;;  %v2944_v19 = vadd.f32 %v7345_v35, %v7343_v3 }
 0x936   : > { %4569 = vpow2.f32 %v2889_v18  ;;  %v7361_v18 = vpop.f32.mrf.mxu2  ;;  %v7363_v35 = vpop.f32.mrf.mxu3 }
 0x937   : > { %2945 = vadd.xlane.f32.xlu2 %v2944_v19 }
 0x938   : > { %v2808_v52 = vpop.xlane.xlu0 %2807 }
 0x939   : > { %v2849_v27 = vsub.f32 %v7169_v9, %v2808_v52  ;;  %v2850_v57 = vsub.f32 %v7165_v59, %v2808_v52 }
 0x93b   : > { %v7355_v61 = vpop.eup %4567  ;;  %v2891_v51 = vmul.f32 1.442695, %v2849_v27  ;;  %v2893_v26 = vmul.f32 1.442695, %v2850_v57 }
 0x93c   : > { %8972 = vst [vmem:[#allocation38_spill] sm:$0xff] %v7355_v61  ;;  %v7357_v34 = vpop.eup %4569 }
 0x93d   : > { %8973 = vst [vmem:[#allocation37_spill] sm:$0xff] %v7357_v34  ;;  %4571 = vpow2.f32 %v2891_v51  ;;  %v2947_v28 = vadd.f32 %v7357_v34, %v7355_v61 }
 0x93e   : > { %4573 = vpow2.f32 %v2893_v26 }
 0x93f   : > { %2948 = vadd.xlane.f32.xlu0 %v2947_v28 }
 0x940   : > { %v2811_v19 = vpop.xlane.xlu1 %2810 }
 0x941   : > { %v2851_v9 = vsub.f32 %v7181_v53, %v2811_v19  ;;  %v2852_v59 = vsub.f32 %v7177_v45, %v2811_v19  ;;  %v7375_v53 = vpop.f32.mrf.mxu2  ;;  %v7377_v45 = vpop.f32.mrf.mxu3 }
 0x943   : > { %v7367_v52 = vpop.eup %4571  ;;  %v2895_v27 = vmul.f32 1.442695, %v2851_v9  ;;  %v2897_v57 = vmul.f32 1.442695, %v2852_v59 }
 0x944   : > { %v7369_v3 = vpop.eup %4573 }
 0x945   : > { %4575 = vpow2.f32 %v2895_v27  ;;  %v2950_v51 = vadd.f32 %v7369_v3, %v7367_v52  ;;  %v3423_v27 = vmul.f32 0.35355338, %v7219_v60 }
 0x946   : > { %4577 = vpow2.f32 %v2897_v57  ;;  %v3424_v57 = vmul.f32 0.35355338, %v7221_v36 }
 0x947   : > { %2951 = vadd.xlane.f32.xlu1 %v2950_v51  ;;  %v7389_v51 = vsel %vm5758_vm7, -60000.0, %v3423_v27  ;;  %vm8980_vm7 = vnez %v8919_v0 }
 0x948   : > { %v2814_v26 = vpop.xlane.xlu2 %2813 }
 0x949   : > { %v2853_v28 = vsub.f32 %v7193_v6, %v2814_v26  ;;  %v2854_v34 = vsub.f32 %v7189_v38, %v2814_v26  ;;  %v3346_v7 = vpop.f32.mrf.mxu2  ;;  %v3411_v27 = vpop.f32.mrf.mxu3 }
 0x94b   : > { %v7379_v19 = vpop.eup %4575  ;;  %v2899_v9 = vmul.f32 1.442695, %v2853_v28  ;;  %v2901_v59 = vmul.f32 1.442695, %v2854_v34  ;;  %v7393_v34 = vsel %vm5765_vm9, -60000.0, %v3424_v57  ;;  %vm8981_vm9 = vnez %v8917_v29 }
 0x94c   : > { %8974 = vst [vmem:[#allocation141_spill] sm:$0xff] %v7379_v19  ;;  %v7381_v61 = vpop.eup %4577  ;;  %v3430_v57 = vmul.f32 0.35355338, %v7263_v37  ;;  %v7483_v48 = vsel %vm8981_vm9, -60000.0, %v3438_v25 }
 0x94d   : > { %8975 = vst [vmem:[#allocation142_spill] sm:$0xff] %v7381_v61  ;;  %4579 = vpow2.f32 %v2899_v9  ;;  %v2953_v6 = vadd.f32 %v7381_v61, %v7379_v19 }
 0x94e   : > { %4581 = vpow2.f32 %v2901_v59  ;;  %v3487_v59 = vmax.f32 %v7389_v51, %v7393_v34 }
 0x94f   : > { %2954 = vadd.xlane.f32.xlu2 %v2953_v6  ;;  %v3425_v6 = vmul.f32 0.35355338, %v7233_v20  ;;  %v7415_v20 = vsel %vm5789_vm11, -60000.0, %v3426_v43  ;;  %vm8983_vm11 = vnez %v8909_v42  ;;  %v3447_v42 = vmul.f32 0.35355338, %v3346_v7 }
 0x950   : > { %v2817_v38 = vpop.xlane.xlu0 %2816  ;;  %v7495_v0 = vsel %vm8983_vm11, -60000.0, %v3433_v30 }
 0x951   : > { %v2855_v26 = vsub.f32 %v7205_v12, %v2817_v38  ;;  %v2856_v60 = vsub.f32 %v7201_v41, %v2817_v38  ;;  %v3429_v41 = vmul.f32 0.35355338, %v7261_v46  ;;  %v7411_v38 = vsel %vm5783_vm10, -60000.0, %v3425_v6  ;;  %v3349_v43 = vpop.f32.mrf.mxu2 }
 0x952   : > { %v7425_v46 = vsel %vm5894_vm2, -60000.0, %v3430_v57  ;;  %v3490_v40 = vmax.f32 %v7411_v38, %v7415_v20  ;;  %v3432_v6 = vmul.f32 0.35355338, %v7277_v58  ;;  %v3442_v57 = vmul.f32 0.35355338, %v7351_v31 }
 0x953   : > { %v7397_v36 = vpop.eup %4579  ;;  %v2903_v28 = vmul.f32 1.442695, %v2855_v26  ;;  %v2905_v9 = vmul.f32 1.442695, %v2856_v60  ;;  %v7421_v26 = vsel %vm8898_vm14, -60000.0, %v3429_v41  ;;  %vm8982_vm10 = vnez %v8926_v50 }
 0x954   : > { %8976 = vst [vmem:[#allocation143_spill] sm:$0xff] %v7397_v36  ;;  %v7399_v61 = vpop.eup %4581  ;;  %v3427_v60 = vmul.f32 0.35355338, %v7247_v47  ;;  %v3496_v62 = vmax.f32 %v7421_v26, %v7425_v46  ;;  %v7443_v47 = vsel %vm8915_vm4, -60000.0, %v3435_v33  ;;  %v7463_v56 = vsel %vm8902_vm13, -60000.0, %v3432_v6 }
 0x955   : > { %8977 = vst [vmem:[#allocation144_spill] sm:$0xff] %v7399_v61  ;;  %4583 = vpow2.f32 %v2903_v28  ;;  %v2956_v12 = vadd.f32 %v7399_v61, %v7397_v36  ;;  %v3436_v28 = vmul.f32 0.35355338, %v7307_v54  ;;  %v3437_v54 = vmul.f32 0.35355338, %v7319_v4 }
 0x956   : > { %4585 = vpow2.f32 %v2905_v9  ;;  %v3428_v9 = vmul.f32 0.35355338, %v7249_v21  ;;  %v7451_v21 = vsel %vm5933_vm6, -60000.0, %v3427_v60  ;;  %v7491_v24 = vsel %vm8982_vm10, -60000.0, %v3442_v57 }
 0x957   : > { %2957 = vadd.xlane.f32.xlu0 %v2956_v12  ;;  %3488 = vmax.xlane.f32.xlu2 %v3487_v59  ;;  %v3431_v59 = vmul.f32 0.35355338, %v7275_v63  ;;  %v3414_v12 = vpop.f32.mrf.mxu3  ;;  %v7447_v17 = vsel %vm8913_vm3, -60000.0, %v3436_v28  ;;  %v7479_v4 = vsel %vm8980_vm7, -60000.0, %v3437_v54  ;;  %vm8984_vm2 = vnez %v8907_v16 }
 0x958   : > { %v7455_v63 = vsel %vm5929_vm5, -60000.0, %v3428_v9  ;;  %v3505_v39 = vmax.f32 %v7443_v47, %v7447_v17  ;;  %v3514_v8 = vmax.f32 %v7487_v49, %v7491_v24  ;;  %v3443_v31 = vmul.f32 0.35355338, %v7361_v18 }
 0x959   : > { %v7459_v58 = vsel %vm8904_vm8, -60000.0, %v3431_v59  ;;  %v3493_v10 = vmax.f32 %v7451_v21, %v7455_v63  ;;  %v3352_v60 = vpop.f32.mrf.mxu2  ;;  %v3444_v50 = vmul.f32 0.35355338, %v7363_v35  ;;  %v3439_v9 = vmul.f32 0.35355338, %v7333_v15  ;;  %v2820_v35 = vpop.xlane.xlu1 %2819  ;;  %v8987_v59 = vld [vmem:[#allocation46_spill] sm:$0xff] }
 0x95a   : > { %v3499_v41 = vmax.f32 %v7459_v58, %v7463_v56  ;;  %v3440_v16 = vmul.f32 0.35355338, %v7337_v13  ;;  %vm8985_vm5 = vnez %v8935_v55  ;;  %vm8986_vm6 = vnez %v8932_v1  ;;  %v8991_v13 = vld [vmem:[#allocation29_spill] sm:$0xff]  ;;  %v8993_v55 = vld [vmem:[#allocation30_spill] sm:$0xff] }
 0x95b   : > { %v7417_v44 = vpop.eup %4583  ;;  %v7517_v18 = vsel %vm8986_vm6, -60000.0, %v3444_v50  ;;  %vm8988_vm14 = vnez %v8987_v59  ;;  %vm8992_vm8 = vnez %v8991_v13  ;;  %vm8994_vm3 = vnez %v8993_v55  ;;  %v9002_v55 = vld [vmem:[#allocation39_spill] sm:$0xff] }
 0x95c   : > { %8978 = vst [vmem:[#allocation145_spill] sm:$0xff] %v7417_v44  ;;  %v7427_v37 = vpop.eup %4585  ;;  %v7521_v7 = vsel %vm8988_vm14, -60000.0, %v3447_v42  ;;  %v7529_v6 = vsel %vm8992_vm8, -60000.0, %v3439_v9  ;;  %v2858_v57 = vsub.f32 %v8996_v5, %v2820_v35  ;;  %v3446_v42 = vmul.f32 0.35355338, %v7377_v45 }
 0x95d   : > { %8979 = vst [vmem:[#allocation146_spill] sm:$0xff] %v7427_v37  ;;  %v2959_v23 = vadd.f32 %v7427_v37, %v7417_v44  ;;  %vm9003_vm12 = vnez %v9002_v55 }
 0x95e   : > { %v2909_v9 = vmul.f32 1.442695, %v2858_v57  ;;  %v9007_v57 = vld [vmem:[#allocation16_spill] sm:$0xff] }
 0x95f   : > { %2960 = vadd.xlane.f32.xlu1 %v2959_v23  ;;  %3491 = vmax.xlane.f32.xlu0 %v3490_v40  ;;  %v3434_v40 = vmul.f32 0.35355338, %v7291_v11  ;;  %v3417_v33 = vpop.f32.mrf.mxu3  ;;  %v3508_v11 = vmax.f32 %v7479_v4, %v7483_v48  ;;  %v3448_v23 = vmul.f32 0.35355338, %v3411_v27  ;;  %v8989_v27 = vld [vmem:[#allocation45_spill] sm:$0xff] }
 0x960   : > { %3497 = vmax.xlane.f32.xlu2 %v3496_v62  ;;  %v7513_v62 = vsel %vm8985_vm5, -60000.0, %v3443_v31  ;;  %vm8990_vm13 = vnez %v8989_v27 }
 0x961   : > { %v7499_v29 = vsel %vm8984_vm2, -60000.0, %v3434_v40  ;;  %v7525_v15 = vsel %vm8990_vm13, -60000.0, %v3448_v23  ;;  %v3355_v1 = vpop.f32.mrf.mxu2  ;;  %v3517_v25 = vmax.f32 %v7513_v62, %v7517_v18  ;;  %v3449_v40 = vmul.f32 0.35355338, %v3349_v43  ;;  %v8998_v43 = vld [vmem:[#allocation50_spill] sm:$0xff] }
 0x962   : > { %v3502_v28 = vmax.f32 %v7495_v0, %v7499_v29  ;;  %v3523_v30 = vmax.f32 %v7521_v7, %v7525_v15  ;;  %v3453_v31 = vmul.f32 0.35355338, %v3355_v1  ;;  %vm8999_vm4 = vnez %v8998_v43 }
 0x963   : > { %v7547_v59 = vsel %vm8954_vm15, -60000.0, %v3449_v40 }
 0x964   : > { %v7555_v13 = vsel %vm8965_vm0, -60000.0, %v3453_v31  ;;  %v3452_v31 = vmul.f32 0.35355338, %v3417_v33 }
 0x967   : > { %3494 = vmax.xlane.f32.xlu1 %v3493_v10  ;;  %3500 = vmax.xlane.f32.xlu0 %v3499_v41  ;;  %v3420_v54 = vpop.f32.mrf.mxu3  ;;  %v8995_v10 = vld [vmem:[#allocation13_spill] sm:$0xff] }
 0x968   : > { %3506 = vmax.xlane.f32.xlu2 %v3505_v39  ;;  %v7533_v39 = vsel %vm8994_vm3, -60000.0, %v3440_v16  ;;  %v2857_v41 = vsub.f32 %v8995_v10, %v2820_v35  ;;  %v3454_v50 = vmul.f32 0.35355338, %v3420_v54  ;;  %v2823_v16 = vpop.xlane.xlu2 %2822  ;;  %v9004_v54 = vld [vmem:[#allocation40_spill] sm:$0xff]  ;;  %v9006_v10 = vld [vmem:[#allocation15_spill] sm:$0xff]  ;;  %v9012_v35 = vld [vmem:[#allocation54_spill] sm:$0xff] }
 0x969   : > { %vm9005_vm15 = vnez %v9004_v54  ;;  %v7599_v54 = vpop.xlane.xlu0 %2825 }
 0x96a   : > { %v2907_v23 = vmul.f32 1.442695, %v2857_v41  ;;  %v7559_v45 = vsel %vm8963_vm1, -60000.0, %v3454_v50  ;;  %v2859_v41 = vsub.f32 %v9006_v10, %v2823_v16  ;;  %vm9013_vm1 = vnez %v9012_v35 }
 0x96b   : > { %v3532_v40 = vmax.f32 %v7555_v13, %v7559_v45  ;;  %v7587_v43 = vsel %vm9013_vm1, -60000.0, %v3452_v31 }
 0x96c   : > { %4587 = vpow2.f32 %v2907_v23  ;;  %v2911_v50 = vmul.f32 1.442695, %v2859_v41 }
 0x96d   : > { %4589 = vpow2.f32 %v2909_v9  ;;  %v9010_v9 = vld [vmem:[#allocation53_spill] sm:$0xff] }
 0x96e   : > { %vm9011_vm0 = vnez %v9010_v9  ;;  %4591 = vpow2.f32 %v2911_v50 }
 0x96f   : > { %3503 = vmax.xlane.f32.xlu1 %v3502_v28  ;;  %3509 = vmax.xlane.f32.xlu0 %v3508_v11  ;;  %v3450_v11 = vmul.f32 0.35355338, %v3414_v12  ;;  %v3445_v28 = vmul.f32 0.35355338, %v7375_v53 }
 0x970   : > { %3515 = vmax.xlane.f32.xlu2 %v3514_v8  ;;  %v3511_v8 = vmax.f32 %v7529_v6, %v7533_v39  ;;  %v7603_v41 = vpop.xlane.xlu1 %2828 }
 0x971   : > { %v7551_v12 = vsel %vm8999_vm4, -60000.0, %v3450_v11  ;;  %v7563_v1 = vsel %vm9003_vm12, -60000.0, %v3445_v28 }
 0x972   : > { %v3526_v5 = vmax.f32 %v7547_v59, %v7551_v12 }
 0x977   : > { %3512 = vmax.xlane.f32.xlu1 %v3511_v8  ;;  %3518 = vmax.xlane.f32.xlu0 %v3517_v25  ;;  %v7567_v25 = vsel %vm9005_vm15, -60000.0, %v3446_v42  ;;  %v3451_v8 = vmul.f32 0.35355338, %v3352_v60  ;;  %v7577_v42 = vpop.eup %4587 }
 0x978   : > { %3524 = vmax.xlane.f32.xlu2 %v3523_v30  ;;  %v2860_v30 = vsub.f32 %v9007_v57, %v2823_v16  ;;  %v3520_v11 = vmax.f32 %v7563_v1, %v7567_v25  ;;  %9008 = vst [vmem:[#allocation46_spill] sm:$0xff] %v7577_v42  ;;  %v7579_v23 = vpop.eup %4589  ;;  %v7601_v10 = vpop.xlane.xlu2 %2831 }
 0x979   : > { %9009 = vst [vmem:[#allocation45_spill] sm:$0xff] %v7579_v23  ;;  %v7583_v16 = vsel %vm9011_vm0, -60000.0, %v3451_v8  ;;  %v2962_v33 = vadd.f32 %v7579_v23, %v7577_v42  ;;  %v7593_v27 = vpop.eup %4591 }
 0x97a   : > { %v2913_v28 = vmul.f32 1.442695, %v2860_v30  ;;  %v3529_v60 = vmax.f32 %v7583_v16, %v7587_v43  ;;  %9014 = vst [vmem:[#allocation29_spill] sm:$0xff] %v7593_v27 }
 0x97c   : > { %4593 = vpow2.f32 %v2913_v28 }
 0x97f   : > { %3521 = vmax.xlane.f32.xlu1 %v3520_v11  ;;  %3527 = vmax.xlane.f32.xlu0 %v3526_v5 }
 0x980   : > { %3533 = vmax.xlane.f32.xlu2 %v3532_v40  ;;  %v7605_v5 = vpop.xlane.xlu0 %2834 }
 0x982   : > { %v7595_v53 = vpop.eup %4593 }
 0x983   : > { %9015 = vst [vmem:[#allocation30_spill] sm:$0xff] %v7595_v53  ;;  %v2965_v55 = vadd.f32 %v7595_v53, %v7593_v27 }
 0x987   : > { %3530 = vmax.xlane.f32.xlu1 %v3529_v60  ;;  %2963 = vadd.xlane.f32.xlu0 %v2962_v33 }
 0x988   : > { %v7609_v30 = vpop.xlane.xlu1 %2837 }
 0x98f   : > { %2966 = vadd.xlane.f32.xlu1 %v2965_v55 }
 0x992   : > { %v7607_v57 = vpop.xlane.xlu2 %2936 }
 0x99a   : > { %v7611_v40 = vpop.xlane.xlu0 %2939 }
 0x9a2   : > { %v7615_v8 = vpop.xlane.xlu1 %2942 }
 0x9aa   : > { %v7613_v11 = vpop.xlane.xlu2 %2945 }
 0x9b2   : > { %v7617_v31 = vpop.xlane.xlu0 %2948 }
 0x9ba   : > { %v7621_v28 = vpop.xlane.xlu1 %2951 }
 0x9c2   : > { %v7619_v50 = vpop.xlane.xlu2 %2954 }
 0x9ca   : > { %v7623_v9 = vpop.xlane.xlu0 %2957  ;;  %v3489_v35 = vpop.xlane.xlu2 %3488 }
 0x9cb   : > { %v3535_v60 = vsub.f32 %v7389_v51, %v3489_v35  ;;  %v3536_v33 = vsub.f32 %v7393_v34, %v3489_v35 }
 0x9cd   : > { %v3567_v55 = vmul.f32 1.442695, %v3535_v60  ;;  %v3569_v37 = vmul.f32 1.442695, %v3536_v33 }
 0x9cf   : > { %4595 = vpow2.f32 %v3567_v55 }
 0x9d0   : > { %4597 = vpow2.f32 %v3569_v37 }
 0x9d2   : > { %v3492_v53 = vpop.xlane.xlu0 %3491  ;;  %v7627_v27 = vpop.xlane.xlu1 %2960 }
 0x9d3   : > { %v3537_v44 = vsub.f32 %v7411_v38, %v3492_v53  ;;  %v3538_v23 = vsub.f32 %v7415_v20, %v3492_v53  ;;  %v3498_v42 = vpop.xlane.xlu2 %3497 }
 0x9d4   : > { %v3541_v61 = vsub.f32 %v7421_v26, %v3498_v42  ;;  %v3542_v36 = vsub.f32 %v7425_v46, %v3498_v42 }
 0x9d5   : > { %v7633_v19 = vpop.eup %4595  ;;  %v3571_v51 = vmul.f32 1.442695, %v3537_v44  ;;  %v3573_v34 = vmul.f32 1.442695, %v3538_v23 }
 0x9d6   : > { %v7635_v35 = vpop.eup %4597  ;;  %v3579_v60 = vmul.f32 1.442695, %v3541_v61  ;;  %v3581_v37 = vmul.f32 1.442695, %v3542_v36 }
 0x9d7   : > { %4599 = vpow2.f32 %v3571_v51  ;;  %v3631_v33 = vadd.f32 %v7635_v35, %v7633_v19 }
 0x9d8   : > { %4601 = vpow2.f32 %v3573_v34 }
 0x9d9   : > { %4603 = vpow2.f32 %v3579_v60  ;;  %3632 = vadd.xlane.f32.xlu2 %v3631_v33 }
 0x9da   : > { %4605 = vpow2.f32 %v3581_v37  ;;  %v3501_v38 = vpop.xlane.xlu0 %3500  ;;  %v3495_v20 = vpop.xlane.xlu1 %3494 }
 0x9db   : > { %v3543_v26 = vsub.f32 %v7459_v58, %v3501_v38  ;;  %v3544_v46 = vsub.f32 %v7463_v56, %v3501_v38  ;;  %v3507_v44 = vpop.xlane.xlu2 %3506  ;;  %v3539_v42 = vsub.f32 %v7451_v21, %v3495_v20  ;;  %v3540_v23 = vsub.f32 %v7455_v63, %v3495_v20 }
 0x9dc   : > { %v3547_v61 = vsub.f32 %v7443_v47, %v3507_v44  ;;  %v3548_v36 = vsub.f32 %v7447_v17, %v3507_v44 }
 0x9dd   : > { %v7645_v53 = vpop.eup %4599  ;;  %v3583_v55 = vmul.f32 1.442695, %v3543_v26  ;;  %v3585_v51 = vmul.f32 1.442695, %v3544_v46  ;;  %v3575_v56 = vmul.f32 1.442695, %v3539_v42 }
 0x9de   : > { %v7647_v34 = vpop.eup %4601  ;;  %v3591_v60 = vmul.f32 1.442695, %v3547_v61  ;;  %v3593_v37 = vmul.f32 1.442695, %v3548_v36  ;;  %v3577_v17 = vmul.f32 1.442695, %v3540_v23 }
 0x9df   : > { %v7649_v58 = vpop.eup %4603  ;;  %4607 = vpow2.f32 %v3583_v55  ;;  %v3634_v21 = vadd.f32 %v7647_v34, %v7645_v53 }
 0x9e0   : > { %v7653_v47 = vpop.eup %4605  ;;  %4609 = vpow2.f32 %v3585_v51 }
 0x9e1   : > { %4611 = vpow2.f32 %v3591_v60  ;;  %v3640_v63 = vadd.f32 %v7653_v47, %v7649_v58  ;;  %3635 = vadd.xlane.f32.xlu0 %v3634_v21 }
 0x9e2   : > { %4613 = vpow2.f32 %v3593_v37  ;;  %v3510_v33 = vpop.xlane.xlu0 %3509  ;;  %v3504_v38 = vpop.xlane.xlu1 %3503 }
 0x9e3   : > { %4615 = vpow2.f32 %v3575_v56  ;;  %3641 = vadd.xlane.f32.xlu2 %v3640_v63  ;;  %v3549_v20 = vsub.f32 %v7479_v4, %v3510_v33  ;;  %v3550_v26 = vsub.f32 %v7483_v48, %v3510_v33  ;;  %v3516_v46 = vpop.xlane.xlu2 %3515  ;;  %v3545_v44 = vsub.f32 %v7495_v0, %v3504_v38 }
 0x9e4   : > { %4617 = vpow2.f32 %v3577_v17  ;;  %v3553_v42 = vsub.f32 %v7487_v49, %v3516_v46  ;;  %v3554_v61 = vsub.f32 %v7491_v24, %v3516_v46  ;;  %v3546_v36 = vsub.f32 %v7499_v29, %v3504_v38 }
 0x9e5   : > { %v7663_v23 = vpop.eup %4607  ;;  %v3595_v55 = vmul.f32 1.442695, %v3549_v20  ;;  %v3597_v51 = vmul.f32 1.442695, %v3550_v26  ;;  %v3587_v48 = vmul.f32 1.442695, %v3545_v44 }
 0x9e6   : > { %9016 = vst [vmem:[#allocation13_spill] sm:$0xff] %v7663_v23  ;;  %v7665_v60 = vpop.eup %4609  ;;  %v3603_v37 = vmul.f32 1.442695, %v3553_v42  ;;  %v3605_v4 = vmul.f32 1.442695, %v3554_v61  ;;  %v9023_v42 = vld [vmem:[#allocation18_spill] sm:$0xff] }
 0x9e7   : > { %9017 = vst [vmem:[#allocation14_spill] sm:$0xff] %v7665_v60  ;;  %v7667_v56 = vpop.eup %4611  ;;  %4619 = vpow2.f32 %v3595_v55  ;;  %v3643_v0 = vadd.f32 %v7665_v60, %v7663_v23  ;;  %v3589_v24 = vmul.f32 1.442695, %v3546_v36  ;;  %v2863_v61 = vsub.f32 %v9023_v42, %v7603_v41 }
 0x9e8   : > { %9018 = vst [vmem:[#allocation49_spill] sm:$0xff] %v7667_v56  ;;  %v7671_v49 = vpop.eup %4613  ;;  %4621 = vpow2.f32 %v3597_v51 }
 0x9e9   : > { %9019 = vst [vmem:[#allocation50_spill] sm:$0xff] %v7671_v49  ;;  %v7673_v29 = vpop.eup %4615  ;;  %4623 = vpow2.f32 %v3603_v37  ;;  %v3649_v21 = vadd.f32 %v7671_v49, %v7667_v56  ;;  %3644 = vadd.xlane.f32.xlu0 %v3643_v0  ;;  %v9109_v49 = vld [vmem:[#allocation80_spill] sm:$0xff]  ;;  %v9110_v56 = vld [vmem:[#allocation81_spill] sm:$0xff] }
 0x9ea   : > { %9020 = vst [vmem:[#allocation57_spill] sm:$0xff] %v7673_v29  ;;  %v7677_v17 = vpop.eup %4617  ;;  %4625 = vpow2.f32 %v3605_v4  ;;  %v3519_v63 = vpop.xlane.xlu0 %3518  ;;  %v9025_v4 = vld [vmem:[#allocation17_spill] sm:$0xff] }
 0x9eb   : > { %9021 = vst [vmem:[#allocation56_spill] sm:$0xff] %v7677_v17  ;;  %v3513_v33 = vpop.xlane.xlu1 %3512  ;;  %4627 = vpow2.f32 %v3587_v48  ;;  %3650 = vadd.xlane.f32.xlu2 %v3649_v21  ;;  %v3637_v38 = vadd.f32 %v7677_v17, %v7673_v29  ;;  %v3555_v20 = vsub.f32 %v7513_v62, %v3519_v63  ;;  %v3556_v26 = vsub.f32 %v7517_v18, %v3519_v63  ;;  %v9101_v17 = vld [vmem:[#allocation124_spill] sm:$0xff] }
 0x9ec   : > { %4629 = vpow2.f32 %v3589_v24  ;;  %v3551_v46 = vsub.f32 %v7529_v6, %v3513_v33  ;;  %v3552_v51 = vsub.f32 %v7533_v39, %v3513_v33  ;;  %v2864_v62 = vsub.f32 %v9025_v4, %v7603_v41  ;;  %v9029_v39 = vld [vmem:[#allocation20_spill] sm:$0xff] }
 0x9ed   : > { %v7684_v44 = vpop.eup %4619  ;;  %3638 = vadd.xlane.f32.xlu1 %v3637_v38  ;;  %v3607_v36 = vmul.f32 1.442695, %v3555_v20  ;;  %v3609_v55 = vmul.f32 1.442695, %v3556_v26  ;;  %v2861_v63 = vsub.f32 %v9029_v39, %v7599_v54  ;;  %v2919_v33 = vmul.f32 1.442695, %v2863_v61 }
 0x9ee   : > { %9022 = vst [vmem:[#allocation39_spill] sm:$0xff] %v7684_v44  ;;  %v7689_v37 = vpop.eup %4621  ;;  %v3599_v18 = vmul.f32 1.442695, %v3551_v46  ;;  %v3601_v24 = vmul.f32 1.442695, %v3552_v51  ;;  %v9031_v20 = vld [vmem:[#allocation19_spill] sm:$0xff] }
 0x9ef   : > { %9024 = vst [vmem:[#allocation40_spill] sm:$0xff] %v7689_v37  ;;  %v7693_v48 = vpop.eup %4623  ;;  %4631 = vpow2.f32 %v3607_v36  ;;  %v3652_v6 = vadd.f32 %v7689_v37, %v7684_v44  ;;  %v2862_v26 = vsub.f32 %v9031_v20, %v7599_v54  ;;  %v2921_v46 = vmul.f32 1.442695, %v2864_v62  ;;  %v9099_v37 = vld [vmem:[#allocation85_spill] sm:$0xff]  ;;  %v9100_v44 = vld [vmem:[#allocation86_spill] sm:$0xff] }
 0x9f0   : > { %9026 = vst [vmem:[#allocation15_spill] sm:$0xff] %v7693_v48  ;;  %v7697_v0 = vpop.eup %4625  ;;  %4633 = vpow2.f32 %v3609_v55  ;;  %v2915_v4 = vmul.f32 1.442695, %v2861_v63 }
 0x9f1   : > { %9027 = vst [vmem:[#allocation16_spill] sm:$0xff] %v7697_v0  ;;  %v7699_v21 = vpop.eup %4627  ;;  %v3658_v41 = vadd.f32 %v7697_v0, %v7693_v48  ;;  %3653 = vadd.xlane.f32.xlu0 %v3652_v6  ;;  %4635 = vpow2.f32 %v3599_v18  ;;  %v2917_v39 = vmul.f32 1.442695, %v2862_v26  ;;  %v3525_v18 = vpop.xlane.xlu2 %3524  ;;  %v9092_v0 = vld [vmem:[#allocation69_spill] sm:$0xff] }
 0x9f2   : > { %9028 = vst [vmem:[#allocation53_spill] sm:$0xff] %v7699_v21  ;;  %v7705_v38 = vpop.eup %4629  ;;  %v3528_v42 = vpop.xlane.xlu0 %3527  ;;  %4637 = vpow2.f32 %v3601_v24  ;;  %v9034_v24 = vld [vmem:[#allocation22_spill] sm:$0xff]  ;;  %v9093_v48 = vld [vmem:[#allocation109_spill] sm:$0xff] }
 0x9f3   : > { %9030 = vst [vmem:[#allocation54_spill] sm:$0xff] %v7705_v38  ;;  %v3522_v36 = vpop.xlane.xlu1 %3521  ;;  %3659 = vadd.xlane.f32.xlu2 %v3658_v41  ;;  %v3646_v55 = vadd.f32 %v7705_v38, %v7699_v21  ;;  %4639 = vpow2.f32 %v2919_v33  ;;  %v3561_v6 = vsub.f32 %v7547_v59, %v3528_v42  ;;  %v3562_v41 = vsub.f32 %v7551_v12, %v3528_v42  ;;  %v9035_v33 = vld [vmem:[#allocation21_spill] sm:$0xff] }
 0x9f4   : > { %v3557_v61 = vsub.f32 %v7563_v1, %v3522_v36  ;;  %v3558_v54 = vsub.f32 %v7567_v25, %v3522_v36  ;;  %4641 = vpow2.f32 %v2921_v46  ;;  %v2865_v20 = vsub.f32 %v9034_v24, %v7601_v10  ;;  %v9041_v24 = vld [vmem:[#allocation23_spill] sm:$0xff] }
 0x9f5   : > { %v7712_v51 = vpop.eup %4631  ;;  %3647 = vadd.xlane.f32.xlu1 %v3646_v55  ;;  %v2866_v55 = vsub.f32 %v9035_v33, %v7601_v10  ;;  %4643 = vpow2.f32 %v2915_v4  ;;  %v3559_v25 = vsub.f32 %v7521_v7, %v3525_v18  ;;  %v3619_v26 = vmul.f32 1.442695, %v3561_v6 }
 0x9f6   : > { %9032 = vst [vmem:[#allocation18_spill] sm:$0xff] %v7712_v51  ;;  %v7716_v62 = vpop.eup %4633  ;;  %v3611_v1 = vmul.f32 1.442695, %v3557_v61  ;;  %v3613_v59 = vmul.f32 1.442695, %v3558_v54  ;;  %4645 = vpow2.f32 %v2917_v39  ;;  %v3560_v12 = vsub.f32 %v7525_v15, %v3525_v18 }
 0x9f7   : > { %9033 = vst [vmem:[#allocation17_spill] sm:$0xff] %v7716_v62  ;;  %v3661_v63 = vadd.f32 %v7716_v62, %v7712_v51  ;;  %v7725_v38 = vpop.eup %4635  ;;  %v3621_v42 = vmul.f32 1.442695, %v3562_v41  ;;  %v2923_v61 = vmul.f32 1.442695, %v2865_v20  ;;  %v2869_v7 = vsub.f32 %v7301_v2, %v7609_v30  ;;  %v9043_v2 = vld [vmem:[#allocation24_spill] sm:$0xff] }
 0x9f8   : > { %9036 = vst [vmem:[#allocation20_spill] sm:$0xff] %v7725_v38  ;;  %v7728_v46 = vpop.eup %4637  ;;  %4647 = vpow2.f32 %v3611_v1  ;;  %v2925_v4 = vmul.f32 1.442695, %v2866_v55  ;;  %v3615_v6 = vmul.f32 1.442695, %v3559_v25  ;;  %v2870_v15 = vsub.f32 %v7297_v14, %v7609_v30  ;;  %v9085_v62 = vld [vmem:[#allocation70_spill] sm:$0xff] }
 0x9f9   : > { %3662 = vadd.xlane.f32.xlu0 %v3661_v63  ;;  %9037 = vst [vmem:[#allocation19_spill] sm:$0xff] %v7728_v46  ;;  %v7731_v36 = vpop.eup %4639  ;;  %v3655_v10 = vadd.f32 %v7728_v46, %v7725_v38  ;;  %4649 = vpow2.f32 %v3613_v59  ;;  %v3617_v39 = vmul.f32 1.442695, %v3560_v12  ;;  %v2867_v20 = vsub.f32 %v9041_v24, %v7605_v5  ;;  %v9082_v46 = vld [vmem:[#allocation74_spill] sm:$0xff]  ;;  %v9083_v38 = vld [vmem:[#allocation116_spill] sm:$0xff] }
 0x9fa   : > { %9038 = vst [vmem:[#allocation22_spill] sm:$0xff] %v7731_v36  ;;  %v7735_v54 = vpop.eup %4641  ;;  %4651 = vpow2.f32 %v3619_v26  ;;  %v2868_v33 = vsub.f32 %v9043_v2, %v7605_v5  ;;  %v2931_v14 = vmul.f32 1.442695, %v2869_v7  ;;  %v2933_v25 = vmul.f32 1.442695, %v2870_v15 }
 0x9fb   : > { %9039 = vst [vmem:[#allocation21_spill] sm:$0xff] %v7735_v54  ;;  %4653 = vpow2.f32 %v3621_v42  ;;  %v3531_v18 = vpop.xlane.xlu1 %3530  ;;  %v7741_v41 = vpop.eup %4643  ;;  %v2971_v1 = vadd.f32 %v7735_v54, %v7731_v36  ;;  %v2927_v42 = vmul.f32 1.442695, %v2867_v20  ;;  %v9075_v54 = vld [vmem:[#allocation59_spill] sm:$0xff] }
 0x9fc   : > { %9040 = vst [vmem:[#allocation147_spill] sm:$0xff] %v7741_v41  ;;  %4655 = vpow2.f32 %v2923_v61  ;;  %v7747_v63 = vpop.eup %4645  ;;  %v3563_v30 = vsub.f32 %v7583_v16, %v3531_v18  ;;  %v3564_v26 = vsub.f32 %v7587_v43, %v3531_v18  ;;  %v3534_v43 = vpop.xlane.xlu2 %3533 }
 0x9fd   : > { %3656 = vadd.xlane.f32.xlu1 %v3655_v10  ;;  %9042 = vst [vmem:[#allocation23_spill] sm:$0xff] %v7747_v63  ;;  %4657 = vpow2.f32 %v2925_v4  ;;  %v2968_v61 = vadd.f32 %v7747_v63, %v7741_v41  ;;  %v2929_v4 = vmul.f32 1.442695, %v2868_v33  ;;  %v3565_v20 = vsub.f32 %v7555_v13, %v3534_v43  ;;  %v9078_v63 = vld [vmem:[#allocation65_spill] sm:$0xff] }
 0x9fe   : > { %v7751_v55 = vpop.eup %4647  ;;  %4659 = vpow2.f32 %v3615_v6  ;;  %v3623_v7 = vmul.f32 1.442695, %v3563_v30  ;;  %v3625_v15 = vmul.f32 1.442695, %v3564_v26 }
 0x9ff   : > { %9044 = vst [vmem:[#allocation24_spill] sm:$0xff] %v7751_v55  ;;  %v7754_v59 = vpop.eup %4649  ;;  %4661 = vpow2.f32 %v3617_v39  ;;  %v3627_v26 = vmul.f32 1.442695, %v3565_v20  ;;  %v9060_v20 = vld [vmem:[#allocation93_spill] sm:$0xff] }
 0xa00   : > { %9045 = vst [vmem:[#allocation148_spill] sm:$0xff] %v7754_v59  ;;  %v7757_v12 = vpop.eup %4651  ;;  %v3664_v5 = vadd.f32 %v7754_v59, %v7751_v55  ;;  %4663 = vpow2.f32 %v2931_v14  ;;  %v9080_v59 = vld [vmem:[#allocation72_spill] sm:$0xff]  ;;  %v9081_v55 = vld [vmem:[#allocation73_spill] sm:$0xff] }
 0xa01   : > { %2972 = vadd.xlane.f32.xlu0 %v2971_v1  ;;  %9046 = vst [vmem:[#allocation149_spill] sm:$0xff] %v7757_v12  ;;  %v7763_v10 = vpop.eup %4653  ;;  %4665 = vpow2.f32 %v2933_v25  ;;  %v3566_v1 = vsub.f32 %v7559_v45, %v3534_v43 }
 0xa02   : > { %9047 = vst [vmem:[#allocation150_spill] sm:$0xff] %v7763_v10  ;;  %v7765_v16 = vpop.eup %4655  ;;  %3665 = vadd.xlane.f32.xlu2 %v3664_v5  ;;  %4667 = vpow2.f32 %v2927_v42  ;;  %v3670_v18 = vadd.f32 %v7763_v10, %v7757_v12  ;;  %v9074_v12 = vld [vmem:[#allocation105_spill] sm:$0xff] }
 0xa03   : > { %9048 = vst [vmem:[#allocation151_spill] sm:$0xff] %v7765_v16  ;;  %v7767_v6 = vpop.eup %4657  ;;  %4669 = vpow2.f32 %v2929_v4  ;;  %v3629_v42 = vmul.f32 1.442695, %v3566_v1  ;;  %v9061_v1 = vld [vmem:[#allocation88_spill] sm:$0xff] }
 0xa04   : > { %9049 = vst [vmem:[#allocation152_spill] sm:$0xff] %v7767_v6  ;;  %v7769_v39 = vpop.eup %4659  ;;  %4671 = vpow2.f32 %v3623_v7  ;;  %v2974_v14 = vadd.f32 %v7767_v6, %v7765_v16 }
 0xa05   : > { %2969 = vadd.xlane.f32.xlu1 %v2968_v61  ;;  %9050 = vst [vmem:[#allocation153_spill] sm:$0xff] %v7769_v39  ;;  %v7773_v24 = vpop.eup %4661  ;;  %4673 = vpow2.f32 %v3625_v15 }
 0xa06   : > { %9051 = vst [vmem:[#allocation154_spill] sm:$0xff] %v7773_v24  ;;  %v7777_v2 = vpop.eup %4663  ;;  %v3667_v33 = vadd.f32 %v7773_v24, %v7769_v39  ;;  %4675 = vpow2.f32 %v3627_v26  ;;  %v9071_v39 = vld [vmem:[#allocation61_spill] sm:$0xff] }
 0xa07   : > { %9052 = vst [vmem:[#allocation155_spill] sm:$0xff] %v7777_v2  ;;  %v7783_v30 = vpop.eup %4665  ;;  %4677 = vpow2.f32 %v3629_v42 }
 0xa08   : > { %9053 = vst [vmem:[#allocation156_spill] sm:$0xff] %v7783_v30  ;;  %v7785_v25 = vpop.eup %4667  ;;  %v2980_v61 = vadd.f32 %v7783_v30, %v7777_v2  ;;  %4679 = vrcp.f32 %v9060_v20  ;;  %v9066_v2 = vld [vmem:[#allocation62_spill] sm:$0xff] }
 0xa09   : > { %3671 = vadd.xlane.f32.xlu0 %v3670_v18  ;;  %9054 = vst [vmem:[#allocation157_spill] sm:$0xff] %v7785_v25  ;;  %v7787_v13 = vpop.eup %4669  ;;  %4681 = vrcp.f32 %v9061_v1  ;;  %v9065_v1 = vld [vmem:[#allocation99_spill] sm:$0xff] }
 0xa0a   : > { %2975 = vadd.xlane.f32.xlu2 %v2974_v14  ;;  %9055 = vst [vmem:[#allocation158_spill] sm:$0xff] %v7787_v13  ;;  %v7789_v45 = vpop.eup %4671  ;;  %v2977_v4 = vadd.f32 %v7787_v13, %v7785_v25  ;;  %v9062_v14 = vld [vmem:[#allocation96_spill] sm:$0xff]  ;;  %v9067_v25 = vld [vmem:[#allocation63_spill] sm:$0xff] }
 0xa0b   : > { %9056 = vst [vmem:[#allocation159_spill] sm:$0xff] %v7789_v45  ;;  %v7793_v5 = vpop.eup %4673  ;;  %4683 = vrcp.f32 %v9062_v14 }
 0xa0c   : > { %9057 = vst [vmem:[#allocation160_spill] sm:$0xff] %v7793_v5  ;;  %v3673_v7 = vadd.f32 %v7793_v5, %v7789_v45  ;;  %v7799_v43 = vpop.eup %4675  ;;  %v9068_v45 = vld [vmem:[#allocation106_spill] sm:$0xff] }
 0xa0d   : > { %3668 = vadd.xlane.f32.xlu1 %v3667_v33  ;;  %9058 = vst [vmem:[#allocation161_spill] sm:$0xff] %v7799_v43  ;;  %v7801_v15 = vpop.eup %4677  ;;  %v7807_v33 = vld [vmem:[#allocation3] sm:$0xff] }
 0xa0e   : > { %9059 = vst [vmem:[#allocation162_spill] sm:$0xff] %v7801_v15  ;;  %v3676_v18 = vadd.f32 %v7801_v15, %v7799_v43  ;;  %v2335_v26 = vperm.slane %v7807_v33, 1  ;;  %v2336_v42 = vperm.slane %v7807_v33, 5  ;;  %v1640_v20 = vperm.slane %v7807_v33, 4 }
 0xa10   : > { %v7816_v15 = vperm.slane %v2335_v26, 1  ;;  %v7819_v14 = vperm.slane %v2336_v42, 1  ;;  %v7829_v10 = vperm.slane %v1640_v20, 0  ;;  %v9077_v20 = vld [vmem:[#allocation64_spill] sm:$0xff] }
 0xa11   : > { %2981 = vadd.xlane.f32.xlu0 %v2980_v61  ;;  %v4680_v61 = vpop.eup %4679 }
 0xa12   : > { %3674 = vadd.xlane.f32.xlu2 %v3673_v7  ;;  %v9064_v7 = vld [vmem:[#allocation102_spill] sm:$0xff]  ;;  %v4682_v30 = vpop.eup %4681  ;;  %v2305_v13 = vmul.f32 %v4680_v61, %v9066_v2  ;;  %v2306_v5 = vmul.f32 %v4680_v61, %v9067_v25  ;;  %9072 = vst [vmem:[#allocation93_spill] sm:$0xff] %v7829_v10 }
 0xa13   : > { %v4684_v43 = vpop.eup %4683  ;;  %v1609_v6 = vmul.f32 %v4682_v30, %v9071_v39 }
 0xa14   : > { %v1607_v25 = vmul.f32 %v4684_v43, %v9075_v54  ;;  %v2344_v61 = vmul.f32 %v7819_v14, %v2306_v5 }
 0xa15   : > { %2978 = vadd.xlane.f32.xlu1 %v2977_v4  ;;  %v9063_v4 = vld [vmem:[#allocation101_spill] sm:$0xff] }
 0xa16   : > { %4685 = vrcp.f32 %v9063_v4  ;;  %v9069_v4 = vld [vmem:[#allocation97_spill] sm:$0xff]  ;;  %v1646_v54 = vmul.f32 %v7829_v10, %v1607_v25 }
 0xa17   : > { %4687 = vrcp.f32 %v9064_v7  ;;  %v9070_v7 = vld [vmem:[#allocation60_spill] sm:$0xff] }
 0xa18   : > { %4689 = vrcp.f32 %v9065_v1  ;;  %v1608_v24 = vmul.f32 %v4682_v30, %v9070_v7  ;;  %v9073_v1 = vld [vmem:[#allocation58_spill] sm:$0xff] }
 0xa19   : > { %4691 = vrcp.f32 %v9068_v45  ;;  %v1606_v42 = vmul.f32 %v4684_v43, %v9073_v1  ;;  %v2343_v45 = vmul.f32 %v7816_v15, %v2305_v13  ;;  %v9079_v13 = vld [vmem:[#allocation113_spill] sm:$0xff] }
 0xa1a   : > { %4693 = vrcp.f32 %v9069_v4  ;;  %v9076_v4 = vld [vmem:[#allocation31_spill] sm:$0xff] }
 0xa1b   : > { %4695 = vrcp.f32 %v9074_v12 }
 0xa1c   : > { %v4686_v16 = vpop.eup %4685  ;;  %4697 = vrcp.f32 %v9076_v4 }
 0xa1d   : > { %3677 = vadd.xlane.f32.xlu1 %v3676_v18  ;;  %v1639_v18 = vperm.slane %v7807_v33, 0  ;;  %v4688_v2 = vpop.eup %4687  ;;  %v2303_v36 = vmul.f32 %v4686_v16, %v9077_v20  ;;  %v2304_v41 = vmul.f32 %v4686_v16, %v9078_v63  ;;  %4699 = vrcp.f32 %v9079_v13  ;;  %v9084_v16 = vld [vmem:[#allocation66_spill] sm:$0xff] }
 0xa1e   : > { %v4690_v7 = vpop.eup %4689  ;;  %4701 = vrcp.f32 %v9083_v38  ;;  %v2307_v25 = vmul.f32 %v4688_v2, %v9084_v16  ;;  %v9091_v38 = vld [vmem:[#allocation68_spill] sm:$0xff] }
 0xa1f   : > { %v7827_v26 = vperm.slane %v1639_v18, 0  ;;  %v4692_v39 = vpop.eup %4691  ;;  %v1648_v18 = vmul.f32 %v7829_v10, %v1609_v6  ;;  %v2312_v6 = vmul.f32 %v4690_v7, %v9081_v55  ;;  %v2341_v63 = vmul.f32 %v7816_v15, %v2303_v36  ;;  %v9089_v55 = vld [vmem:[#allocation51_spill] sm:$0xff] }
 0xa20   : > { %v4694_v1 = vpop.eup %4693  ;;  %v1610_v20 = vmul.f32 %v4692_v39, %v9082_v46  ;;  %v9090_v46 = vld [vmem:[#allocation67_spill] sm:$0xff] }
 0xa21   : > { %v1647_v30 = vmul.f32 %v7827_v26, %v1608_v24  ;;  %v1645_v12 = vmul.f32 %v7827_v26, %v1606_v42  ;;  %v7846_v43 = vadd.f32 %v2344_v61, %v1648_v18  ;;  %v4696_v4 = vpop.eup %4695  ;;  %v2311_v24 = vmul.f32 %v4690_v7, %v9080_v59  ;;  %v9088_v59 = vld [vmem:[#allocation75_spill] sm:$0xff] }
 0xa22   : > { %v4698_v42 = vpop.eup %4697  ;;  %v1614_v13 = vmul.f32 %v4694_v1, %v9085_v62  ;;  %v2342_v61 = vmul.f32 %v7819_v14, %v2304_v41  ;;  %v1611_v51 = vmul.f32 %v4692_v39, %v9088_v59  ;;  %v2308_v7 = vmul.f32 %v4688_v2, %v9090_v46  ;;  %v9095_v2 = vld [vmem:[#allocation42_spill] sm:$0xff]  ;;  %v9097_v46 = vld [vmem:[#allocation41_spill] sm:$0xff] }
 0xa23   : > { %v7844_v5 = vadd.f32 %v2343_v45, %v1647_v30  ;;  %v9086_v45 = vld [vmem:[#allocation35_spill] sm:$0xff]  ;;  %v1612_v21 = vmul.f32 %v4696_v4, %v9091_v38  ;;  %v1613_v36 = vmul.f32 %v4696_v4, %v9092_v0  ;;  %v2349_v62 = vmul.f32 %v7816_v15, %v2311_v24  ;;  %v9096_v24 = vld [vmem:[#allocation77_spill] sm:$0xff] }
 0xa24   : > { %4703 = vrcp.f32 %v9086_v45  ;;  %v9087_v30 = vld [vmem:[#allocation71_spill] sm:$0xff]  ;;  %v2350_v16 = vmul.f32 %v7819_v14, %v2312_v6  ;;  %v1649_v41 = vmul.f32 %v7827_v26, %v1610_v20  ;;  %v9094_v45 = vld [vmem:[#allocation76_spill] sm:$0xff]  ;;  %v2345_v39 = vmul.f32 %v7816_v15, %v2307_v25 }
 0xa25   : > { %v1615_v18 = vmul.f32 %v4694_v1, %v9087_v30  ;;  %4705 = vrcp.f32 %v9089_v55  ;;  %v2309_v1 = vmul.f32 %v4698_v42, %v9094_v45  ;;  %v4700_v30 = vpop.eup %4699  ;;  %v1653_v59 = vmul.f32 %v7827_v26, %v1614_v13 }
 0xa26   : > { %4707 = vrcp.f32 %v9093_v48  ;;  %v7871_v55 = vadd.f32 %v2341_v63, %v1645_v12  ;;  %v4702_v0 = vpop.eup %4701  ;;  %v1650_v4 = vmul.f32 %v7829_v10, %v1611_v51  ;;  %v2310_v6 = vmul.f32 %v4698_v42, %v9096_v24  ;;  %v9098_v24 = vld [vmem:[#allocation84_spill] sm:$0xff] }
 0xa27   : > { %4709 = vrcp.f32 %v9095_v2  ;;  %v1654_v48 = vmul.f32 %v7829_v10, %v1615_v18  ;;  %v2346_v38 = vmul.f32 %v7819_v14, %v2308_v7  ;;  %v1651_v25 = vmul.f32 %v7827_v26, %v1612_v21 }
 0xa28   : > { %4711 = vrcp.f32 %v9097_v46  ;;  %v1652_v13 = vmul.f32 %v7829_v10, %v1613_v36  ;;  %v7880_v45 = vadd.f32 %v2342_v61, %v1646_v54  ;;  %v2347_v63 = vmul.f32 %v7816_v15, %v2309_v1  ;;  %v9102_v61 = vld [vmem:[#allocation87_spill] sm:$0xff]  ;;  %v9103_v1 = vld [vmem:[#allocation125_spill] sm:$0xff] }
 0xa29   : > { %v7883_v2 = vadd.f32 %v2349_v62, %v1653_v59  ;;  %v7885_v18 = vadd.f32 %v2350_v16, %v1654_v48  ;;  %v7887_v51 = vadd.f32 %v2345_v39, %v1649_v41  ;;  %v2317_v46 = vmul.f32 %v4700_v30, %v9098_v24  ;;  %v9104_v41 = vld [vmem:[#allocation78_spill] sm:$0xff]  ;;  %v9106_v24 = vld [vmem:[#allocation83_spill] sm:$0xff] }
 0xa2a   : > { %v4704_v20 = vpop.eup %4703  ;;  %v2318_v7 = vmul.f32 %v4700_v30, %v9099_v37  ;;  %v1616_v21 = vmul.f32 %v4702_v0, %v9100_v44  ;;  %4713 = vrcp.f32 %v9101_v17  ;;  %v2348_v54 = vmul.f32 %v7819_v14, %v2310_v6  ;;  %v9105_v59 = vld [vmem:[#allocation82_spill] sm:$0xff]  ;;  %v9108_v30 = vld [vmem:[#allocation79_spill] sm:$0xff] }
 0xa2b   : > { %v4706_v12 = vpop.eup %4705  ;;  %v1617_v36 = vmul.f32 %v4702_v0, %v9102_v61  ;;  %4715 = vrcp.f32 %v9103_v1  ;;  %v7896_v62 = vadd.f32 %v2346_v38, %v1650_v4  ;;  %v2313_v39 = vmul.f32 %v4704_v20, %v9104_v41  ;;  %v9107_v37 = vld [vmem:[#allocation126_spill] sm:$0xff]  ;;  %v9111_v41 = vld [vmem:[#allocation48_spill] sm:$0xff] }
 0xa2c   : > { %v4708_v42 = vpop.eup %4707  ;;  %v1620_v48 = vmul.f32 %v4706_v12, %v9105_v59  ;;  %v1621_v29 = vmul.f32 %v4706_v12, %v9106_v24  ;;  %4717 = vrcp.f32 %v9107_v37  ;;  %v2314_v17 = vmul.f32 %v4704_v20, %v9108_v30  ;;  %v9112_v59 = vld [vmem:[#allocation89_spill] sm:$0xff]  ;;  %v9113_v37 = vld [vmem:[#allocation90_spill] sm:$0xff]  ;;  %v9114_v30 = vld [vmem:[#allocation127_spill] sm:$0xff] }
 0xa2d   : > { %v4710_v16 = vpop.eup %4709  ;;  %v1618_v6 = vmul.f32 %v4708_v42, %v9109_v49  ;;  %v1619_v0 = vmul.f32 %v4708_v42, %v9110_v56  ;;  %v7905_v61 = vadd.f32 %v2347_v63, %v1651_v25  ;;  %v2355_v4 = vmul.f32 %v7816_v15, %v2317_v46  ;;  %v9115_v63 = vld [vmem:[#allocation91_spill] sm:$0xff] }
 0xa2e   : > { %v4712_v44 = vpop.eup %4711  ;;  %v2356_v38 = vmul.f32 %v7819_v14, %v2318_v7  ;;  %v1655_v1 = vmul.f32 %v7827_v26, %v1616_v21  ;;  %4719 = vrcp.f32 %v9111_v41  ;;  %v1656_v12 = vmul.f32 %v7829_v10, %v1617_v36 }
 0xa2f   : > { %v2315_v24 = vmul.f32 %v4710_v16, %v9112_v59  ;;  %v2316_v20 = vmul.f32 %v4710_v16, %v9113_v37  ;;  %4721 = vrcp.f32 %v9114_v30  ;;  %v1659_v56 = vmul.f32 %v7827_v26, %v1620_v48  ;;  %v9116_v37 = vld [vmem:[#allocation92_spill] sm:$0xff] }
 0xa30   : > { %v4714_v49 = vpop.eup %4713  ;;  %v1660_v25 = vmul.f32 %v7829_v10, %v1621_v29  ;;  %v2319_v42 = vmul.f32 %v4712_v44, %v9115_v63  ;;  %v7918_v46 = vadd.f32 %v2348_v54, %v1652_v13  ;;  %v2351_v21 = vmul.f32 %v7816_v15, %v2313_v39  ;;  %v9119_v63 = vld [vmem:[#allocation98_spill] sm:$0xff] }
 0xa31   : > { %v4716_v7 = vpop.eup %4715  ;;  %v2352_v36 = vmul.f32 %v7819_v14, %v2314_v17  ;;  %v1657_v41 = vmul.f32 %v7827_v26, %v1618_v6  ;;  %4723 = vrcp.f32 %v7607_v57  ;;  %v1658_v59 = vmul.f32 %v7829_v10, %v1619_v0  ;;  %v9120_v0 = vld [vmem:[#allocation103_spill] sm:$0xff] }
 0xa32   : > { %v4718_v16 = vpop.eup %4717  ;;  %v2320_v48 = vmul.f32 %v4712_v44, %v9116_v37  ;;  %v7926_v30 = vadd.f32 %v2355_v4, %v1659_v56  ;;  %v7928_v29 = vadd.f32 %v2356_v38, %v1660_v25  ;;  %v2353_v13 = vmul.f32 %v7816_v15, %v2315_v24  ;;  %v9121_v44 = vld [vmem:[#allocation104_spill] sm:$0xff] }
 0xa33   : > { %v2354_v54 = vmul.f32 %v7819_v14, %v2316_v20  ;;  %v7932_v39 = vadd.f32 %v2351_v21, %v1655_v1  ;;  %v7934_v17 = vadd.f32 %v2352_v36, %v1656_v12  ;;  %v2357_v57 = vmul.f32 %v7816_v15, %v2319_v42  ;;  %v9122_v38 = vld [vmem:[#allocation100_spill] sm:$0xff]  ;;  %v9125_v1 = vld [vmem:[#allocation55_spill] sm:$0xff] }
 0xa34   : > { %9117 = vst [vmem:[#allocation88_spill] sm:$0xff] %v7926_v30  ;;  %v4720_v6 = vpop.eup %4719  ;;  %v1626_v60 = vmul.f32 %v4714_v49, %v9119_v63  ;;  %v2323_v23 = vmul.f32 %v4716_v7, %v9120_v0  ;;  %v2324_v4 = vmul.f32 %v4716_v7, %v9121_v44  ;;  %v1627_v25 = vmul.f32 %v4714_v49, %v9122_v38  ;;  %v9123_v37 = vld [vmem:[#allocation32_spill] sm:$0xff]  ;;  %v9126_v63 = vld [vmem:[#allocation94_spill] sm:$0xff]  ;;  %v9127_v0 = vld [vmem:[#allocation95_spill] sm:$0xff] }
 0xa35   : > { %9118 = vst [vmem:[#allocation96_spill] sm:$0xff] %v7928_v29  ;;  %v4722_v56 = vpop.eup %4721  ;;  %v1622_v24 = vmul.f32 %v4718_v16, %v9123_v37  ;;  %v9124_v29 = vld [vmem:[#allocation36_spill] sm:$0xff]  ;;  %4725 = vrcp.f32 %v9125_v1  ;;  %v2358_v12 = vmul.f32 %v7819_v14, %v2320_v48  ;;  %v3031_v21 = vperm.slane %v7807_v33, 2 }
 0xa36   : > { %v1623_v20 = vmul.f32 %v4718_v16, %v9124_v29  ;;  %v3032_v42 = vperm.slane %v7807_v33, 6  ;;  %4727 = vrcp.f32 %v7611_v40  ;;  %v1624_v7 = vmul.f32 %v4720_v6, %v9126_v63  ;;  %v9129_v48 = vld [vmem:[#allocation44_spill] sm:$0xff] }
 0xa37   : > { %v4724_v36 = vpop.eup %4723  ;;  %v1625_v44 = vmul.f32 %v4720_v6, %v9127_v0  ;;  %4729 = vrcp.f32 %v7615_v8  ;;  %v7951_v49 = vadd.f32 %v2353_v13, %v1657_v41  ;;  %v2361_v16 = vmul.f32 %v7816_v15, %v2323_v23  ;;  %v9130_v41 = vld [vmem:[#allocation25_spill] sm:$0xff]  ;;  %v9131_v13 = vld [vmem:[#allocation26_spill] sm:$0xff] }
 0xa38   : > { %v2362_v29 = vmul.f32 %v7819_v14, %v2324_v4  ;;  %v2321_v38 = vmul.f32 %v4722_v56, %v9129_v48  ;;  %4731 = vrcp.f32 %v7613_v11  ;;  %v1665_v37 = vmul.f32 %v7827_v26, %v1626_v60  ;;  %v9132_v60 = vld [vmem:[#allocation43_spill] sm:$0xff] }
 0xa39   : > { %9128 = vst [vmem:[#allocation101_spill] sm:$0xff] %v7951_v49  ;;  %v1666_v40 = vmul.f32 %v7829_v10, %v1627_v25  ;;  %v1661_v1 = vmul.f32 %v7827_v26, %v1622_v24  ;;  %v1662_v6 = vmul.f32 %v7829_v10, %v1623_v20  ;;  %v7961_v63 = vperm.slane %v3031_v21, 2  ;;  %v7970_v25 = vpop.xlane.xlu0 %2963 }
 0xa3a   : > { %v7963_v8 = vperm.slane %v3032_v42, 2  ;;  %v2999_v23 = vmul.f32 %v4724_v36, %v9130_v41  ;;  %v3000_v4 = vmul.f32 %v4724_v36, %v9131_v13  ;;  %v1663_v48 = vmul.f32 %v7827_v26, %v1624_v7  ;;  %v9133_v13 = vld [vmem:[#allocation128_spill] sm:$0xff] }
 0xa3b   : > { %v4726_v0 = vpop.eup %4725  ;;  %v1664_v11 = vmul.f32 %v7829_v10, %v1625_v44  ;;  %v2322_v30 = vmul.f32 %v4722_v56, %v9132_v60  ;;  %v7972_v49 = vadd.f32 %v2354_v54, %v1658_v59  ;;  %v2359_v21 = vmul.f32 %v7816_v15, %v2321_v38 }
 0xa3c   : > { %v4728_v20 = vpop.eup %4727  ;;  %v7975_v42 = vadd.f32 %v2361_v16, %v1665_v37  ;;  %v7977_v41 = vadd.f32 %v2362_v29, %v1666_v40  ;;  %v3727_v7 = vperm.slane %v7807_v33, 3  ;;  %v3728_v56 = vperm.slane %v7807_v33, 7  ;;  %v9134_v29 = vld [vmem:[#allocation107_spill] sm:$0xff]  ;;  %v9135_v37 = vld [vmem:[#allocation108_spill] sm:$0xff] }
 0xa3d   : > { %v4730_v36 = vpop.eup %4729  ;;  %v7982_v44 = vadd.f32 %v2357_v57, %v1661_v1  ;;  %v3037_v59 = vmul.f32 %v7961_v63, %v2999_v23  ;;  %v3038_v54 = vmul.f32 %v7963_v8, %v3000_v4  ;;  %v7987_v16 = vadd.f32 %v2358_v12, %v1662_v6  ;;  %v9136_v57 = vld [vmem:[#allocation28_spill] sm:$0xff] }
 0xa3e   : > { %v4732_v60 = vpop.eup %4731  ;;  %v7990_v38 = vmul.f32 %v4726_v0, %v9134_v29  ;;  %v7993_v40 = vmul.f32 %v4726_v0, %v9135_v37  ;;  %v3001_v33 = vmul.f32 %v4728_v20, %v7323_v32  ;;  %v3002_v1 = vmul.f32 %v4728_v20, %v9136_v57  ;;  %v9140_v32 = vld [vmem:[#allocation34_spill] sm:$0xff] }
 0xa3f   : > { %v3003_v23 = vmul.f32 %v4730_v36, %v7331_v22  ;;  %v8000_v10 = vadd.f32 %v2359_v21, %v1663_v48  ;;  %v8004_v6 = vperm.slane %v3727_v7, 3  ;;  %v8006_v0 = vperm.slane %v3728_v56, 3 }
 0xa40   : > { %v3006_v37 = vmul.f32 %v4732_v60, %v9140_v32  ;;  %v3069_v20 = vadd.f32 %v3037_v59, %v7871_v55  ;;  %v3070_v22 = vadd.f32 %v3038_v54, %v7880_v45  ;;  %v3039_v48 = vmul.f32 %v7961_v63, %v3001_v33  ;;  %v9141_v54 = vld [vmem:[#allocation110_spill] sm:$0xff]  ;;  %v9144_v32 = vld [vmem:[#allocation133_spill] sm:$0xff] }
 0xa41   : > { %v3040_v57 = vmul.f32 %v7963_v8, %v3002_v1 }
 0xa42   : > { %v3044_v33 = vmul.f32 %v7963_v8, %v3006_v37 }
 0xa43   : > { %v3072_v37 = vadd.f32 %v3040_v57, %v7846_v43  ;;  %v9146_v57 = vld [vmem:[#allocation141_spill] sm:$0xff] }
 0xa4c   : > { %v3633_v24 = vpop.xlane.xlu2 %3632 }
 0xa4d   : > { %4733 = vrcp.f32 %v3633_v24  ;;  %v2360_v24 = vmul.f32 %v7819_v14, %v2322_v30  ;;  %v9139_v30 = vld [vmem:[#allocation134_spill] sm:$0xff] }
 0xa4e   : > { %4735 = vrcp.f32 %v9133_v13  ;;  %v9137_v13 = vld [vmem:[#allocation27_spill] sm:$0xff] }
 0xa4f   : > { %4737 = vrcp.f32 %v7617_v31  ;;  %v3004_v4 = vmul.f32 %v4730_v36, %v9137_v13  ;;  %v9138_v31 = vld [vmem:[#allocation33_spill] sm:$0xff]  ;;  %v8030_v1 = vadd.f32 %v2360_v24, %v1664_v11  ;;  %v9142_v13 = vld [vmem:[#allocation136_spill] sm:$0xff] }
 0xa50   : > { %v3005_v12 = vmul.f32 %v4732_v60, %v9138_v31  ;;  %4739 = vrcp.f32 %v7621_v28  ;;  %v3041_v60 = vmul.f32 %v7961_v63, %v3003_v23 }
 0xa51   : > { %4741 = vrcp.f32 %v9139_v30  ;;  %v3042_v55 = vmul.f32 %v7963_v8, %v3004_v4  ;;  %v9143_v4 = vld [vmem:[#allocation38_spill] sm:$0xff] }
 0xa52   : > { %4743 = vrcp.f32 %v7619_v50  ;;  %v3043_v45 = vmul.f32 %v7961_v63, %v3005_v12 }
 0xa53   : > { %v4734_v29 = vpop.eup %4733 }
 0xa54   : > { %v8012_v36 = vpop.eup %4735  ;;  %v3695_v28 = vmul.f32 %v4734_v29, %v7633_v19  ;;  %v3696_v21 = vmul.f32 %v4734_v29, %v7635_v35  ;;  %v3636_v7 = vpop.xlane.xlu0 %3635 }
 0xa55   : > { %v4738_v56 = vpop.eup %4737  ;;  %4745 = vrcp.f32 %v3636_v7  ;;  %v8027_v35 = vmul.f32 %v8012_v36, %v9141_v54  ;;  %v3071_v7 = vadd.f32 %v3039_v48, %v7844_v5  ;;  %v8042_v54 = vadd.f32 %v3041_v60, %v7887_v51  ;;  %v9147_v60 = vld [vmem:[#allocation142_spill] sm:$0xff] }
 0xa56   : > { %4747 = vrcp.f32 %v7623_v9  ;;  %v3642_v59 = vpop.xlane.xlu2 %3641  ;;  %v3733_v50 = vmul.f32 %v8004_v6, %v3695_v28  ;;  %v3734_v19 = vmul.f32 %v8006_v0, %v3696_v21  ;;  %v4740_v23 = vpop.eup %4739  ;;  %v3007_v31 = vmul.f32 %v4738_v56, %v9143_v4  ;;  %v9145_v28 = vld [vmem:[#allocation37_spill] sm:$0xff]  ;;  %v9148_v4 = vld [vmem:[#allocation143_spill] sm:$0xff] }
 0xa57   : > { %4749 = vrcp.f32 %v3642_v59  ;;  %v2967_v9 = vpop.xlane.xlu1 %2966  ;;  %v8034_v30 = vpop.eup %4741  ;;  %v3008_v21 = vmul.f32 %v4738_v56, %v9145_v28  ;;  %v3075_v59 = vadd.f32 %v3043_v45, %v7905_v61  ;;  %v3076_v5 = vadd.f32 %v3044_v33, %v7918_v46 }
 0xa58   : > { %4751 = vrcp.f32 %v9142_v13  ;;  %v3765_v12 = vadd.f32 %v3733_v50, %v3069_v20  ;;  %v3766_v29 = vadd.f32 %v3734_v19, %v3070_v22  ;;  %v4744_v11 = vpop.eup %4743  ;;  %v8045_v20 = vadd.f32 %v3042_v55, %v7896_v62 }
 0xa59   : > { %4753 = vrcp.f32 %v9144_v32  ;;  %v3009_v50 = vmul.f32 %v4740_v23, %v7367_v52  ;;  %v3010_v19 = vmul.f32 %v4740_v23, %v7369_v3  ;;  %v3045_v48 = vmul.f32 %v7961_v63, %v3007_v31 }
 0xa5a   : > { %v3797_v24 = vadd.f32 %v3766_v29, %v3765_v12  ;;  %4755 = vrcp.f32 %v7627_v27  ;;  %v3046_v52 = vmul.f32 %v7963_v8, %v3008_v21  ;;  %v3011_v3 = vmul.f32 %v4744_v11, %v9146_v57 }
 0xa5b   : > { %v4746_v22 = vpop.eup %4745  ;;  %4757 = vrcp.f32 %v7970_v25  ;;  %v3012_v27 = vmul.f32 %v4744_v11, %v9147_v60  ;;  %v3047_v23 = vmul.f32 %v7961_v63, %v3009_v50  ;;  %v3048_v13 = vmul.f32 %v7963_v8, %v3010_v19 }
 0xa5c   : > { %v4748_v43 = vpop.eup %4747  ;;  %v3697_v51 = vmul.f32 %v4746_v22, %v7645_v53  ;;  %v3698_v61 = vmul.f32 %v4746_v22, %v7647_v34  ;;  %v3645_v62 = vpop.xlane.xlu0 %3644  ;;  %3798 = vadd.xlane.f32.xlu2 %v3797_v24  ;;  %v3049_v21 = vmul.f32 %v7961_v63, %v3011_v3  ;;  %v9149_v24 = vld [vmem:[#allocation144_spill] sm:$0xff] }
 0xa5d   : > { %v4750_v56 = vpop.eup %4749  ;;  %4759 = vrcp.f32 %v3645_v62  ;;  %v3013_v31 = vmul.f32 %v4748_v43, %v9148_v4  ;;  %v3050_v11 = vmul.f32 %v7963_v8, %v3012_v27  ;;  %v3014_v22 = vmul.f32 %v4748_v43, %v9149_v24  ;;  %v9150_v43 = vld [vmem:[#allocation13_spill] sm:$0xff]  ;;  %v9151_v27 = vld [vmem:[#allocation14_spill] sm:$0xff] }
 0xa5e   : > { %v8058_v46 = vpop.eup %4751  ;;  %v3701_v55 = vmul.f32 %v4750_v56, %v7649_v58  ;;  %v3702_v25 = vmul.f32 %v4750_v56, %v7653_v47  ;;  %v3651_v45 = vpop.xlane.xlu2 %3650  ;;  %v3735_v53 = vmul.f32 %v8004_v6, %v3697_v51  ;;  %v3736_v34 = vmul.f32 %v8006_v0, %v3698_v61  ;;  %v9155_v4 = vld [vmem:[#allocation46_spill] sm:$0xff] }
 0xa5f   : > { %v8064_v33 = vpop.eup %4753  ;;  %4761 = vrcp.f32 %v3651_v45  ;;  %v3051_v62 = vmul.f32 %v7961_v63, %v3013_v31  ;;  %v3078_v56 = vadd.f32 %v3046_v52, %v7885_v18  ;;  %v8080_v57 = vadd.f32 %v3047_v23, %v7932_v39  ;;  %v9153_v52 = vld [vmem:[#allocation49_spill] sm:$0xff] }
 0xa60   : > { %v3639_v12 = vpop.xlane.xlu1 %3638  ;;  %v3767_v29 = vadd.f32 %v3735_v53, %v3071_v7  ;;  %v3768_v32 = vadd.f32 %v3736_v34, %v3072_v37  ;;  %v3739_v58 = vmul.f32 %v8004_v6, %v3701_v55  ;;  %v3740_v47 = vmul.f32 %v8006_v0, %v3702_v25  ;;  %v8071_v28 = vpop.eup %4755  ;;  %v9152_v25 = vld [vmem:[#allocation101_spill] sm:$0xff] }
 0xa61   : > { %4763 = vrcp.f32 %v3639_v12  ;;  %v4758_v50 = vpop.eup %4757  ;;  %v3077_v7 = vadd.f32 %v3045_v48, %v7883_v2  ;;  %v8083_v3 = vadd.f32 %v3048_v13, %v7934_v17  ;;  %v3052_v48 = vmul.f32 %v7963_v8, %v3014_v22  ;;  %v9154_v17 = vld [vmem:[#allocation50_spill] sm:$0xff]  ;;  %v9156_v12 = vld [vmem:[#allocation45_spill] sm:$0xff] }
 0xa62   : > { %v3800_v19 = vadd.f32 %v3768_v32, %v3767_v29  ;;  %v3771_v51 = vadd.f32 %v3739_v58, %v3075_v59  ;;  %v3772_v61 = vadd.f32 %v3740_v47, %v3076_v5  ;;  %4765 = vrcp.f32 %v2967_v9  ;;  %v9157_v32 = vld [vmem:[#allocation88_spill] sm:$0xff]  ;;  %v9158_v47 = vld [vmem:[#allocation57_spill] sm:$0xff] }
 0xa63   : > { %v4760_v37 = vpop.eup %4759  ;;  %v3081_v18 = vadd.f32 %v3049_v21, %v9152_v25  ;;  %v3082_v39 = vadd.f32 %v3050_v11, %v7972_v49  ;;  %v3017_v31 = vmul.f32 %v4758_v50, %v9155_v4  ;;  %v3018_v29 = vmul.f32 %v4758_v50, %v9156_v12  ;;  %v9159_v21 = vld [vmem:[#allocation56_spill] sm:$0xff]  ;;  %v9165_v12 = vld [vmem:[#allocation30_spill] sm:$0xff] }
 0xa64   : > { %v3703_v60 = vmul.f32 %v4760_v37, %v9150_v43  ;;  %v3704_v55 = vmul.f32 %v4760_v37, %v9151_v27  ;;  %v3654_v59 = vpop.xlane.xlu0 %3653  ;;  %3801 = vadd.xlane.f32.xlu0 %v3800_v19  ;;  %v3806_v5 = vadd.f32 %v3772_v61, %v3771_v51  ;;  %v3083_v58 = vadd.f32 %v3051_v62, %v9157_v32  ;;  %v9160_v37 = vld [vmem:[#allocation96_spill] sm:$0xff]  ;;  %v9161_v27 = vld [vmem:[#allocation145_spill] sm:$0xff] }
 0xa65   : > { %v4762_v2 = vpop.eup %4761  ;;  %4767 = vrcp.f32 %v3654_v59  ;;  %v3084_v43 = vadd.f32 %v3052_v48, %v9160_v37  ;;  %v3015_v50 = vmul.f32 %v8071_v28, %v9161_v27  ;;  %v9170_v37 = vld [vmem:[#allocation54_spill] sm:$0xff] }
 0xa66   : > { %v3707_v45 = vmul.f32 %v4762_v2, %v9153_v52  ;;  %v3708_v53 = vmul.f32 %v4762_v2, %v9154_v17  ;;  %v3660_v9 = vpop.xlane.xlu2 %3659  ;;  %3807 = vadd.xlane.f32.xlu2 %v3806_v5  ;;  %v3741_v34 = vmul.f32 %v8004_v6, %v3703_v60  ;;  %v3742_v23 = vmul.f32 %v8006_v0, %v3704_v55  ;;  %v9162_v52 = vld [vmem:[#allocation39_spill] sm:$0xff]  ;;  %v9163_v17 = vld [vmem:[#allocation40_spill] sm:$0xff] }
 0xa67   : > { %v4764_v13 = vpop.eup %4763  ;;  %4769 = vrcp.f32 %v3660_v9 }
 0xa68   : > { %v3699_v49 = vmul.f32 %v4764_v13, %v9158_v47  ;;  %v3700_v11 = vmul.f32 %v4764_v13, %v9159_v21  ;;  %v3648_v24 = vpop.xlane.xlu1 %3647  ;;  %v3773_v22 = vadd.f32 %v3741_v34, %v3077_v7  ;;  %v3774_v19 = vadd.f32 %v3742_v23, %v3078_v56  ;;  %v4766_v60 = vpop.eup %4765  ;;  %v9164_v13 = vld [vmem:[#allocation29_spill] sm:$0xff] }
 0xa69   : > { %4771 = vrcp.f32 %v3648_v24  ;;  %v3745_v51 = vmul.f32 %v8004_v6, %v3707_v45  ;;  %v3746_v61 = vmul.f32 %v8006_v0, %v3708_v53  ;;  %v3055_v7 = vmul.f32 %v7961_v63, %v3017_v31  ;;  %v9168_v24 = vld [vmem:[#allocation146_spill] sm:$0xff] }
 0xa6a   : > { %v3809_v55 = vadd.f32 %v3774_v19, %v3773_v22  ;;  %v3737_v62 = vmul.f32 %v8004_v6, %v3699_v49  ;;  %v3738_v59 = vmul.f32 %v8006_v0, %v3700_v11  ;;  %v3056_v56 = vmul.f32 %v7963_v8, %v3018_v29  ;;  %v9166_v29 = vld [vmem:[#allocation15_spill] sm:$0xff] }
 0xa6b   : > { %v4768_v5 = vpop.eup %4767  ;;  %v3777_v2 = vadd.f32 %v3745_v51, %v3081_v18  ;;  %v3778_v25 = vadd.f32 %v3746_v61, %v3082_v39  ;;  %v3019_v4 = vmul.f32 %v4766_v60, %v9164_v13  ;;  %v3020_v32 = vmul.f32 %v4766_v60, %v9165_v12  ;;  %v9167_v39 = vld [vmem:[#allocation16_spill] sm:$0xff]  ;;  %v9169_v51 = vld [vmem:[#allocation53_spill] sm:$0xff] }
 0xa6c   : > { %v3709_v45 = vmul.f32 %v4768_v5, %v9162_v52  ;;  %v3710_v48 = vmul.f32 %v4768_v5, %v9163_v17  ;;  %v3663_v53 = vpop.xlane.xlu0 %3662  ;;  %3810 = vadd.xlane.f32.xlu0 %v3809_v55  ;;  %v3769_v9 = vadd.f32 %v3737_v62, %v8042_v54  ;;  %v3770_v34 = vadd.f32 %v3738_v59, %v8045_v20 }
 0xa6d   : > { %v4770_v23 = vpop.eup %4769  ;;  %4773 = vrcp.f32 %v3663_v53  ;;  %v3815_v31 = vadd.f32 %v3778_v25, %v3777_v2  ;;  %v3016_v54 = vmul.f32 %v8071_v28, %v9168_v24  ;;  %v3087_v22 = vadd.f32 %v3055_v7, %v8000_v10  ;;  %v9171_v25 = vld [vmem:[#allocation52_spill] sm:$0xff] }
 0xa6e   : > { %v3713_v18 = vmul.f32 %v4770_v23, %v9166_v29  ;;  %v3714_v47 = vmul.f32 %v4770_v23, %v9167_v39  ;;  %v3803_v49 = vadd.f32 %v3770_v34, %v3769_v9  ;;  %v3747_v21 = vmul.f32 %v8004_v6, %v3709_v45 }
 0xa6f   : > { %v4772_v11 = vpop.eup %4771  ;;  %3816 = vadd.xlane.f32.xlu2 %v3815_v31  ;;  %v3748_v20 = vmul.f32 %v8006_v0, %v3710_v48  ;;  %v3088_v19 = vadd.f32 %v3056_v56, %v8030_v1  ;;  %v3057_v59 = vmul.f32 %v7961_v63, %v3019_v4  ;;  %v3058_v2 = vmul.f32 %v7963_v8, %v3020_v32  ;;  %v9173_v48 = vld [vmem:[#allocation18_spill] sm:$0xff] }
 0xa70   : > { %v3705_v61 = vmul.f32 %v4772_v11, %v9169_v51  ;;  %v3706_v60 = vmul.f32 %v4772_v11, %v9170_v37  ;;  %3804 = vadd.xlane.f32.xlu1 %v3803_v49  ;;  %v3657_v27 = vpop.xlane.xlu1 %3656  ;;  %v3779_v55 = vadd.f32 %v3747_v21, %v3083_v58  ;;  %v3751_v62 = vmul.f32 %v8004_v6, %v3713_v18  ;;  %v9172_v58 = vld [vmem:[#allocation135_spill] sm:$0xff]  ;;  %v9175_v21 = vld [vmem:[#allocation112_spill] sm:$0xff] }
 0xa71   : > { %4775 = vrcp.f32 %v3657_v27  ;;  %v3780_v28 = vadd.f32 %v3748_v20, %v3084_v43  ;;  %v3752_v5 = vmul.f32 %v8006_v0, %v3714_v47  ;;  %v1632_v52 = vmul.f32 %v8034_v30, %v9171_v25  ;;  %v9174_v43 = vld [vmem:[#allocation17_spill] sm:$0xff]  ;;  %v9177_v11 = vld [vmem:[#allocation115_spill] sm:$0xff] }
 0xa72   : > { %v3783_v10 = vadd.f32 %v3751_v62, %v3087_v22  ;;  %v3743_v1 = vmul.f32 %v8004_v6, %v3705_v61  ;;  %v3744_v7 = vmul.f32 %v8006_v0, %v3706_v60  ;;  %4777 = vrcp.f32 %v9172_v58  ;;  %v9179_v20 = vld [vmem:[#allocation19_spill] sm:$0xff] }
 0xa73   : > { %v4774_v56 = vpop.eup %4773  ;;  %v3818_v45 = vadd.f32 %v3780_v28, %v3779_v55  ;;  %v3784_v17 = vadd.f32 %v3752_v5, %v3088_v19  ;;  %v3053_v4 = vmul.f32 %v7961_v63, %v3015_v50  ;;  %v3054_v12 = vmul.f32 %v7963_v8, %v3016_v54  ;;  %v9180_v60 = vld [vmem:[#allocation47_spill] sm:$0xff] }
 0xa74   : > { %v3715_v53 = vmul.f32 %v4774_v56, %v9173_v48  ;;  %v3716_v9 = vmul.f32 %v4774_v56, %v9174_v43  ;;  %v2973_v34 = vpop.xlane.xlu0 %2972  ;;  %v3775_v23 = vadd.f32 %v3743_v1, %v8080_v57  ;;  %v3776_v13 = vadd.f32 %v3744_v7, %v8083_v3  ;;  %v9176_v3 = vld [vmem:[#allocation114_spill] sm:$0xff]  ;;  %v9181_v28 = vld [vmem:[#allocation111_spill] sm:$0xff]  ;;  %v9183_v7 = vld [vmem:[#allocation137_spill] sm:$0xff] }
 0xa75   : > { %3819 = vadd.xlane.f32.xlu0 %v3818_v45  ;;  %v3824_v32 = vadd.f32 %v3784_v17, %v3783_v10  ;;  %v3089_v31 = vadd.f32 %v3057_v59, %v7975_v42  ;;  %v3090_v18 = vadd.f32 %v3058_v2, %v7977_v41  ;;  %v1633_v57 = vmul.f32 %v8034_v30, %v9175_v21  ;;  %v9178_v42 = vld [vmem:[#allocation20_spill] sm:$0xff]  ;;  %v3666_v22 = vpop.xlane.xlu2 %3665  ;;  %v9182_v10 = vld [vmem:[#allocation117_spill] sm:$0xff] }
 0xa76   : > { %v3812_v29 = vadd.f32 %v3776_v13, %v3775_v23  ;;  %v3753_v39 = vmul.f32 %v8004_v6, %v3715_v53  ;;  %v3754_v47 = vmul.f32 %v8006_v0, %v3716_v9  ;;  %v2329_v50 = vmul.f32 %v8058_v46, %v9176_v3  ;;  %v9184_v56 = vld [vmem:[#allocation120_spill] sm:$0xff]  ;;  %v9185_v53 = vld [vmem:[#allocation93_spill] sm:$0xff]  ;;  %v9186_v9 = vld [vmem:[#allocation139_spill] sm:$0xff] }
 0xa77   : > { %v4776_v49 = vpop.eup %4775  ;;  %v2330_v24 = vmul.f32 %v8058_v46, %v9177_v11  ;;  %4779 = vrcp.f32 %v2973_v34  ;;  %3825 = vadd.xlane.f32.xlu2 %v3824_v32  ;;  %v1628_v30 = vmul.f32 %v8064_v33, %v9180_v60  ;;  %v3085_v27 = vadd.f32 %v3053_v4, %v7982_v44  ;;  %v9187_v34 = vld [vmem:[#allocation121_spill] sm:$0xff]  ;;  %v9190_v11 = vld [vmem:[#allocation147_spill] sm:$0xff] }
 0xa78   : > { %v3711_v54 = vmul.f32 %v4776_v49, %v9178_v42  ;;  %v3712_v41 = vmul.f32 %v4776_v49, %v9179_v20  ;;  %3813 = vadd.xlane.f32.xlu1 %v3812_v29  ;;  %v2970_v19 = vpop.xlane.xlu1 %2969  ;;  %v3785_v51 = vadd.f32 %v3753_v39, %v3089_v31  ;;  %v3786_v61 = vadd.f32 %v3754_v47, %v3090_v18  ;;  %v4778_v37 = vpop.eup %4777  ;;  %v9188_v18 = vld [vmem:[#allocation24_spill] sm:$0xff]  ;;  %v9192_v20 = vld [vmem:[#allocation22_spill] sm:$0xff] }
 0xa79   : > { %4781 = vrcp.f32 %v3666_v22  ;;  %v3086_v46 = vadd.f32 %v3054_v12, %v7987_v16  ;;  %v1631_v5 = vmul.f32 %v8012_v36, %v9181_v28  ;;  %v2367_v2 = vmul.f32 %v7816_v15, %v2329_v50  ;;  %v9189_v50 = vld [vmem:[#allocation148_spill] sm:$0xff]  ;;  %v9196_v28 = vld [vmem:[#allocation138_spill] sm:$0xff] }
 0xa7a   : > { %4783 = vrcp.f32 %v2970_v19  ;;  %v3827_v55 = vadd.f32 %v3786_v61, %v3785_v51  ;;  %v3749_v62 = vmul.f32 %v8004_v6, %v3711_v54  ;;  %v3750_v59 = vmul.f32 %v8006_v0, %v3712_v41  ;;  %v9193_v51 = vld [vmem:[#allocation21_spill] sm:$0xff] }
 0xa7b   : > { %v1629_v1 = vmul.f32 %v8064_v33, %v9182_v10  ;;  %4785 = vrcp.f32 %v9183_v7  ;;  %v2368_v44 = vmul.f32 %v7819_v14, %v2330_v24  ;;  %v2327_v16 = vmul.f32 %v4778_v37, %v9184_v56  ;;  %v9197_v56 = vld [vmem:[#allocation129_spill] sm:$0xff] }
 0xa7c   : > { %v3672_v25 = vpop.xlane.xlu0 %3671  ;;  %v3781_v58 = vadd.f32 %v3749_v62, %v3085_v27  ;;  %v3782_v45 = vadd.f32 %v3750_v59, %v3086_v46  ;;  %v2363_v48 = vmul.f32 %v7816_v15, %v7990_v38  ;;  %v1671_v36 = vmul.f32 %v7827_v26, %v1632_v52  ;;  %v9194_v46 = vld [vmem:[#allocation118_spill] sm:$0xff]  ;;  %v9195_v62 = vld [vmem:[#allocation119_spill] sm:$0xff] }
 0xa7d   : > { %v4780_v17 = vpop.eup %4779  ;;  %v1672_v43 = vmul.f32 %v9185_v53, %v1633_v57  ;;  %4787 = vrcp.f32 %v9186_v9  ;;  %3828 = vadd.xlane.f32.xlu0 %v3827_v55  ;;  %v1667_v33 = vmul.f32 %v7827_v26, %v1628_v30  ;;  %v2328_v23 = vmul.f32 %v4778_v37, %v9187_v34  ;;  %v2976_v47 = vpop.xlane.xlu2 %2975 }
 0xa7e   : > { %4789 = vrcp.f32 %v3672_v25  ;;  %v3821_v13 = vadd.f32 %v3782_v45, %v3781_v58  ;;  %v2364_v12 = vmul.f32 %v7819_v14, %v7993_v40  ;;  %v1669_v38 = vmul.f32 %v7827_v26, %v8027_v35  ;;  %v9191_v35 = vld [vmem:[#allocation23_spill] sm:$0xff]  ;;  %v9198_v25 = vld [vmem:[#allocation140_spill] sm:$0xff] }
 0xa7f   : > { %v4782_v4 = vpop.eup %4781  ;;  %v1670_v52 = vmul.f32 %v9185_v53, %v1631_v5  ;;  %v1668_v32 = vmul.f32 %v9185_v53, %v1629_v1  ;;  %v2365_v29 = vmul.f32 %v7816_v15, %v2327_v16  ;;  %v2399_v21 = vadd.f32 %v2367_v2, %v1671_v36  ;;  %v9199_v36 = vld [vmem:[#allocation149_spill] sm:$0xff] }
 0xa80   : > { %v4784_v31 = vpop.eup %4783  ;;  %v3717_v39 = vmul.f32 %v4782_v4, %v9188_v18  ;;  %3822 = vadd.xlane.f32.xlu1 %v3821_v13  ;;  %v3669_v49 = vpop.xlane.xlu1 %3668  ;;  %v2400_v57 = vadd.f32 %v2368_v44, %v1672_v43  ;;  %v3718_v40 = vmul.f32 %v4782_v4, %v9189_v50  ;;  %4791 = vrcp.f32 %v2976_v47  ;;  %v9201_v4 = vld [vmem:[#allocation151_spill] sm:$0xff]  ;;  %v9203_v18 = vld [vmem:[#allocation153_spill] sm:$0xff]  ;;  %v9205_v50 = vld [vmem:[#allocation130_spill] sm:$0xff] }
 0xa81   : > { %v4786_v3 = vpop.eup %4785  ;;  %v3021_v24 = vmul.f32 %v4784_v31, %v9190_v11  ;;  %v3022_v42 = vmul.f32 %v4784_v31, %v9191_v35  ;;  %v2366_v54 = vmul.f32 %v7819_v14, %v2328_v23  ;;  %v3023_v41 = vmul.f32 %v4780_v17, %v9192_v20  ;;  %v9200_v23 = vld [vmem:[#allocation150_spill] sm:$0xff] }
 0xa82   : > { %4793 = vrcp.f32 %v3669_v49  ;;  %v2395_v22 = vadd.f32 %v2363_v48, %v1667_v33  ;;  %v3024_v61 = vmul.f32 %v4780_v17, %v9193_v51  ;;  %v2396_v30 = vadd.f32 %v2364_v12, %v1668_v32 }
 0xa83   : > { %v4788_v19 = vpop.eup %4787  ;;  %v3059_v37 = vmul.f32 %v7961_v63, %v3021_v24  ;;  %v3060_v60 = vmul.f32 %v7963_v8, %v3022_v42  ;;  %v2331_v55 = vmul.f32 %v4786_v3, %v9194_v46  ;;  %v2332_v59 = vmul.f32 %v4786_v3, %v9195_v62 }
 0xa84   : > { %v4790_v27 = vpop.eup %4789  ;;  %4795 = vrcp.f32 %v9196_v28  ;;  %v2397_v5 = vadd.f32 %v2365_v29, %v1669_v38  ;;  %v2982_v2 = vpop.xlane.xlu0 %2981  ;;  %v3755_v7 = vmul.f32 %v8004_v6, %v3717_v39  ;;  %v3756_v44 = vmul.f32 %v8006_v0, %v3718_v40  ;;  %v9202_v38 = vld [vmem:[#allocation152_spill] sm:$0xff] }
 0xa85   : > { %v3091_v10 = vadd.f32 %v3059_v37, %v2395_v22  ;;  %v3092_v1 = vadd.f32 %v3060_v60, %v2396_v30  ;;  %v1634_v16 = vmul.f32 %v4788_v19, %v9197_v56  ;;  %4797 = vrcp.f32 %v9198_v25  ;;  %v3675_v31 = vpop.xlane.xlu2 %3674  ;;  %v9208_v25 = vld [vmem:[#allocation159_spill] sm:$0xff] }
 0xa86   : > { %v3061_v58 = vmul.f32 %v7961_v63, %v3023_v41  ;;  %v2398_v45 = vadd.f32 %v2366_v54, %v1670_v52  ;;  %v4792_v17 = vpop.eup %4791  ;;  %v3062_v48 = vmul.f32 %v7963_v8, %v3024_v61  ;;  %v3721_v43 = vmul.f32 %v4790_v27, %v9199_v36  ;;  %v9204_v52 = vld [vmem:[#allocation154_spill] sm:$0xff]  ;;  %v9210_v36 = vld [vmem:[#allocation157_spill] sm:$0xff] }
 0xa87   : > { %v3787_v9 = vadd.f32 %v3755_v7, %v3091_v10  ;;  %v3788_v33 = vadd.f32 %v3756_v44, %v3092_v1  ;;  %v3722_v13 = vmul.f32 %v4790_v27, %v9200_v23  ;;  %v3025_v12 = vmul.f32 %v4792_v17, %v9201_v4  ;;  %v9206_v1 = vld [vmem:[#allocation131_spill] sm:$0xff]  ;;  %v9207_v44 = vld [vmem:[#allocation132_spill] sm:$0xff] }
 0xa88   : > { %v4794_v34 = vpop.eup %4793  ;;  %v3026_v32 = vmul.f32 %v4792_v17, %v9202_v38  ;;  %4799 = vrcp.f32 %v2982_v2  ;;  %v2979_v29 = vpop.xlane.xlu1 %2978  ;;  %v1635_v40 = vmul.f32 %v4788_v19, %v9205_v50  ;;  %v3093_v35 = vadd.f32 %v3061_v58, %v2397_v5 }
 0xa89   : > { %v3719_v39 = vmul.f32 %v4794_v34, %v9203_v18  ;;  %v3720_v47 = vmul.f32 %v4794_v34, %v9204_v52  ;;  %4801 = vrcp.f32 %v3675_v31  ;;  %v3830_v49 = vadd.f32 %v3788_v33, %v3787_v9  ;;  %v9211_v9 = vld [vmem:[#allocation158_spill] sm:$0xff]  ;;  %v9213_v34 = vld [vmem:[#allocation123_spill] sm:$0xff] }
 0xa8a   : > { %v4796_v3 = vpop.eup %4795  ;;  %v3063_v11 = vmul.f32 %v7961_v63, %v3025_v12  ;;  %v3064_v24 = vmul.f32 %v7963_v8, %v3026_v32  ;;  %4803 = vrcp.f32 %v2979_v29  ;;  %v3094_v42 = vadd.f32 %v3062_v48, %v2398_v45  ;;  %v9215_v12 = vld [vmem:[#allocation156_spill] sm:$0xff] }
 0xa8b   : > { %3831 = vadd.xlane.f32.xlu1 %v3830_v49  ;;  %v3757_v54 = vmul.f32 %v8004_v6, %v3719_v39  ;;  %v3758_v20 = vmul.f32 %v8006_v0, %v3720_v47  ;;  %v4798_v41 = vpop.eup %4797  ;;  %v3759_v61 = vmul.f32 %v8004_v6, %v3721_v43  ;;  %v3760_v37 = vmul.f32 %v8006_v0, %v3722_v13  ;;  %v9214_v13 = vld [vmem:[#allocation155_spill] sm:$0xff] }
 0xa8c   : > { %v3095_v22 = vadd.f32 %v3063_v11, %v2399_v21  ;;  %v3096_v51 = vadd.f32 %v3064_v24, %v2400_v57  ;;  %v2369_v27 = vmul.f32 %v7816_v15, %v2331_v55  ;;  %v2370_v5 = vmul.f32 %v7819_v14, %v2332_v59  ;;  %v9209_v55 = vld [vmem:[#allocation160_spill] sm:$0xff] }
 0xa8d   : > { %v3789_v19 = vadd.f32 %v3757_v54, %v3093_v35  ;;  %v3790_v60 = vadd.f32 %v3758_v20, %v3094_v42  ;;  %v1673_v2 = vmul.f32 %v7827_v26, %v1634_v16  ;;  %v1674_v10 = vmul.f32 %v9185_v53, %v1635_v40  ;;  %v9212_v16 = vld [vmem:[#allocation122_spill] sm:$0xff] }
 0xa8e   : > { %v4800_v30 = vpop.eup %4799  ;;  %v3791_v46 = vadd.f32 %v3759_v61, %v3095_v22  ;;  %v3792_v62 = vadd.f32 %v3760_v37, %v3096_v51  ;;  %v2333_v7 = vmul.f32 %v4798_v41, %v9206_v1  ;;  %v2334_v56 = vmul.f32 %v4798_v41, %v9207_v44 }
 0xa8f   : > { %v4802_v28 = vpop.eup %4801  ;;  %v3833_v21 = vadd.f32 %v3790_v60, %v3789_v19  ;;  %v1636_v33 = vmul.f32 %v4796_v3, %v9212_v16  ;;  %v1637_v23 = vmul.f32 %v4796_v3, %v9213_v34  ;;  %v3029_v4 = vmul.f32 %v4800_v30, %v9214_v13 }
 0xa90   : > { %v4804_v57 = vpop.eup %4803  ;;  %v3723_v58 = vmul.f32 %v4802_v28, %v9208_v25  ;;  %v3678_v45 = vpop.xlane.xlu1 %3677  ;;  %v3836_v17 = vadd.f32 %v3792_v62, %v3791_v46  ;;  %v3724_v48 = vmul.f32 %v4802_v28, %v9209_v55  ;;  %v3030_v38 = vmul.f32 %v4800_v30, %v9215_v12 }
 0xa91   : > { %v3027_v43 = vmul.f32 %v4804_v57, %v9210_v36  ;;  %v3028_v59 = vmul.f32 %v4804_v57, %v9211_v9  ;;  %3834 = vadd.xlane.f32.xlu2 %v3833_v21  ;;  %4805 = vrcp.f32 %v3678_v45  ;;  %v2401_v29 = vadd.f32 %v2369_v27, %v1673_v2 }
 0xa92   : > { %3837 = vadd.xlane.f32.xlu0 %v3836_v17  ;;  %v2402_v18 = vadd.f32 %v2370_v5, %v1674_v10  ;;  %v2371_v39 = vmul.f32 %v7816_v15, %v2333_v7  ;;  %v2372_v52 = vmul.f32 %v7819_v14, %v2334_v56  ;;  %v3761_v50 = vmul.f32 %v8004_v6, %v3723_v58  ;;  %v9216_v15 = vld [vmem:[#allocation161_spill] sm:$0xff]  ;;  %v9217_v14 = vld [vmem:[#allocation162_spill] sm:$0xff]  ;;  %v3877_v58 = vld [vmem:[%s275_s21] sm:$0x1] }
 0xa93   : > { %v3065_v32 = vmul.f32 %v7961_v63, %v3027_v43  ;;  %v3066_v31 = vmul.f32 %v7963_v8, %v3028_v59  ;;  %v3762_v3 = vmul.f32 %v8006_v0, %v3724_v48  ;;  %v1675_v40 = vmul.f32 %v7827_v26, %v1636_v33 }
 0xa94   : > { %v1676_v11 = vmul.f32 %v9185_v53, %v1637_v23  ;;  %v3067_v24 = vmul.f32 %v7961_v63, %v3029_v4  ;;  %v3068_v35 = vmul.f32 %v7963_v8, %v3030_v38  ;;  %vm3878_vm7 = vnez %v3877_v58 }
 0xa95   : > { %v3097_v47 = vadd.f32 %v3065_v32, %v2401_v29  ;;  %v3098_v49 = vadd.f32 %v3066_v31, %v2402_v18  ;;  %v2403_v51 = vadd.f32 %v2371_v39, %v1675_v40  ;;  %v9218_v45 = vmov 0  }
 0xa96   : > { %v2404_v61 = vadd.f32 %v2372_v52, %v1676_v11  ;;  %v3879_v17 = vsel %vm3878_vm7, 16843009, %v9218_v45 }
 0xa97   : > { %v4806_v42 = vpop.eup %4805  ;;  %v3793_v54 = vadd.f32 %v3761_v50, %v3097_v47  ;;  %v3794_v20 = vadd.f32 %v3762_v3, %v3098_v49  ;;  %v3099_v19 = vadd.f32 %v3067_v24, %v2403_v51  ;;  %v3880_v55 = vunpack.c.0.s8 %v3879_v17 }
 0xa98   : > { %v3725_v41 = vmul.f32 %v4806_v42, %v9216_v15  ;;  %v3726_v22 = vmul.f32 %v4806_v42, %v9217_v14  ;;  %v3100_v60 = vadd.f32 %v3068_v35, %v2404_v61 }
 0xa99   : > { %v3839_v37 = vadd.f32 %v3794_v20, %v3793_v54  ;;  %vm3881_vm9 = vcmp.ne.s32.totalorder %v3880_v55, 0 }
 0xa9a   : > { %v3763_v26 = vmul.f32 %v8004_v6, %v3725_v41  ;;  %v3764_v53 = vmul.f32 %v8006_v0, %v3726_v22 }
 0xa9b   : > { %3840 = vadd.xlane.f32.xlu1 %v3839_v37 }
 0xa9c   : > { %v3795_v63 = vadd.f32 %v3763_v26, %v3099_v19  ;;  %v3796_v30 = vadd.f32 %v3764_v53, %v3100_v60 }
 0xa9e   : > { %v3842_v8 = vadd.f32 %v3796_v30, %v3795_v63 }
 0xaa0   : > { %3843 = vadd.xlane.f32.xlu2 %v3842_v8 }
 0xacf   : > { %v3799_v27 = vpop.xlane.xlu2 %3798 }
 0xad0   : > { %3845 = vxpose.xlu0.b32.start [1/16] (narrow) %v3799_v27, 8 }
 0xad7   : > { %v3802_v46 = vpop.xlane.xlu0 %3801 }
 0xad8   : > { %3846 = vxpose.xlu0.b32.cont [2/16] (narrow) %v3802_v46, 8 }
 0xad9   : > { %v3808_v28 = vpop.xlane.xlu2 %3807 }
 0xadf   : > { %v3811_v5 = vpop.xlane.xlu0 %3810 }
 0xae2   : > { %v3817_v6 = vpop.xlane.xlu2 %3816 }
 0xae3   : > { %v3805_v62 = vpop.xlane.xlu1 %3804 }
 0xae4   : > { %3847 = vxpose.xlu0.b32.cont [3/16] (narrow) %v3805_v62, 8 }
 0xae8   : > { %v3820_v0 = vpop.xlane.xlu0 %3819 }
 0xaea   : > { %v3826_v21 = vpop.xlane.xlu2 %3825 }
 0xaeb   : > { %v3814_v2 = vpop.xlane.xlu1 %3813 }
 0xaec   : > { %3848 = vxpose.xlu0.b32.cont [4/16] (narrow) %v3808_v28, 8 }
 0xaf0   : > { %v3829_v57 = vpop.xlane.xlu0 %3828 }
 0xaf3   : > { %v3823_v10 = vpop.xlane.xlu1 %3822 }
 0xaf4   : > { %3849 = vxpose.xlu0.b32.cont [5/16] (narrow) %v3811_v5, 8 }
 0xafc   : > { %3850 = vxpose.xlu0.b32.cont [6/16] (narrow) %v3814_v2, 8 }
 0xafe   : > { %v3832_v1 = vpop.xlane.xlu1 %3831 }
 0xb04   : > { %3851 = vxpose.xlu0.b32.cont [7/16] (narrow) %v3817_v6, 8  ;;  %v3835_v7 = vpop.xlane.xlu2 %3834 }
 0xb05   : > { %v3838_v44 = vpop.xlane.xlu0 %3837 }
 0xb0c   : > { %3852 = vxpose.xlu0.b32.cont [8/16] (narrow) %v3820_v0, 8 }
 0xb0e   : > { %v3841_v56 = vpop.xlane.xlu1 %3840 }
 0xb13   : > { %v3844_v25 = vpop.xlane.xlu2 %3843 }
 0xb14   : > { %3853 = vxpose.xlu0.b32.cont [9/16] (narrow) %v3823_v10, 8 }
 0xb1c   : > { %3854 = vxpose.xlu0.b32.cont [10/16] (narrow) %v3826_v21, 8 }
 0xb24   : > { %3855 = vxpose.xlu0.b32.cont [11/16] (narrow) %v3829_v57, 8 }
 0xb2c   : > { %3856 = vxpose.xlu0.b32.cont [12/16] (narrow) %v3832_v1, 8 }
 0xb34   : > { %3857 = vxpose.xlu0.b32.cont [13/16] (narrow) %v3835_v7, 8 }
 0xb3c   : > { %3858 = vxpose.xlu0.b32.cont [14/16] (narrow) %v3838_v44, 8 }
 0xb44   : > { %3859 = vxpose.xlu0.b32.cont [15/16] (narrow) %v3841_v56, 8 }
 0xb4c   : > { %3860 = vxpose.xlu0.b32.end [16/16] (narrow) %v3844_v25, 8 }
 0xb78   : > { %v3861_v48 = vpop.trf.xlu0 }
 0xb79   : > { %v3882_v36 = vsel %vm3881_vm9, -60000.0, %v3861_v48 }
 0xb7a   : > { %v4326_v43 = vmul.f32 -1.442695, %v3882_v36 }
 0xb7c   : > { %4807 = vpow2.f32 %v4326_v43 }
 0xb82   : > { %v4808_v9 = vpop.eup %4807 }
 0xb83   : > { %v3886_v59 = vadd.f32 1.0, %v4808_v9 }
 0xb85   : > { %4809 = vrcp.f32 %v3886_v59  ;;  %v3898_v23 = vand.u32 2147483648, %v3886_v59  ;;  %v3896_v4 = vand.u32 2147483647, %v3886_v59  ;;  %vm3892_vm11 = vweird.f32 %v3886_v59 }
 0xb87   : > { %v3899_v38 = vor.u32 1.1754944e-38, %v3898_v23  ;;  %vm3897_vm5 = vcmp.eq.f32.partialorder %v3896_v4, 8.507059e+37 }
 0xb8b   : > { %v4810_v16 = vpop.eup %4809 }
 0xb8c   : > { %v3888_v33 = vmul.f32 %v4810_v16, %v3886_v59  ;;  %vm3893_vm10 = vweird.f32 %v4810_v16 }
 0xb8d   : > { %vm3894_vm2 = vmor %vm3892_vm11, %vm3893_vm10 }
 0xb8e   : > { %v3889_v34 = vsub.f32 1.0, %v3888_v33 }
 0xb90   : > { %v3890_v13 = vmul.f32 %v4810_v16, %v3889_v34 }
 0xb92   : > { %v3891_v12 = vadd.f32 %v4810_v16, %v3890_v13 }
 0xb94   : > { %v3895_v32 = vsel %vm3894_vm2, %v4810_v16, %v3891_v12 }
 0xb95   : > { %v3900_v31 = vsel %vm3897_vm5, %v3899_v38, %v3895_v32 }
 0xb96   : > { %3902 = vst [vmem:[%s5092_s13] sm:$0x1] %v3900_v31 }
 0xb97   : > { %4894 = shalt.err (!%p4891_p10)
}
 0xb98   : > { %4343 = dma.vmem_to_hbm [thread:$0]  (%p5048_p3), %s3917_s7, 16, %s3919_s8, %s3904_s19  }
 0xb99 PF: > { %p4349_p11 = scmp.ge.s32.totalorder %s4961_s22, 2  ;;  %s3930_s13 = sand.u32 1, %s4933_s15  }
 0xb9a   : > { %s3931_s9 = scalar_lea.sflag [#allocation5], %s3930_s13 }
 0xb9b   : > { %p4346_p12 = pnand %p4349_p11, %p5057_p8 }
 0xb9d   : > { %p4347_p13 = pneg %p4346_p12 }
 0xb9f   : > { %4928 = dma.done.wait (%p4347_p13), %s3931_s9, 16  }
 0xba0   : > { %4930 = vsyncadd (%p4347_p13), %s3931_s9, 4294967280  ;;  %s17_s22 = sadd.s32 1, %s4961_s22   ;;  %s9220_s10 = sld [smem:[#allocation7_spill]] }
 0xba1   : > { %p14_p0 = scmp.ge.s32.totalorder %s17_s22, 6   ;;  %s9221_s17 = sld [smem:[#allocation12_spill]] }
 0xba2   : > { %s9222_s18 = sld [smem:[#allocation8_spill]]  ;;  %s9226_s15 = smov %s4937_s16 }
 0xba3   : > { %s9223_s19 = sld [smem:[#allocation9_spill]]  ;;  %16 = sbr.rel (!%p14_p0) target bundleno = 5 (0x5), region = 82 }
 0xba4   : > { %s9224_s20 = sld [smem:[#allocation10_spill]] }
 0xba5   : > { %s9225_s21 = sld [smem:[#allocation11_spill]] }
 0xba6   : > { %s9227_s16 = smov %s9220_s10 }
 0xba8   :  { %3936 = vsyncpa [#allocation5], 1 }
 0xba9   :  { %3938 = vsyncpa [#allocation5 + $0x1], 1 }

</bundles_post_ra>
